<compile_context>
chip_gen: v5e
topology: v5e:2x2
jax: 0.10.0
libtpu: 0.0.40
codegen_flags: <defaults>
</compile_context>

<pallas_src>
import jax
import jax.numpy as jnp
from jax import lax
from jax.experimental import pallas as pl
from jax.experimental.pallas import tpu as pltpu

INPUT_NC = 64          # forward() hard-codes 64*16*16, so input_nc must be 64
H, W = 16, 16
K = INPUT_NC * H * W   # 16384
HID = INPUT_NC         # 64


def _leaky_relu(x, slope=0.2):
    return jnp.where(x > 0, x, slope * x)


def _fused_kernel(x_ref, w1_ref, b1_ref, w2_ref, b2_ref, w3_ref, b3_ref,
                  o_ref, acc_ref):
    k = pl.program_id(1)

    @pl.when(k == 0)
    def _():
        acc_ref[...] = jnp.zeros_like(acc_ref)

    # fc1 partial: (TB, TK) x (HID, TK), contracted over the lane-dense K axis.
    # bf16 operands on the MXU, f32 accumulation in VMEM scratch.
    acc_ref[...] += lax.dot_general(
        x_ref[...].astype(jnp.bfloat16), w1_ref[...],
        dimension_numbers=(((1,), (1,)), ((), ())),
        preferred_element_type=jnp.float32)

    @pl.when(k == pl.num_programs(1) - 1)
    def _():
        h1 = _leaky_relu(acc_ref[...] + b1_ref[...])                       # (TB, 64)
        h2 = _leaky_relu(
            jnp.dot(h1, w2_ref[...], preferred_element_type=jnp.float32)
            + b2_ref[...])                                                  # (TB, 64)
        # (TB,64)@(64,1) as a VPU broadcast-mul + lane reduction.
        out = jnp.sum(h2 * w3_ref[...], axis=-1, keepdims=True) + b3_ref[...]
        o_ref[...] = out.astype(o_ref.dtype)                               # (TB, 1)


def _choose_tiles(batch):
    # Batch tile: whole batch if small (single step), else 128-row tiles so the
    # "parallel" axis can shard rows across v7x's two TensorCores.
    tb = batch if batch <= 128 else 128
    bp = ((batch + tb - 1) // tb) * tb
    # K tile: largest power-of-two split whose double-buffered working set
    # (x f32 + w1 bf16 per tile) fits in ~24 MiB.  Usually the full K.
    budget = 24 * 1024 * 1024
    num_k = 1
    while num_k < 16:
        tk = K // num_k
        if 2 * tk * (tb * 4 + HID * 2) <= budget:
            break
        num_k *= 2
    return tb, bp, K // num_k


def feature_discriminator(x_nchw, params):
    """x_nchw: (B, 64, 16, 16) float32. Returns (B, 1) float32."""
    w1t, b1, w2, b2, w3, b3 = params   # w1t: (HID, K) bf16, K lane-dense
    B = x_nchw.shape[0]
    x = x_nchw.reshape(B, K)           # row-major == torch .view(-1, 16384)

    TB, Bp, TK = _choose_tiles(B)
    if Bp != B:
        x = jnp.pad(x, ((0, Bp - B), (0, 0)))
    grid = (Bp // TB, K // TK)

    cost = pl.CostEstimate(
        flops=2 * Bp * K * HID + 2 * Bp * HID * HID + 2 * Bp * HID,
        transcendentals=0,
        bytes_accessed=(Bp * K * 4            # x (f32)
                        + HID * K * 2         # w1 (bf16, lane-dense)
                        + HID * HID * 4 + 3 * HID * 4 + 4   # tail params
                        + Bp * 4))            # output

    out = pl.pallas_call(
        _fused_kernel,
        out_shape=jax.ShapeDtypeStruct((Bp, 1), jnp.float32),
        grid=grid,
        in_specs=[
            pl.BlockSpec((TB, TK),   lambda b, k: (b, k)),   # x tile (f32)
            pl.BlockSpec((HID, TK),  lambda b, k: (0, k)),   # w1t tile (bf16)
            pl.BlockSpec((1, HID),   lambda b, k: (0, 0)),   # b1
            pl.BlockSpec((HID, HID), lambda b, k: (0, 0)),   # w2
            pl.BlockSpec((1, HID),   lambda b, k: (0, 0)),   # b2
            pl.BlockSpec((1, HID),   lambda b, k: (0, 0)),   # w3 (row vector)
            pl.BlockSpec((1, 1),     lambda b, k: (0, 0)),   # b3
        ],
        out_specs=pl.BlockSpec((TB, 1), lambda b, k: (b, 0)),
        scratch_shapes=[pltpu.VMEM((TB, HID), jnp.float32)],
        compiler_params=pltpu.CompilerParams(
            dimension_semantics=("parallel", "arbitrary"),
            vmem_limit_bytes=32 * 1024 * 1024),
        cost_estimate=cost,
    )(x, w1t, b1, w2, b2, w3, b3)

    return out[:B] if Bp != B else out


def init_params(key):
    """Synthetic init matching the nn.Linear shapes.  w1 is stored transposed
    and lane-dense as (HID, K) in bf16 (dominant HBM stream); w3 as (1, HID)."""
    k1, k2, k3, k4, k5, k6 = jax.random.split(key, 6)

    def uni(k, shape, fan_in):
        bound = 1.0 / jnp.sqrt(fan_in)
        return jax.random.uniform(k, shape, jnp.float32, -bound, bound)

    w1t = uni(k1, (HID, K), K).astype(jnp.bfloat16)   # (out, in): lane-dense K
    b1 = uni(k2, (1, HID), K)
    w2 = uni(k3, (HID, HID), HID)                     # (in, out)
    b2 = uni(k4, (1, HID), HID)
    w3 = uni(k5, (1, HID), HID)                       # row vector (out=1)
    b3 = uni(k6, (1, 1), HID)
    return (w1t, b1, w2, b2, w3, b3)


def reference(x_nchw, params):
    """Pure-JAX reference using the same bf16 streaming of x/w1 (f32 math)."""
    w1t, b1, w2, b2, w3, b3 = params
    x = x_nchw.reshape(x_nchw.shape[0], K)
    xq = x.astype(jnp.bfloat16).astype(jnp.float32)
    w1f = w1t.astype(jnp.float32).T                   # (K, HID)
    h1 = jax.nn.leaky_relu(xq @ w1f + b1, 0.2)
    h2 = jax.nn.leaky_relu(h1 @ w2 + b2, 0.2)
    return h2 @ w3.T + b3


if __name__ == "__main__":
    key = jax.random.PRNGKey(0)
    kx, kp = jax.random.split(key)

    B = 2
    x = jax.random.normal(kx, (B, INPUT_NC, H, W), jnp.float32)
    params = init_params(kp)

    out = jax.block_until_ready(jax.jit(feature_discriminator)(x, params))

    ref = reference(x, params)
    assert out.shape == (B, 1), out.shape
    assert jnp.allclose(out, ref, atol=2e-3, rtol=2e-3), (out, ref)

    print("KERNEL_OK")
</pallas_src>

<mosaic_0001>
module attributes {stable_mosaic.version = 11 : i64} {
  func.func @_fused_kernel(%arg0: i32, %arg1: i32, %arg2: memref<2x16384xf32, #tpu.memory_space<vmem>>, %arg3: memref<64x16384xbf16, #tpu.memory_space<vmem>>, %arg4: memref<1x64xf32, #tpu.memory_space<vmem>>, %arg5: memref<64x64xf32, #tpu.memory_space<vmem>>, %arg6: memref<1x64xf32, #tpu.memory_space<vmem>>, %arg7: memref<1x64xf32, #tpu.memory_space<vmem>>, %arg8: memref<1x1xf32, #tpu.memory_space<vmem>>, %arg9: memref<2x1xf32, #tpu.memory_space<vmem>>, %arg10: memref<2x64xf32, #tpu.memory_space<vmem>>) attributes {dimension_semantics = [#tpu.dimension_semantics<parallel>, #tpu.dimension_semantics<arbitrary>], iteration_bounds = array<i64: 1, 1>, scalar_prefetch = 0 : i64, scratch_operands = 1 : i64, tpu.core_type = #tpu.core_type<tc>, window_params = [{transform_indices = @transform_0, window_bounds = array<i64: 2, 16384>}, {transform_indices = @transform_1, window_bounds = array<i64: 64, 16384>}, {pipeline_mode = #tpu.pipeline_mode<synchronous>, transform_indices = @transform_2, window_bounds = array<i64: 1, 64>}, {pipeline_mode = #tpu.pipeline_mode<synchronous>, transform_indices = @transform_3, window_bounds = array<i64: 64, 64>}, {pipeline_mode = #tpu.pipeline_mode<synchronous>, transform_indices = @transform_4, window_bounds = array<i64: 1, 64>}, {pipeline_mode = #tpu.pipeline_mode<synchronous>, transform_indices = @transform_5, window_bounds = array<i64: 1, 64>}, {pipeline_mode = #tpu.pipeline_mode<synchronous>, transform_indices = @transform_6, window_bounds = array<i64: 1, 1>}, {transform_indices = @transform_7, window_bounds = array<i64: 2, 1>}]} {
    %c0_i32 = arith.constant 0 : i32
    %0 = arith.cmpi eq, %arg1, %c0_i32 : i32
    %1 = arith.extui %0 : i1 to i32
    %c0_i32_0 = arith.constant 0 : i32
    %2 = arith.cmpi ne, %1, %c0_i32_0 : i32
    scf.if %2 {
      %cst_10 = arith.constant 0.000000e+00 : f32
      %13 = vector.broadcast %cst_10 : f32 to vector<2x64xf32>
      %c0_11 = arith.constant 0 : index
      %c0_12 = arith.constant 0 : index
      %14 = vector.load %arg10[%c0_11, %c0_12] : memref<2x64xf32, #tpu.memory_space<vmem>>, vector<2x64xf32>
      tpu.vector_store %arg10[%c0_11, %c0_12], %13 {strides = array<i32>} : memref<2x64xf32, #tpu.memory_space<vmem>>, vector<2x64xf32>,
    } else {
    }
    %c0 = arith.constant 0 : index
    %c0_1 = arith.constant 0 : index
    %3 = vector.load %arg10[%c0, %c0_1] : memref<2x64xf32, #tpu.memory_space<vmem>>, vector<2x64xf32>
    %c0_2 = arith.constant 0 : index
    %c0_3 = arith.constant 0 : index
    %4 = vector.load %arg2[%c0_2, %c0_3] : memref<2x16384xf32, #tpu.memory_space<vmem>>, vector<2x16384xf32>
    %5 = arith.truncf %4 : vector<2x16384xf32> to vector<2x16384xbf16>
    %c0_4 = arith.constant 0 : index
    %c0_5 = arith.constant 0 : index
    %6 = vector.load %arg3[%c0_4, %c0_5] : memref<64x16384xbf16, #tpu.memory_space<vmem>>, vector<64x16384xbf16>
    %cst = arith.constant dense<0.000000e+00> : vector<2x64xf32>
    %7 = tpu.matmul %5, %6, %cst {dimension_numbers = #tpu.dot_dimension_numbers<[1], [1], [0], [0], [0, 0, 1, 0], [], []>} : vector<2x16384xbf16>, vector<64x16384xbf16>, vector<2x64xf32> -> vector<2x64xf32>
    %8 = arith.addf %3, %7 : vector<2x64xf32>
    %c0_6 = arith.constant 0 : index
    %c0_7 = arith.constant 0 : index
    %9 = vector.load %arg10[%c0_6, %c0_7] : memref<2x64xf32, #tpu.memory_space<vmem>>, vector<2x64xf32>
    tpu.vector_store %arg10[%c0_6, %c0_7], %8 {strides = array<i32>} : memref<2x64xf32, #tpu.memory_space<vmem>>, vector<2x64xf32>,
    %c0_i32_8 = arith.constant 0 : i32
    %10 = arith.cmpi eq, %arg1, %c0_i32_8 : i32
    %11 = arith.extui %10 : i1 to i32
    %c0_i32_9 = arith.constant 0 : i32
    %12 = arith.cmpi ne, %11, %c0_i32_9 : i32
    scf.if %12 {
      %c0_10 = arith.constant 0 : index
      %c0_11 = arith.constant 0 : index
      %13 = vector.load %arg10[%c0_10, %c0_11] : memref<2x64xf32, #tpu.memory_space<vmem>>, vector<2x64xf32>
      %c0_12 = arith.constant 0 : index
      %c0_13 = arith.constant 0 : index
      %14 = vector.load %arg4[%c0_12, %c0_13] : memref<1x64xf32, #tpu.memory_space<vmem>>, vector<1x64xf32>
      %15 = vector.broadcast %14 : vector<1x64xf32> to vector<2x64xf32>
      %16 = arith.addf %13, %15 : vector<2x64xf32>
      %cst_14 = arith.constant 0.000000e+00 : f32
      %17 = vector.broadcast %cst_14 : f32 to vector<2x64xf32>
      %18 = arith.cmpf ogt, %16, %17 : vector<2x64xf32>
      %cst_15 = arith.constant 2.000000e-01 : f32
      %19 = vector.broadcast %cst_15 : f32 to vector<2x64xf32>
      %20 = arith.mulf %19, %16 : vector<2x64xf32>
      %21 = arith.select %18, %16, %20 : vector<2x64xi1>, vector<2x64xf32>
      %c0_16 = arith.constant 0 : index
      %c0_17 = arith.constant 0 : index
      %22 = vector.load %arg5[%c0_16, %c0_17] : memref<64x64xf32, #tpu.memory_space<vmem>>, vector<64x64xf32>
      %cst_18 = arith.constant dense<0.000000e+00> : vector<2x64xf32>
      %23 = tpu.matmul %21, %22, %cst_18 {dimension_numbers = #tpu.dot_dimension_numbers<[1], [0], [0], [1], [0, 0, 1, 1], [], []>} : vector<2x64xf32>, vector<64x64xf32>, vector<2x64xf32> -> vector<2x64xf32>
      %c0_19 = arith.constant 0 : index
      %c0_20 = arith.constant 0 : index
      %24 = vector.load %arg6[%c0_19, %c0_20] : memref<1x64xf32, #tpu.memory_space<vmem>>, vector<1x64xf32>
      %25 = vector.broadcast %24 : vector<1x64xf32> to vector<2x64xf32>
      %26 = arith.addf %23, %25 : vector<2x64xf32>
      %cst_21 = arith.constant 0.000000e+00 : f32
      %27 = vector.broadcast %cst_21 : f32 to vector<2x64xf32>
      %28 = arith.cmpf ogt, %26, %27 : vector<2x64xf32>
      %cst_22 = arith.constant 2.000000e-01 : f32
      %29 = vector.broadcast %cst_22 : f32 to vector<2x64xf32>
      %30 = arith.mulf %29, %26 : vector<2x64xf32>
      %31 = arith.select %28, %26, %30 : vector<2x64xi1>, vector<2x64xf32>
      %c0_23 = arith.constant 0 : index
      %c0_24 = arith.constant 0 : index
      %32 = vector.load %arg7[%c0_23, %c0_24] : memref<1x64xf32, #tpu.memory_space<vmem>>, vector<1x64xf32>
      %33 = vector.broadcast %32 : vector<1x64xf32> to vector<2x64xf32>
      %34 = arith.mulf %31, %33 : vector<2x64xf32>
      %cst_25 = arith.constant dense<0.000000e+00> : vector<2xf32>
      %35 = vector.multi_reduction <add>, %34, %cst_25 [1] : vector<2x64xf32> to vector<2xf32>
      %36 = vector.shape_cast %35 : vector<2xf32> to vector<2x1xf32>
      %c0_26 = arith.constant 0 : index
      %c0_27 = arith.constant 0 : index
      %37 = vector.load %arg8[%c0_26, %c0_27] : memref<1x1xf32, #tpu.memory_space<vmem>>, vector<1x1xf32>
      %38 = vector.broadcast %37 : vector<1x1xf32> to vector<2x1xf32>
      %39 = arith.addf %36, %38 : vector<2x1xf32>
      %c0_28 = arith.constant 0 : index
      %c0_29 = arith.constant 0 : index
      %40 = vector.load %arg9[%c0_28, %c0_29] : memref<2x1xf32, #tpu.memory_space<vmem>>, vector<2x1xf32>
      tpu.vector_store %arg9[%c0_28, %c0_29], %39 {strides = array<i32>} : memref<2x1xf32, #tpu.memory_space<vmem>>, vector<2x1xf32>,
    } else {
    }
    return
  }
  func.func @transform_0(%arg0: i32, %arg1: i32) -> (i32, i32) {
    %c0_i32 = arith.constant 0 : i32
    return %arg0, %arg1 : i32, i32
  }
  func.func @transform_1(%arg0: i32, %arg1: i32) -> (i32, i32) {
    %c0_i32 = arith.constant 0 : i32
    %c0_i32_0 = arith.constant 0 : i32
    return %c0_i32, %arg1 : i32, i32
  }
  func.func @transform_2(%arg0: i32, %arg1: i32) -> (i32, i32) {
    %c0_i32 = arith.constant 0 : i32
    %c0_i32_0 = arith.constant 0 : i32
    %c0_i32_1 = arith.constant 0 : i32
    return %c0_i32, %c0_i32_0 : i32, i32
  }
  func.func @transform_3(%arg0: i32, %arg1: i32) -> (i32, i32) {
    %c0_i32 = arith.constant 0 : i32
    %c0_i32_0 = arith.constant 0 : i32
    %c0_i32_1 = arith.constant 0 : i32
    return %c0_i32, %c0_i32_0 : i32, i32
  }
  func.func @transform_4(%arg0: i32, %arg1: i32) -> (i32, i32) {
    %c0_i32 = arith.constant 0 : i32
    %c0_i32_0 = arith.constant 0 : i32
    %c0_i32_1 = arith.constant 0 : i32
    return %c0_i32, %c0_i32_0 : i32, i32
  }
  func.func @transform_5(%arg0: i32, %arg1: i32) -> (i32, i32) {
    %c0_i32 = arith.constant 0 : i32
    %c0_i32_0 = arith.constant 0 : i32
    %c0_i32_1 = arith.constant 0 : i32
    return %c0_i32, %c0_i32_0 : i32, i32
  }
  func.func @transform_6(%arg0: i32, %arg1: i32) -> (i32, i32) {
    %c0_i32 = arith.constant 0 : i32
    %c0_i32_0 = arith.constant 0 : i32
    %c0_i32_1 = arith.constant 0 : i32
    return %c0_i32, %c0_i32_0 : i32, i32
  }
  func.func @transform_7(%arg0: i32, %arg1: i32) -> (i32, i32) {
    %c0_i32 = arith.constant 0 : i32
    %c0_i32_0 = arith.constant 0 : i32
    return %arg0, %c0_i32 : i32, i32
  }
}

</mosaic_0001>

<bundles_post_ra>
// kernel: feature_discriminator.1
= control target key start
LH: loop header
LB: loop body
LE: loop exit
PB: predicated region body
PF: predicated region fallthrough
CT: control target
= control target key end

     0   :  { %vm33_vm0 = vcmask 517120   ;;  %vm5280_vm2 = vcmask 523264   ;;  %vm5320_vm4 = vcmask 1024   ;;  %s11143_s1 = inlined_call_operand.vmem [shape: bf16[64,16384], index: 1, kind: input, shape index: {}]   ;;  %s11144_s0 = inlined_call_operand.vmem [shape: f32[2,16384], index: 0, kind: input, shape index: {}]   ;;  %s11145_s2 = inlined_call_operand.vmem [shape: f32[1,64], index: 2, kind: input, shape index: {}]   ;;  %s11146_s4 = inlined_call_operand.vmem [shape: f32[1,64], index: 4, kind: input, shape index: {}]   ;;  %s11147_s3 = inlined_call_operand.vmem [shape: f32[64,64], index: 3, kind: input, shape index: {}]   ;;  %s11148_s5 = inlined_call_operand.vmem [shape: f32[1,64], index: 5, kind: input, shape index: {}]   ;;  %s11149_s6 = inlined_call_operand.<no memory space> [shape: f32[1,1], index: 6, kind: input, shape index: {}]   ;;  %s11150_s7 = inlined_call_operand.vmem [shape: f32[2,1], index: 7, kind: output, shape index: {}]  }
   0x1   :  { %v6864_v0 = vld [vmem:[%s11143_s1 + $0xc00] sm:$0xf]  ;;  %v7759_v2 = vld [vmem:[%s11143_s1 + $0xc04] sm:$0xf]  ;;  %v6872_v5 = vld [vmem:[%s11143_s1 + $0xc08] sm:$0xf] }
   0x2   :  { %v7823_v1 = vld [vmem:[%s11143_s1 + $0xdfc] sm:$0xf0]  ;;  %v6866_v4 = vld [vmem:[%s11143_s1 + $0xe00] sm:$0xf0]  ;;  %v7824_v6 = vld [vmem:[%s11143_s1 + $0xe04] sm:$0xf0] }
   0x3   :  { %v6865_v3 = vor.u32 %v7823_v1, %v6864_v0  ;;  %v6869_v7 = vor.u32 %v7759_v2, %v6866_v4  ;;  %v6873_v8 = vor.u32 %v7824_v6, %v6872_v5  ;;  %v7760_v9 = vld [vmem:[%s11143_s1 + $0xc0c] sm:$0xf]  ;;  %v6352_v12 = vld [vmem:[%s11143_s1 + $0x800] sm:$0xf]  ;;  %v7631_v14 = vld [vmem:[%s11143_s1 + $0x804] sm:$0xf] }
   0x4   :  { %v6874_v10 = vld [vmem:[%s11143_s1 + $0xe08] sm:$0xf0]  ;;  %v7695_v13 = vld [vmem:[%s11143_s1 + $0x9fc] sm:$0xf0]  ;;  %v6354_v15 = vld [vmem:[%s11143_s1 + $0xa00] sm:$0xf0] }
   0x5   :  { %3593 = vmatpush.bf16.xpose.msra.mxu0 %v6865_v3  ;;  %v6877_v11 = vor.u32 %v7760_v9, %v6874_v10  ;;  %3606 = vmatpush.bf16.xpose.msra.mxu1 %v6869_v7  ;;  %v6360_v16 = vld [vmem:[%s11143_s1 + $0x808] sm:$0xf]  ;;  %v7632_v18 = vld [vmem:[%s11143_s1 + $0x80c] sm:$0xf]  ;;  %v6353_v20 = vor.u32 %v7695_v13, %v6352_v12  ;;  %v6357_v21 = vor.u32 %v7631_v14, %v6354_v15  ;;  %v5840_v24 = vld [vmem:[%s11143_s1 + $0x400] sm:$0xf] }
   0x6   :  { %3619 = vmatpush.bf16.xpose.msra.mxu2 %v6873_v8  ;;  %v7696_v17 = vld [vmem:[%s11143_s1 + $0xa04] sm:$0xf0]  ;;  %v6362_v19 = vld [vmem:[%s11143_s1 + $0xa08] sm:$0xf0]  ;;  %v7567_v25 = vld [vmem:[%s11143_s1 + $0x5fc] sm:$0xf0] }
   0x7   :  { %3632 = vmatpush.bf16.xpose.msra.mxu3 %v6877_v11  ;;  %v6361_v22 = vor.u32 %v7696_v17, %v6360_v16  ;;  %v6365_v23 = vor.u32 %v7632_v18, %v6362_v19  ;;  %v7503_v26 = vld [vmem:[%s11143_s1 + $0x404] sm:$0xf]  ;;  %v5848_v28 = vld [vmem:[%s11143_s1 + $0x408] sm:$0xf]  ;;  %v7504_v30 = vld [vmem:[%s11143_s1 + $0x40c] sm:$0xf]  ;;  %v5841_v32 = vor.u32 %v7567_v25, %v5840_v24 }
   0x8   :  { %v5842_v27 = vld [vmem:[%s11143_s1 + $0x600] sm:$0xf0]  ;;  %v7568_v29 = vld [vmem:[%s11143_s1 + $0x604] sm:$0xf0]  ;;  %v5850_v31 = vld [vmem:[%s11143_s1 + $0x608] sm:$0xf0] }
   0x9   :  { %v5845_v33 = vor.u32 %v7503_v26, %v5842_v27  ;;  %v5849_v34 = vor.u32 %v7568_v29, %v5848_v28  ;;  %v36_v35 = vld [vmem:[%s11144_s0] sm:$0xff]  ;;  %v5853_v36 = vor.u32 %v7504_v30, %v5850_v31  ;;  %v5336_v41 = vld [vmem:[%s11143_s1 + $0x8] sm:$0xf]  ;;  %v7376_v43 = vld [vmem:[%s11143_s1 + $0xc] sm:$0xf] }
   0xa   :  { %100 = vst [vmem:[#allocation1] ss:$4 sm:$0xff] %v36_v35  ;;  %v5328_v37 = vld [vmem:[%s11143_s1] sm:$0xf]  ;;  %v7375_v39 = vld [vmem:[%s11143_s1 + $0x4] sm:$0xf] }
   0xb   :  { %v7439_v38 = vld [vmem:[%s11143_s1 + $0x1fc] sm:$0xf0]  ;;  %v5330_v40 = vld [vmem:[%s11143_s1 + $0x200] sm:$0xf0]  ;;  %v7440_v42 = vld [vmem:[%s11143_s1 + $0x204] sm:$0xf0] }
   0xc   :  { %v5338_v44 = vld [vmem:[%s11143_s1 + $0x208] sm:$0xf0]  ;;  %v6880_v45 = vld [vmem:[%s11143_s1 + $0xc10] sm:$0xf]  ;;  %v7761_v47 = vld [vmem:[%s11143_s1 + $0xc14] sm:$0xf]  ;;  %v5329_v48 = vor.u32 %v7439_v38, %v5328_v37  ;;  %v5333_v52 = vor.u32 %v7375_v39, %v5330_v40  ;;  %v5337_v53 = vor.u32 %v7440_v42, %v5336_v41 }
   0xd   :  { %3594 = vmatpush.bf16.xpose.msra.mxu0 %v6353_v20  ;;  %3607 = vmatpush.bf16.xpose.msra.mxu1 %v6357_v21  ;;  %v7825_v46 = vld [vmem:[%s11143_s1 + $0xe0c] sm:$0xf0]  ;;  %v6882_v49 = vld [vmem:[%s11143_s1 + $0xe10] sm:$0xf0]  ;;  %v6888_v50 = vld [vmem:[%s11143_s1 + $0xc18] sm:$0xf]  ;;  %v5341_v56 = vor.u32 %v7376_v43, %v5338_v44 }
   0xe   :  { %3620 = vmatpush.bf16.xpose.msra.mxu2 %v6361_v22  ;;  %v7826_v51 = vld [vmem:[%s11143_s1 + $0xe14] sm:$0xf0]  ;;  %v7762_v54 = vld [vmem:[%s11143_s1 + $0xc1c] sm:$0xf]  ;;  %v6881_v57 = vor.u32 %v7825_v46, %v6880_v45  ;;  %v6885_v58 = vor.u32 %v7761_v47, %v6882_v49  ;;  %v37_v60 = vld [vmem:[%s11144_s0 + $0x8] sm:$0xff] }
   0xf   :  { %3633 = vmatpush.bf16.xpose.msra.mxu3 %v6365_v23  ;;  %v6890_v55 = vld [vmem:[%s11143_s1 + $0xe18] sm:$0xf0]  ;;  %v6889_v59 = vor.u32 %v7826_v51, %v6888_v50  ;;  %102 = vst [vmem:[#allocation1 + $0x20] ss:$4 sm:$0xff] %v37_v60  ;;  %v6368_v2 = vld [vmem:[%s11143_s1 + $0x810] sm:$0xf] }
  0x10   :  { %v6893_v61 = vor.u32 %v7762_v54, %v6890_v55  ;;  %v7697_v3 = vld [vmem:[%s11143_s1 + $0xa0c] sm:$0xf0]  ;;  %v7633_v4 = vld [vmem:[%s11143_s1 + $0x814] sm:$0xf]  ;;  %v6376_v7 = vld [vmem:[%s11143_s1 + $0x818] sm:$0xf] }
  0x11   :  { %v103_v62 = vld.sshfl [vmem:[#allocation1] sm:$0xff pattern:$0x73625140]  ;;  %v105_v63 = vld.sshfl [vmem:[#allocation1 + $0x10] sm:$0xff pattern:$0x73625140]  ;;  %v6369_v14 = vor.u32 %v7697_v3, %v6368_v2 }
  0x12   :  { %v104_v0 = vld.sshfl [vmem:[#allocation1 + $0x8] sm:$0xff pattern:$0x73625140]  ;;  %v106_v1 = vld.sshfl [vmem:[#allocation1 + $0x18] sm:$0xff pattern:$0x73625140]  ;;  %v389_v5 = vpack.c.bf16 %v103_v62, %v103_v62  ;;  %v391_v9 = vpack.c.bf16 %v105_v63, %v105_v63 }
  0x13   :  { %v6370_v6 = vld [vmem:[%s11143_s1 + $0xa10] sm:$0xf0]  ;;  %v7698_v8 = vld [vmem:[%s11143_s1 + $0xa14] sm:$0xf0]  ;;  %v390_v10 = vpack.c.bf16 %v104_v0, %v104_v0  ;;  %v7634_v11 = vld [vmem:[%s11143_s1 + $0x81c] sm:$0xf]  ;;  %v392_v13 = vpack.c.bf16 %v106_v1, %v106_v1 }
  0x14   :  { %v6378_v12 = vld [vmem:[%s11143_s1 + $0xa18] sm:$0xf0]  ;;  %v6373_v15 = vor.u32 %v7633_v4, %v6370_v6  ;;  %v6377_v16 = vor.u32 %v7698_v8, %v6376_v7  ;;  %v5856_v18 = vld [vmem:[%s11143_s1 + $0x410] sm:$0xf]  ;;  %v7505_v20 = vld [vmem:[%s11143_s1 + $0x414] sm:$0xf] }
  0x15   :  { %3595 = vmatpush.bf16.xpose.msra.mxu0 %v5841_v32  ;;  %3608 = vmatpush.bf16.xpose.msra.mxu1 %v5845_v33  ;;  %v6381_v17 = vor.u32 %v7634_v11, %v6378_v12  ;;  %v7569_v19 = vld [vmem:[%s11143_s1 + $0x60c] sm:$0xf0]  ;;  %v5858_v21 = vld [vmem:[%s11143_s1 + $0x610] sm:$0xf0]  ;;  %v5864_v22 = vld [vmem:[%s11143_s1 + $0x418] sm:$0xf] }
  0x16   :  { %3621 = vmatpush.bf16.xpose.msra.mxu2 %v5849_v34  ;;  %v7570_v23 = vld [vmem:[%s11143_s1 + $0x614] sm:$0xf0]  ;;  %v7506_v24 = vld [vmem:[%s11143_s1 + $0x41c] sm:$0xf]  ;;  %v5857_v26 = vor.u32 %v7569_v19, %v5856_v18  ;;  %v5861_v27 = vor.u32 %v7505_v20, %v5858_v21  ;;  %v5344_v30 = vld [vmem:[%s11143_s1 + $0x10] sm:$0xf] }
  0x17   :  { %3634 = vmatpush.bf16.xpose.msra.mxu3 %v5853_v36  ;;  %v5866_v25 = vld [vmem:[%s11143_s1 + $0x618] sm:$0xf0]  ;;  %v5865_v28 = vor.u32 %v7570_v23, %v5864_v22  ;;  %v7441_v31 = vld [vmem:[%s11143_s1 + $0x20c] sm:$0xf0]  ;;  %v7377_v32 = vld [vmem:[%s11143_s1 + $0x14] sm:$0xf] }
  0x18   :  { %v5869_v29 = vor.u32 %v7506_v24, %v5866_v25  ;;  %v5346_v33 = vld [vmem:[%s11143_s1 + $0x210] sm:$0xf0]  ;;  %v5352_v34 = vld [vmem:[%s11143_s1 + $0x18] sm:$0xf]  ;;  %v7378_v36 = vld [vmem:[%s11143_s1 + $0x1c] sm:$0xf]  ;;  %v5345_v41 = vor.u32 %v7441_v31, %v5344_v30 }
  0x19   :  { %v7442_v35 = vld [vmem:[%s11143_s1 + $0x214] sm:$0xf0]  ;;  %v5354_v37 = vld [vmem:[%s11143_s1 + $0x218] sm:$0xf0]  ;;  %v6896_v38 = vld [vmem:[%s11143_s1 + $0xc20] sm:$0xf]  ;;  %v5349_v45 = vor.u32 %v7377_v32, %v5346_v33 }
  0x1a   :  { %v7827_v39 = vld [vmem:[%s11143_s1 + $0xe1c] sm:$0xf0]  ;;  %v7763_v40 = vld [vmem:[%s11143_s1 + $0xc24] sm:$0xf]  ;;  %v6904_v43 = vld [vmem:[%s11143_s1 + $0xc28] sm:$0xf]  ;;  %v5353_v46 = vor.u32 %v7442_v35, %v5352_v34  ;;  %v5357_v50 = vor.u32 %v7378_v36, %v5354_v37 }
  0x1b   :  { %v6898_v42 = vld [vmem:[%s11143_s1 + $0xe20] sm:$0xf0]  ;;  %v7828_v44 = vld [vmem:[%s11143_s1 + $0xe24] sm:$0xf0]  ;;  %v7764_v47 = vld [vmem:[%s11143_s1 + $0xc2c] sm:$0xf]  ;;  %v6897_v51 = vor.u32 %v7827_v39, %v6896_v38 }
  0x1c   :  { %v38_v49 = vld [vmem:[%s11144_s0 + $0x10] sm:$0xff]  ;;  %v107_v55 = vld.sshfl [vmem:[#allocation1 + $0x20] sm:$0xff pattern:$0x73625140]  ;;  %v6392_v1 = vld [vmem:[%s11143_s1 + $0x828] sm:$0xf] }
  0x1d   :  { %3596 = vmatpush.bf16.xpose.msra.mxu0 %v5329_v48  ;;  %3609 = vmatpush.bf16.xpose.msra.mxu1 %v5333_v52  ;;  %v6906_v48 = vld [vmem:[%s11143_s1 + $0xe28] sm:$0xf0]  ;;  %111 = vst [vmem:[#allocation1] ss:$4 sm:$0xff] %v38_v49  ;;  %v6901_v52 = vor.u32 %v7763_v40, %v6898_v42  ;;  %v6384_v60 = vld [vmem:[%s11143_s1 + $0x820] sm:$0xf] }
  0x1e   :  { %3622 = vmatpush.bf16.xpose.msra.mxu2 %v5337_v53  ;;  %v6905_v53 = vor.u32 %v7828_v44, %v6904_v43  ;;  %v6909_v54 = vor.u32 %v7764_v47, %v6906_v48  ;;  %v7635_v62 = vld [vmem:[%s11143_s1 + $0x824] sm:$0xf]  ;;  %v7700_v2 = vld [vmem:[%s11143_s1 + $0xa24] sm:$0xf0]  ;;  %v6394_v6 = vld [vmem:[%s11143_s1 + $0xa28] sm:$0xf0] }
  0x1f   :  { %3635 = vmatpush.bf16.xpose.msra.mxu3 %v5341_v56  ;;  %v109_v56 = vld.sshfl [vmem:[#allocation1 + $0x30] sm:$0xff pattern:$0x73625140]  ;;  %v6386_v0 = vld [vmem:[%s11143_s1 + $0xa20] sm:$0xf0]  ;;  %v39_v42 = vld [vmem:[%s11144_s0 + $0x18] sm:$0xff] }
  0x20   :  { %v395_v63 = vpack.c.bf16 %v109_v56, %v109_v56  ;;  %v6389_v8 = vor.u32 %v7635_v62, %v6386_v0  ;;  %v5872_v11 = vld [vmem:[%s11143_s1 + $0x420] sm:$0xf]  ;;  %v5882_v18 = vld [vmem:[%s11143_s1 + $0x628] sm:$0xf0]  ;;  %v7379_v25 = vld [vmem:[%s11143_s1 + $0x24] sm:$0xf] }
  0x21   :  { %v7571_v12 = vld [vmem:[%s11143_s1 + $0x61c] sm:$0xf0]  ;;  %v5370_v30 = vld [vmem:[%s11143_s1 + $0x228] sm:$0xf0]  ;;  %v6912_v31 = vld [vmem:[%s11143_s1 + $0xc30] sm:$0xf] }
  0x22   :  { %v5873_v19 = vor.u32 %v7571_v12, %v5872_v11  ;;  %v5360_v23 = vld [vmem:[%s11143_s1 + $0x20] sm:$0xf]  ;;  %v7829_v32 = vld [vmem:[%s11143_s1 + $0xe2c] sm:$0xf0]  ;;  %v7765_v33 = vld [vmem:[%s11143_s1 + $0xc34] sm:$0xf] }
  0x23   :  { %v7443_v24 = vld [vmem:[%s11143_s1 + $0x21c] sm:$0xf0]  ;;  %v6914_v35 = vld [vmem:[%s11143_s1 + $0xe30] sm:$0xf0]  ;;  %v6920_v36 = vld [vmem:[%s11143_s1 + $0xc38] sm:$0xf]  ;;  %v6913_v44 = vor.u32 %v7829_v32, %v6912_v31 }
  0x24   :  { %3597 = vmatmul.bf16.vlgmr.msra.gmra.mxu0 %v389_v5  ;;  %3610 = vmatmul.bf16.vlgmr.msra.gmra.mxu1 %v390_v10  ;;  %v7636_v5 = vld [vmem:[%s11143_s1 + $0x82c] sm:$0xf]  ;;  %v5361_v34 = vor.u32 %v7443_v24, %v5360_v23  ;;  %v7830_v37 = vld [vmem:[%s11143_s1 + $0xe34] sm:$0xf0]  ;;  %v7766_v40 = vld [vmem:[%s11143_s1 + $0xc3c] sm:$0xf] }
  0x25   :  { %3645 = vmatpush.bf16.xpose.msrb.mxu0 %v6881_v57  ;;  %3658 = vmatpush.bf16.xpose.msrb.mxu1 %v6885_v58  ;;  %v108_v57 = vld.sshfl [vmem:[#allocation1 + $0x28] sm:$0xff pattern:$0x73625140]  ;;  %v110_v58 = vld.sshfl [vmem:[#allocation1 + $0x38] sm:$0xff pattern:$0x73625140]  ;;  %v6397_v10 = vor.u32 %v7636_v5, %v6394_v6 }
  0x26   :  { %3671 = vmatpush.bf16.xpose.msrb.mxu2 %v6889_v59  ;;  %3636 = vmatmul.bf16.vlgmr.msra.gmra.mxu3 %v392_v13  ;;  %v393_v59 = vpack.c.bf16 %v107_v55, %v107_v55  ;;  %v394_v3 = vpack.c.bf16 %v108_v57, %v108_v57  ;;  %v396_v4 = vpack.c.bf16 %v110_v58, %v110_v58  ;;  %v7507_v13 = vld [vmem:[%s11143_s1 + $0x424] sm:$0xf]  ;;  %v115_v49 = vld.sshfl [vmem:[#allocation1 + $0x10] sm:$0xff pattern:$0x73625140] }
  0x27   :  { %3684 = vmatpush.bf16.xpose.msrb.mxu3 %v6893_v61  ;;  %3623 = vmatmul.bf16.vlgmr.msra.gmra.mxu2 %v391_v9  ;;  %v7699_v61 = vld [vmem:[%s11143_s1 + $0xa1c] sm:$0xf0]  ;;  %v6393_v9 = vor.u32 %v7700_v2, %v6392_v1  ;;  %112 = vst [vmem:[#allocation1 + $0x20] ss:$4 sm:$0xff] %v39_v42  ;;  %v7637_v55 = vld [vmem:[%s11143_s1 + $0x834] sm:$0xf]  ;;  %v399_v56 = vpack.c.bf16 %v115_v49, %v115_v49 }
  0x28   :  { %v6385_v7 = vor.u32 %v7699_v61, %v6384_v60  ;;  %v113_v48 = vld.sshfl [vmem:[#allocation1] sm:$0xff pattern:$0x73625140]  ;;  %v6402_v58 = vld [vmem:[%s11143_s1 + $0xa30] sm:$0xf0] }
  0x29   :  { %v7702_v60 = vld [vmem:[%s11143_s1 + $0xa34] sm:$0xf0]  ;;  %v7638_v62 = vld [vmem:[%s11143_s1 + $0x83c] sm:$0xf]  ;;  %v6405_v1 = vor.u32 %v7637_v55, %v6402_v58  ;;  %v7573_v5 = vld [vmem:[%s11143_s1 + $0x62c] sm:$0xf0] }
  0x2a   :  { %v7509_v6 = vld [vmem:[%s11143_s1 + $0x434] sm:$0xf]  ;;  %v5898_v11 = vld [vmem:[%s11143_s1 + $0x638] sm:$0xf0]  ;;  %v6928_v24 = vld [vmem:[%s11143_s1 + $0xc40] sm:$0xf] }
  0x2b   :  { %v5386_v23 = vld [vmem:[%s11143_s1 + $0x238] sm:$0xf0]  ;;  %v7640_v55 = vld [vmem:[%s11143_s1 + $0x84c] sm:$0xf] }
  0x2d   :  { %3646 = vmatpush.bf16.xpose.msrb.mxu0 %v6369_v14  ;;  %3659 = vmatpush.bf16.xpose.msrb.mxu1 %v6373_v15  ;;  %v5874_v14 = vld [vmem:[%s11143_s1 + $0x620] sm:$0xf0]  ;;  %v5880_v15 = vld [vmem:[%s11143_s1 + $0x428] sm:$0xf] }
  0x2e   :  { %3672 = vmatpush.bf16.xpose.msrb.mxu2 %v6377_v16  ;;  %v7572_v16 = vld [vmem:[%s11143_s1 + $0x624] sm:$0xf0]  ;;  %v5877_v20 = vor.u32 %v7507_v13, %v5874_v14  ;;  %v119_v42 = vld.sshfl [vmem:[#allocation1 + $0x30] sm:$0xff pattern:$0x73625140] }
  0x2f   :  { %3685 = vmatpush.bf16.xpose.msrb.mxu3 %v6381_v17  ;;  %v7508_v17 = vld [vmem:[%s11143_s1 + $0x42c] sm:$0xf]  ;;  %v5881_v21 = vor.u32 %v7572_v16, %v5880_v15  ;;  %v5376_v16 = vld [vmem:[%s11143_s1 + $0x30] sm:$0xf]  ;;  %v403_v49 = vpack.c.bf16 %v119_v42, %v119_v42 }
  0x30   :  { %v5885_v22 = vor.u32 %v7508_v17, %v5882_v18  ;;  %v7445_v17 = vld [vmem:[%s11143_s1 + $0x22c] sm:$0xf0]  ;;  %v7381_v18 = vld [vmem:[%s11143_s1 + $0x34] sm:$0xf] }
  0x35   :  { %3647 = vmatpush.bf16.xpose.msrb.mxu0 %v5857_v26  ;;  %3660 = vmatpush.bf16.xpose.msrb.mxu1 %v5861_v27  ;;  %v5362_v26 = vld [vmem:[%s11143_s1 + $0x220] sm:$0xf0]  ;;  %v5368_v27 = vld [vmem:[%s11143_s1 + $0x28] sm:$0xf] }
  0x36   :  { %3673 = vmatpush.bf16.xpose.msrb.mxu2 %v5865_v28  ;;  %v7444_v28 = vld [vmem:[%s11143_s1 + $0x224] sm:$0xf0]  ;;  %v5365_v38 = vor.u32 %v7379_v25, %v5362_v26  ;;  %v7831_v25 = vld [vmem:[%s11143_s1 + $0xe3c] sm:$0xf0]  ;;  %v7767_v26 = vld [vmem:[%s11143_s1 + $0xc44] sm:$0xf] }
  0x37   :  { %3686 = vmatpush.bf16.xpose.msrb.mxu3 %v5869_v29  ;;  %v7380_v29 = vld [vmem:[%s11143_s1 + $0x2c] sm:$0xf]  ;;  %v5369_v39 = vor.u32 %v7444_v28, %v5368_v27  ;;  %v5377_v27 = vor.u32 %v7445_v17, %v5376_v16  ;;  %v6930_v28 = vld [vmem:[%s11143_s1 + $0xe40] sm:$0xf0]  ;;  %v6944_v17 = vld [vmem:[%s11143_s1 + $0xc50] sm:$0xf] }
  0x38   :  { %v5373_v43 = vor.u32 %v7380_v29, %v5370_v30  ;;  %v6936_v29 = vld [vmem:[%s11143_s1 + $0xc48] sm:$0xf]  ;;  %v5402_v16 = vld [vmem:[%s11143_s1 + $0x248] sm:$0xf0] }
  0x39   :  { %v7832_v30 = vld [vmem:[%s11143_s1 + $0xe44] sm:$0xf0] }
  0x3d   :  { %3648 = vmatpush.bf16.xpose.msrb.mxu0 %v5345_v41  ;;  %3661 = vmatpush.bf16.xpose.msrb.mxu1 %v5349_v45  ;;  %v6922_v41 = vld [vmem:[%s11143_s1 + $0xe38] sm:$0xf0]  ;;  %v6917_v45 = vor.u32 %v7765_v33, %v6914_v35  ;;  %v7768_v33 = vld [vmem:[%s11143_s1 + $0xc4c] sm:$0xf]  ;;  %v40_v35 = vld [vmem:[%s11144_s0 + $0x20] sm:$0xff] }
  0x3e   :  { %3674 = vmatpush.bf16.xpose.msrb.mxu2 %v5353_v46  ;;  %v6921_v46 = vor.u32 %v7830_v37, %v6920_v36  ;;  %v6925_v47 = vor.u32 %v7766_v40, %v6922_v41  ;;  %v6929_v37 = vor.u32 %v7831_v25, %v6928_v24  ;;  %v117_v41 = vld.sshfl [vmem:[#allocation1 + $0x20] sm:$0xff pattern:$0x73625140] }
  0x3f   :  { %3687 = vmatpush.bf16.xpose.msrb.mxu3 %v5357_v50  ;;  %v114_v50 = vld.sshfl [vmem:[#allocation1 + $0x8] sm:$0xff pattern:$0x73625140] }
  0x40   :  { %v398_v57 = vpack.c.bf16 %v114_v50, %v114_v50 }
  0x44   :  { %3649 = vmatmul.bf16.vlgmr.msrb.gmra.mxu0 %v393_v59  ;;  %3662 = vmatmul.bf16.vlgmr.msrb.gmra.mxu1 %v394_v3  ;;  %v6408_v59 = vld [vmem:[%s11143_s1 + $0x838] sm:$0xf] }
  0x45   :  { %3697 = vmatpush.bf16.xpose.msra.mxu0 %v6897_v51  ;;  %3710 = vmatpush.bf16.xpose.msra.mxu1 %v6901_v52  ;;  %v116_v51 = vld.sshfl [vmem:[#allocation1 + $0x18] sm:$0xff pattern:$0x73625140]  ;;  %v397_v52 = vpack.c.bf16 %v113_v48, %v113_v48  ;;  %v6409_v2 = vor.u32 %v7702_v60, %v6408_v59  ;;  %v7639_v48 = vld [vmem:[%s11143_s1 + $0x844] sm:$0xf] }
  0x46   :  { %3723 = vmatpush.bf16.xpose.msra.mxu2 %v6905_v53  ;;  %3688 = vmatmul.bf16.vlgmr.msrb.gmra.mxu3 %v396_v4  ;;  %v6400_v53 = vld [vmem:[%s11143_s1 + $0x830] sm:$0xf]  ;;  %v400_v61 = vpack.c.bf16 %v116_v51, %v116_v51  ;;  %121 = vst [vmem:[#allocation1] ss:$4 sm:$0xff] %v40_v35  ;;  %v6418_v51 = vld [vmem:[%s11143_s1 + $0xa40] sm:$0xf0] }
  0x47   :  { %3736 = vmatpush.bf16.xpose.msra.mxu3 %v6909_v54  ;;  %3675 = vmatmul.bf16.vlgmr.msrb.gmra.mxu2 %v395_v63  ;;  %v7701_v54 = vld [vmem:[%s11143_s1 + $0xa2c] sm:$0xf0]  ;;  %v6410_v63 = vld [vmem:[%s11143_s1 + $0xa38] sm:$0xf0]  ;;  %v6421_v58 = vor.u32 %v7639_v48, %v6418_v51 }
  0x48   :  { %v6401_v0 = vor.u32 %v7701_v54, %v6400_v53  ;;  %v6413_v3 = vor.u32 %v7638_v62, %v6410_v63  ;;  %v5888_v4 = vld [vmem:[%s11143_s1 + $0x430] sm:$0xf]  ;;  %v7704_v53 = vld [vmem:[%s11143_s1 + $0xa44] sm:$0xf0]  ;;  %v7575_v62 = vld [vmem:[%s11143_s1 + $0x63c] sm:$0xf0] }
  0x49   :  { %v5889_v12 = vor.u32 %v7573_v5, %v5888_v4  ;;  %v7511_v63 = vld [vmem:[%s11143_s1 + $0x444] sm:$0xf]  ;;  %v5914_v4 = vld [vmem:[%s11143_s1 + $0x648] sm:$0xf0]  ;;  %v7642_v48 = vld [vmem:[%s11143_s1 + $0x85c] sm:$0xf] }
  0x4d   :  { %3698 = vmatpush.bf16.xpose.msra.mxu0 %v6385_v7  ;;  %3711 = vmatpush.bf16.xpose.msra.mxu1 %v6389_v8  ;;  %v5890_v7 = vld [vmem:[%s11143_s1 + $0x630] sm:$0xf0]  ;;  %v5896_v8 = vld [vmem:[%s11143_s1 + $0x438] sm:$0xf] }
  0x4e   :  { %3724 = vmatpush.bf16.xpose.msra.mxu2 %v6393_v9  ;;  %v7574_v9 = vld [vmem:[%s11143_s1 + $0x634] sm:$0xf0]  ;;  %v5893_v13 = vor.u32 %v7509_v6, %v5890_v7  ;;  %v125_v35 = vld.sshfl [vmem:[#allocation1 + $0x10] sm:$0xff pattern:$0x73625140] }
  0x4f   :  { %3737 = vmatpush.bf16.xpose.msra.mxu3 %v6397_v10  ;;  %v7510_v10 = vld [vmem:[%s11143_s1 + $0x43c] sm:$0xf]  ;;  %v5897_v14 = vor.u32 %v7574_v9, %v5896_v8  ;;  %v5392_v9 = vld [vmem:[%s11143_s1 + $0x40] sm:$0xf]  ;;  %v407_v42 = vpack.c.bf16 %v125_v35, %v125_v35  ;;  %v7643_v35 = vld [vmem:[%s11143_s1 + $0x864] sm:$0xf] }
  0x50   :  { %v5901_v15 = vor.u32 %v7510_v10, %v5898_v11  ;;  %v7447_v10 = vld [vmem:[%s11143_s1 + $0x23c] sm:$0xf0]  ;;  %v7383_v11 = vld [vmem:[%s11143_s1 + $0x44] sm:$0xf] }
  0x55   :  { %3699 = vmatpush.bf16.xpose.msra.mxu0 %v5873_v19  ;;  %3712 = vmatpush.bf16.xpose.msra.mxu1 %v5877_v20  ;;  %v5378_v19 = vld [vmem:[%s11143_s1 + $0x230] sm:$0xf0]  ;;  %v5384_v20 = vld [vmem:[%s11143_s1 + $0x38] sm:$0xf] }
  0x56   :  { %3725 = vmatpush.bf16.xpose.msra.mxu2 %v5881_v21  ;;  %v7446_v21 = vld [vmem:[%s11143_s1 + $0x234] sm:$0xf0]  ;;  %v5381_v31 = vor.u32 %v7381_v18, %v5378_v19  ;;  %v7833_v18 = vld [vmem:[%s11143_s1 + $0xe4c] sm:$0xf0]  ;;  %v7769_v19 = vld [vmem:[%s11143_s1 + $0xc54] sm:$0xf] }
  0x57   :  { %3738 = vmatpush.bf16.xpose.msra.mxu3 %v5885_v22  ;;  %v7382_v22 = vld [vmem:[%s11143_s1 + $0x3c] sm:$0xf]  ;;  %v5385_v32 = vor.u32 %v7446_v21, %v5384_v20  ;;  %v5393_v20 = vor.u32 %v7447_v10, %v5392_v9  ;;  %v6946_v21 = vld [vmem:[%s11143_s1 + $0xe50] sm:$0xf0]  ;;  %v6960_v10 = vld [vmem:[%s11143_s1 + $0xc60] sm:$0xf] }
  0x58   :  { %v5389_v36 = vor.u32 %v7382_v22, %v5386_v23  ;;  %v6952_v22 = vld [vmem:[%s11143_s1 + $0xc58] sm:$0xf]  ;;  %v5418_v9 = vld [vmem:[%s11143_s1 + $0x258] sm:$0xf0] }
  0x59   :  { %v7834_v23 = vld [vmem:[%s11143_s1 + $0xe54] sm:$0xf0] }
  0x5d   :  { %3700 = vmatpush.bf16.xpose.msra.mxu0 %v5361_v34  ;;  %3713 = vmatpush.bf16.xpose.msra.mxu1 %v5365_v38  ;;  %v6938_v34 = vld [vmem:[%s11143_s1 + $0xe48] sm:$0xf0]  ;;  %v6933_v38 = vor.u32 %v7767_v26, %v6930_v28  ;;  %v7770_v26 = vld [vmem:[%s11143_s1 + $0xc5c] sm:$0xf] }
  0x5e   :  { %3726 = vmatpush.bf16.xpose.msra.mxu2 %v5369_v39  ;;  %v6937_v39 = vor.u32 %v7832_v30, %v6936_v29  ;;  %v6941_v40 = vor.u32 %v7768_v33, %v6938_v34  ;;  %v41_v28 = vld [vmem:[%s11144_s0 + $0x28] sm:$0xff]  ;;  %v6945_v30 = vor.u32 %v7833_v18, %v6944_v17  ;;  %v123_v34 = vld.sshfl [vmem:[#allocation1] sm:$0xff pattern:$0x73625140] }
  0x5f   :  { %3739 = vmatpush.bf16.xpose.msra.mxu3 %v5373_v43  ;;  %v118_v43 = vld.sshfl [vmem:[#allocation1 + $0x28] sm:$0xff pattern:$0x73625140] }
  0x60   :  { %v402_v50 = vpack.c.bf16 %v118_v43, %v118_v43 }
  0x64   :  { %3701 = vmatmul.bf16.vlgmr.msra.gmra.mxu0 %v397_v52  ;;  %3714 = vmatmul.bf16.vlgmr.msra.gmra.mxu1 %v398_v57  ;;  %v6424_v52 = vld [vmem:[%s11143_s1 + $0x848] sm:$0xf] }
  0x65   :  { %3749 = vmatpush.bf16.xpose.msrb.mxu0 %v6913_v44  ;;  %3762 = vmatpush.bf16.xpose.msrb.mxu1 %v6917_v45  ;;  %v120_v44 = vld.sshfl [vmem:[#allocation1 + $0x38] sm:$0xff pattern:$0x73625140]  ;;  %v401_v45 = vpack.c.bf16 %v117_v41, %v117_v41  ;;  %v6425_v59 = vor.u32 %v7704_v53, %v6424_v52  ;;  %v7641_v41 = vld [vmem:[%s11143_s1 + $0x854] sm:$0xf] }
  0x66   :  { %3775 = vmatpush.bf16.xpose.msrb.mxu2 %v6921_v46  ;;  %3740 = vmatmul.bf16.vlgmr.msra.gmra.mxu3 %v400_v61  ;;  %v6416_v46 = vld [vmem:[%s11143_s1 + $0x840] sm:$0xf]  ;;  %v404_v54 = vpack.c.bf16 %v120_v44, %v120_v44  ;;  %122 = vst [vmem:[#allocation1 + $0x20] ss:$4 sm:$0xff] %v41_v28  ;;  %v6434_v44 = vld [vmem:[%s11143_s1 + $0xa50] sm:$0xf0] }
  0x67   :  { %3788 = vmatpush.bf16.xpose.msrb.mxu3 %v6925_v47  ;;  %3727 = vmatmul.bf16.vlgmr.msra.gmra.mxu2 %v399_v56  ;;  %v7703_v47 = vld [vmem:[%s11143_s1 + $0xa3c] sm:$0xf0]  ;;  %v6426_v56 = vld [vmem:[%s11143_s1 + $0xa48] sm:$0xf0]  ;;  %v6437_v51 = vor.u32 %v7641_v41, %v6434_v44  ;;  %v7708_v41 = vld [vmem:[%s11143_s1 + $0xa64] sm:$0xf0] }
  0x68   :  { %v6417_v57 = vor.u32 %v7703_v47, %v6416_v46  ;;  %v6429_v60 = vor.u32 %v7640_v55, %v6426_v56  ;;  %v5904_v61 = vld [vmem:[%s11143_s1 + $0x440] sm:$0xf]  ;;  %v7706_v46 = vld [vmem:[%s11143_s1 + $0xa54] sm:$0xf0]  ;;  %v7577_v55 = vld [vmem:[%s11143_s1 + $0x64c] sm:$0xf0] }
  0x69   :  { %v5905_v5 = vor.u32 %v7575_v62, %v5904_v61  ;;  %v7513_v56 = vld [vmem:[%s11143_s1 + $0x454] sm:$0xf]  ;;  %v5930_v61 = vld [vmem:[%s11143_s1 + $0x658] sm:$0xf0]  ;;  %v7644_v44 = vld [vmem:[%s11143_s1 + $0x86c] sm:$0xf] }
  0x6d   :  { %3750 = vmatpush.bf16.xpose.msrb.mxu0 %v6401_v0  ;;  %3763 = vmatpush.bf16.xpose.msrb.mxu1 %v6405_v1  ;;  %v5906_v0 = vld [vmem:[%s11143_s1 + $0x640] sm:$0xf0]  ;;  %v5912_v1 = vld [vmem:[%s11143_s1 + $0x448] sm:$0xf] }
  0x6e   :  { %3776 = vmatpush.bf16.xpose.msrb.mxu2 %v6409_v2  ;;  %v7576_v2 = vld [vmem:[%s11143_s1 + $0x644] sm:$0xf0]  ;;  %v5909_v6 = vor.u32 %v7511_v63, %v5906_v0  ;;  %v129_v28 = vld.sshfl [vmem:[#allocation1 + $0x30] sm:$0xff pattern:$0x73625140] }
  0x6f   :  { %3789 = vmatpush.bf16.xpose.msrb.mxu3 %v6413_v3  ;;  %v7512_v3 = vld [vmem:[%s11143_s1 + $0x44c] sm:$0xf]  ;;  %v5913_v7 = vor.u32 %v7576_v2, %v5912_v1  ;;  %v5408_v2 = vld [vmem:[%s11143_s1 + $0x50] sm:$0xf] }
  0x70   :  { %v5917_v8 = vor.u32 %v7512_v3, %v5914_v4  ;;  %v7449_v3 = vld [vmem:[%s11143_s1 + $0x24c] sm:$0xf0]  ;;  %v7385_v4 = vld [vmem:[%s11143_s1 + $0x54] sm:$0xf] }
  0x75   :  { %3751 = vmatpush.bf16.xpose.msrb.mxu0 %v5889_v12  ;;  %3764 = vmatpush.bf16.xpose.msrb.mxu1 %v5893_v13  ;;  %v5394_v12 = vld [vmem:[%s11143_s1 + $0x240] sm:$0xf0]  ;;  %v5400_v13 = vld [vmem:[%s11143_s1 + $0x48] sm:$0xf] }
  0x76   :  { %3777 = vmatpush.bf16.xpose.msrb.mxu2 %v5897_v14  ;;  %v7448_v14 = vld [vmem:[%s11143_s1 + $0x244] sm:$0xf0]  ;;  %v5397_v24 = vor.u32 %v7383_v11, %v5394_v12  ;;  %v7835_v11 = vld [vmem:[%s11143_s1 + $0xe5c] sm:$0xf0]  ;;  %v7771_v12 = vld [vmem:[%s11143_s1 + $0xc64] sm:$0xf] }
  0x77   :  { %3790 = vmatpush.bf16.xpose.msrb.mxu3 %v5901_v15  ;;  %v7384_v15 = vld [vmem:[%s11143_s1 + $0x4c] sm:$0xf]  ;;  %v5401_v25 = vor.u32 %v7448_v14, %v5400_v13  ;;  %v5409_v13 = vor.u32 %v7449_v3, %v5408_v2  ;;  %v6962_v14 = vld [vmem:[%s11143_s1 + $0xe60] sm:$0xf0] }
  0x78   :  { %v5405_v29 = vor.u32 %v7384_v15, %v5402_v16  ;;  %v6968_v15 = vld [vmem:[%s11143_s1 + $0xc68] sm:$0xf] }
  0x79   :  { %v7836_v16 = vld [vmem:[%s11143_s1 + $0xe64] sm:$0xf0] }
  0x7d   :  { %3752 = vmatpush.bf16.xpose.msrb.mxu0 %v5377_v27  ;;  %3765 = vmatpush.bf16.xpose.msrb.mxu1 %v5381_v31  ;;  %v6954_v27 = vld [vmem:[%s11143_s1 + $0xe58] sm:$0xf0]  ;;  %v6949_v31 = vor.u32 %v7769_v19, %v6946_v21  ;;  %v7772_v19 = vld [vmem:[%s11143_s1 + $0xc6c] sm:$0xf]  ;;  %v42_v21 = vld [vmem:[%s11144_s0 + $0x30] sm:$0xff] }
  0x7e   :  { %3778 = vmatpush.bf16.xpose.msrb.mxu2 %v5385_v32  ;;  %v6953_v32 = vor.u32 %v7834_v23, %v6952_v22  ;;  %v6957_v33 = vor.u32 %v7770_v26, %v6954_v27  ;;  %v6961_v23 = vor.u32 %v7835_v11, %v6960_v10  ;;  %v127_v27 = vld.sshfl [vmem:[#allocation1 + $0x20] sm:$0xff pattern:$0x73625140]  ;;  %v5432_v10 = vld [vmem:[%s11143_s1 + $0x68] sm:$0xf] }
  0x7f   :  { %3791 = vmatpush.bf16.xpose.msrb.mxu3 %v5389_v36  ;;  %v124_v36 = vld.sshfl [vmem:[#allocation1 + $0x8] sm:$0xff pattern:$0x73625140] }
  0x80   :  { %v406_v43 = vpack.c.bf16 %v124_v36, %v124_v36  ;;  %v7452_v11 = vld [vmem:[%s11143_s1 + $0x264] sm:$0xf0] }
  0x84   :  { %3753 = vmatmul.bf16.vlgmr.msrb.gmra.mxu0 %v401_v45  ;;  %3766 = vmatmul.bf16.vlgmr.msrb.gmra.mxu1 %v402_v50  ;;  %v6440_v45 = vld [vmem:[%s11143_s1 + $0x858] sm:$0xf] }
  0x85   :  { %3801 = vmatpush.bf16.xpose.msra.mxu0 %v6929_v37  ;;  %3814 = vmatpush.bf16.xpose.msra.mxu1 %v6933_v38  ;;  %v126_v37 = vld.sshfl [vmem:[#allocation1 + $0x18] sm:$0xff pattern:$0x73625140]  ;;  %v405_v38 = vpack.c.bf16 %v123_v34, %v123_v34  ;;  %v6441_v52 = vor.u32 %v7706_v46, %v6440_v45  ;;  %v7707_v34 = vld [vmem:[%s11143_s1 + $0xa5c] sm:$0xf0] }
  0x86   :  { %3827 = vmatpush.bf16.xpose.msra.mxu2 %v6937_v39  ;;  %3792 = vmatmul.bf16.vlgmr.msrb.gmra.mxu3 %v404_v54  ;;  %v6432_v39 = vld [vmem:[%s11143_s1 + $0x850] sm:$0xf]  ;;  %v408_v47 = vpack.c.bf16 %v126_v37, %v126_v37  ;;  %131 = vst [vmem:[#allocation1] ss:$4 sm:$0xff] %v42_v21  ;;  %v411_v37 = vpack.c.bf16 %v129_v28, %v129_v28  ;;  %v6458_v45 = vld [vmem:[%s11143_s1 + $0xa68] sm:$0xf0] }
  0x87   :  { %3840 = vmatpush.bf16.xpose.msra.mxu3 %v6941_v40  ;;  %3779 = vmatmul.bf16.vlgmr.msrb.gmra.mxu2 %v403_v49  ;;  %v7705_v40 = vld [vmem:[%s11143_s1 + $0xa4c] sm:$0xf0]  ;;  %v6442_v49 = vld [vmem:[%s11143_s1 + $0xa58] sm:$0xf0] }
  0x88   :  { %v6433_v50 = vor.u32 %v7705_v40, %v6432_v39  ;;  %v6445_v53 = vor.u32 %v7642_v48, %v6442_v49  ;;  %v5920_v54 = vld [vmem:[%s11143_s1 + $0x450] sm:$0xf]  ;;  %v6450_v39 = vld [vmem:[%s11143_s1 + $0xa60] sm:$0xf0]  ;;  %v6456_v40 = vld [vmem:[%s11143_s1 + $0x868] sm:$0xf]  ;;  %v6461_v49 = vor.u32 %v7644_v44, %v6458_v45 }
  0x89   :  { %v5921_v62 = vor.u32 %v7577_v55, %v5920_v54  ;;  %v6457_v48 = vor.u32 %v7708_v41, %v6456_v40  ;;  %v5936_v54 = vld [vmem:[%s11143_s1 + $0x460] sm:$0xf]  ;;  %v7645_v40 = vld [vmem:[%s11143_s1 + $0x874] sm:$0xf]  ;;  %v6472_v45 = vld [vmem:[%s11143_s1 + $0x878] sm:$0xf] }
  0x8a   :  { %v7579_v55 = vld [vmem:[%s11143_s1 + $0x65c] sm:$0xf0]  ;;  %v6466_v44 = vld [vmem:[%s11143_s1 + $0xa70] sm:$0xf0] }
  0x8d   :  { %3802 = vmatpush.bf16.xpose.msra.mxu0 %v6417_v57  ;;  %3815 = vmatpush.bf16.xpose.msra.mxu1 %v6421_v58  ;;  %v5922_v57 = vld [vmem:[%s11143_s1 + $0x650] sm:$0xf0]  ;;  %v5928_v58 = vld [vmem:[%s11143_s1 + $0x458] sm:$0xf] }
  0x8e   :  { %3828 = vmatpush.bf16.xpose.msra.mxu2 %v6425_v59  ;;  %v7578_v59 = vld [vmem:[%s11143_s1 + $0x654] sm:$0xf0]  ;;  %v5925_v63 = vor.u32 %v7513_v56, %v5922_v57  ;;  %v7515_v56 = vld [vmem:[%s11143_s1 + $0x464] sm:$0xf] }
  0x8f   :  { %3841 = vmatpush.bf16.xpose.msra.mxu3 %v6429_v60  ;;  %v7514_v60 = vld [vmem:[%s11143_s1 + $0x45c] sm:$0xf]  ;;  %v5929_v0 = vor.u32 %v7578_v59, %v5928_v58  ;;  %v5938_v58 = vld [vmem:[%s11143_s1 + $0x660] sm:$0xf0]  ;;  %v5944_v59 = vld [vmem:[%s11143_s1 + $0x468] sm:$0xf] }
  0x90   :  { %v5933_v1 = vor.u32 %v7514_v60, %v5930_v61  ;;  %v7580_v60 = vld [vmem:[%s11143_s1 + $0x664] sm:$0xf0] }
  0x91   :  { %v5945_v2 = vor.u32 %v7580_v60, %v5944_v59  ;;  %v5952_v59 = vld [vmem:[%s11143_s1 + $0x470] sm:$0xf] }
  0x92   :  { %v7581_v60 = vld [vmem:[%s11143_s1 + $0x66c] sm:$0xf0] }
  0x95   :  { %3803 = vmatpush.bf16.xpose.msra.mxu0 %v5905_v5  ;;  %3816 = vmatpush.bf16.xpose.msra.mxu1 %v5909_v6  ;;  %v5410_v5 = vld [vmem:[%s11143_s1 + $0x250] sm:$0xf0]  ;;  %v5416_v6 = vld [vmem:[%s11143_s1 + $0x58] sm:$0xf] }
  0x96   :  { %3829 = vmatpush.bf16.xpose.msra.mxu2 %v5913_v7  ;;  %v7450_v7 = vld [vmem:[%s11143_s1 + $0x254] sm:$0xf0]  ;;  %v5413_v17 = vor.u32 %v7385_v4, %v5410_v5  ;;  %v5424_v5 = vld [vmem:[%s11143_s1 + $0x60] sm:$0xf] }
  0x97   :  { %3842 = vmatpush.bf16.xpose.msra.mxu3 %v5917_v8  ;;  %v7386_v8 = vld [vmem:[%s11143_s1 + $0x5c] sm:$0xf]  ;;  %v5417_v18 = vor.u32 %v7450_v7, %v5416_v6  ;;  %v7451_v6 = vld [vmem:[%s11143_s1 + $0x25c] sm:$0xf0] }
  0x98   :  { %v5421_v22 = vor.u32 %v7386_v8, %v5418_v9  ;;  %v7387_v8 = vld [vmem:[%s11143_s1 + $0x64] sm:$0xf] }
  0x99   :  { %v5426_v9 = vld [vmem:[%s11143_s1 + $0x260] sm:$0xf0] }
  0x9a   :  { %v5429_v21 = vor.u32 %v7387_v8, %v5426_v9 }
  0x9d   :  { %3804 = vmatpush.bf16.xpose.msra.mxu0 %v5393_v20  ;;  %3817 = vmatpush.bf16.xpose.msra.mxu1 %v5397_v24  ;;  %v6970_v20 = vld [vmem:[%s11143_s1 + $0xe68] sm:$0xf0]  ;;  %v6965_v24 = vor.u32 %v7771_v12, %v6962_v14  ;;  %v6976_v14 = vld [vmem:[%s11143_s1 + $0xc70] sm:$0xf] }
  0x9e   :  { %3830 = vmatpush.bf16.xpose.msra.mxu2 %v5401_v25  ;;  %v6969_v25 = vor.u32 %v7836_v16, %v6968_v15  ;;  %v6973_v26 = vor.u32 %v7772_v19, %v6970_v20  ;;  %v7388_v12 = vld [vmem:[%s11143_s1 + $0x6c] sm:$0xf]  ;;  %v7837_v15 = vld [vmem:[%s11143_s1 + $0xe6c] sm:$0xf0]  ;;  %v7773_v16 = vld [vmem:[%s11143_s1 + $0xc74] sm:$0xf] }
  0x9f   :  { %3843 = vmatpush.bf16.xpose.msra.mxu3 %v5405_v29  ;;  %v128_v29 = vld.sshfl [vmem:[#allocation1 + $0x28] sm:$0xff pattern:$0x73625140]  ;;  %v6984_v19 = vld [vmem:[%s11143_s1 + $0xc78] sm:$0xf] }
  0xa0   :  { %v7838_v20 = vld [vmem:[%s11143_s1 + $0xe74] sm:$0xf0] }
  0xa1   :  { %v3611_v36 = vpop.f32.mrf.mxu1 }
  0xa4   :  { %3805 = vmatmul.bf16.vlgmr.msra.gmra.mxu0 %v405_v38  ;;  %3818 = vmatmul.bf16.vlgmr.msra.gmra.mxu1 %v406_v43  ;;  %v410_v38 = vpack.c.bf16 %v128_v29, %v128_v29  ;;  %v6985_v29 = vor.u32 %v7838_v20, %v6984_v19  ;;  %v6992_v19 = vld [vmem:[%s11143_s1 + $0xc80] sm:$0xf] }
  0xa5   :  { %3853 = vmatpush.bf16.xpose.msrb.mxu0 %v6945_v30  ;;  %3866 = vmatpush.bf16.xpose.msrb.mxu1 %v6949_v31  ;;  %v130_v30 = vld.sshfl [vmem:[#allocation1 + $0x38] sm:$0xff pattern:$0x73625140]  ;;  %v3598_v31 = vpop.f32.mrf.mxu0  ;;  %v7839_v20 = vld [vmem:[%s11143_s1 + $0xe7c] sm:$0xf0] }
  0xa6   :  { %3879 = vmatpush.bf16.xpose.msrb.mxu2 %v6953_v32  ;;  %3844 = vmatmul.bf16.vlgmr.msra.gmra.mxu3 %v408_v47  ;;  %v409_v32 = vpack.c.bf16 %v127_v27, %v127_v27  ;;  %v412_v43 = vpack.c.bf16 %v130_v30, %v130_v30  ;;  %v6453_v47 = vor.u32 %v7643_v35, %v6450_v39  ;;  %v136_v35 = vld.sshfl [vmem:[#allocation1 + $0x18] sm:$0xff pattern:$0x73625140]  ;;  %v7709_v39 = vld [vmem:[%s11143_s1 + $0xa6c] sm:$0xf0] }
  0xa7   :  { %3892 = vmatpush.bf16.xpose.msrb.mxu3 %v6957_v33  ;;  %3831 = vmatmul.bf16.vlgmr.msra.gmra.mxu2 %v407_v42  ;;  %v6448_v33 = vld [vmem:[%s11143_s1 + $0x860] sm:$0xf]  ;;  %v3612_v42 = vadd.f32 %v3611_v36, %v3598_v31  ;;  %v6977_v27 = vor.u32 %v7837_v15, %v6976_v14  ;;  %v5442_v14 = vld [vmem:[%s11143_s1 + $0x270] sm:$0xf0]  ;;  %v5448_v15 = vld [vmem:[%s11143_s1 + $0x78] sm:$0xf] }
  0xa8   :  { %v6449_v46 = vor.u32 %v7707_v34, %v6448_v33  ;;  %v133_v31 = vld.sshfl [vmem:[#allocation1] sm:$0xff pattern:$0x73625140]  ;;  %v134_v33 = vld.sshfl [vmem:[#allocation1 + $0x8] sm:$0xff pattern:$0x73625140] }
  0xa9   :  { %v3613_v57 = vpop.f32.mrf.mxu1  ;;  %v413_v36 = vpack.c.bf16 %v133_v31, %v133_v31 }
  0xad   :  { %3854 = vmatpush.bf16.xpose.msrb.mxu0 %v6433_v50  ;;  %3867 = vmatpush.bf16.xpose.msrb.mxu1 %v6437_v51  ;;  %v3624_v50 = vpop.f32.mrf.mxu2 }
  0xae   :  { %3880 = vmatpush.bf16.xpose.msrb.mxu2 %v6441_v52  ;;  %v3625_v51 = vadd.f32 %v3624_v50, %v3612_v42  ;;  %v3637_v52 = vpop.f32.mrf.mxu3 }
  0xaf   :  { %3893 = vmatpush.bf16.xpose.msrb.mxu3 %v6445_v53  ;;  %v3600_v53 = vpop.f32.mrf.mxu0 }
  0xb0   :  { %v3638_v61 = vadd.f32 %v3637_v52, %v3625_v51  ;;  %v6469_v52 = vor.u32 %v7645_v40, %v6466_v44  ;;  %v6480_v44 = vld [vmem:[%s11143_s1 + $0x880] sm:$0xf] }
  0xb5   :  { %3855 = vmatpush.bf16.xpose.msrb.mxu0 %v5921_v62  ;;  %3868 = vmatpush.bf16.xpose.msrb.mxu1 %v5925_v63  ;;  %v7516_v62 = vld [vmem:[%s11143_s1 + $0x46c] sm:$0xf]  ;;  %v3626_v4 = vpop.f32.mrf.mxu2 }
  0xb6   :  { %3881 = vmatpush.bf16.xpose.msrb.mxu2 %v5929_v0  ;;  %v5946_v63 = vld [vmem:[%s11143_s1 + $0x668] sm:$0xf0]  ;;  %v5937_v0 = vor.u32 %v7579_v55, %v5936_v54  ;;  %v3639_v7 = vpop.f32.mrf.mxu3  ;;  %v5962_v4 = vld [vmem:[%s11143_s1 + $0x678] sm:$0xf0] }
  0xb7   :  { %3894 = vmatpush.bf16.xpose.msrb.mxu3 %v5933_v1  ;;  %v5941_v1 = vor.u32 %v7515_v56, %v5938_v58  ;;  %v5949_v3 = vor.u32 %v7516_v62, %v5946_v63 }
  0xbd   :  { %3856 = vmatpush.bf16.xpose.msrb.mxu0 %v5409_v13  ;;  %3869 = vmatpush.bf16.xpose.msrb.mxu1 %v5413_v17  ;;  %v5434_v13 = vld [vmem:[%s11143_s1 + $0x268] sm:$0xf0]  ;;  %v5425_v17 = vor.u32 %v7451_v6, %v5424_v5  ;;  %v5953_v5 = vor.u32 %v7581_v60, %v5952_v59 }
  0xbe   :  { %3882 = vmatpush.bf16.xpose.msrb.mxu2 %v5417_v18  ;;  %v6978_v18 = vld [vmem:[%s11143_s1 + $0xe70] sm:$0xf0] }
  0xbf   :  { %3895 = vmatpush.bf16.xpose.msrb.mxu3 %v5421_v22  ;;  %v5433_v22 = vor.u32 %v7452_v11, %v5432_v10  ;;  %v6981_v28 = vor.u32 %v7773_v16, %v6978_v18  ;;  %v5440_v10 = vld [vmem:[%s11143_s1 + $0x70] sm:$0xf]  ;;  %v7454_v16 = vld [vmem:[%s11143_s1 + $0x274] sm:$0xf0]  ;;  %v5450_v18 = vld [vmem:[%s11143_s1 + $0x278] sm:$0xf0] }
  0xc0   :  { %v7453_v11 = vld [vmem:[%s11143_s1 + $0x26c] sm:$0xf0] }
  0xc1   :  { %v3650_v34 = vpop.f32.mrf.mxu0  ;;  %v3663_v41 = vpop.f32.mrf.mxu1 }
  0xc4   :  { %3857 = vmatmul.bf16.vlgmr.msrb.gmra.mxu0 %v409_v32  ;;  %3870 = vmatmul.bf16.vlgmr.msrb.gmra.mxu1 %v410_v38  ;;  %v135_v32 = vld.sshfl [vmem:[#allocation1 + $0x10] sm:$0xff pattern:$0x73625140] }
  0xc5   :  { %3905 = vmatpush.bf16.xpose.msra.mxu0 %v6961_v23  ;;  %3918 = vmatpush.bf16.xpose.msra.mxu1 %v6965_v24  ;;  %v7774_v23 = vld [vmem:[%s11143_s1 + $0xc7c] sm:$0xf]  ;;  %v6464_v38 = vld [vmem:[%s11143_s1 + $0x870] sm:$0xf]  ;;  %v415_v42 = vpack.c.bf16 %v135_v32, %v135_v32  ;;  %v6993_v32 = vor.u32 %v7839_v20, %v6992_v19  ;;  %v5458_v19 = vld [vmem:[%s11143_s1 + $0x280] sm:$0xf0] }
  0xc6   :  { %3931 = vmatpush.bf16.xpose.msra.mxu2 %v6969_v25  ;;  %3896 = vmatmul.bf16.vlgmr.msrb.gmra.mxu3 %v412_v43  ;;  %v6986_v24 = vld [vmem:[%s11143_s1 + $0xe78] sm:$0xf0]  ;;  %v414_v43 = vpack.c.bf16 %v134_v33, %v134_v33  ;;  %v6465_v51 = vor.u32 %v7709_v39, %v6464_v38  ;;  %v5464_v20 = vld [vmem:[%s11143_s1 + $0x88] sm:$0xf] }
  0xc7   :  { %3944 = vmatpush.bf16.xpose.msra.mxu3 %v6973_v26  ;;  %3883 = vmatmul.bf16.vlgmr.msrb.gmra.mxu2 %v411_v37  ;;  %v43_v25 = vld [vmem:[%s11144_s0 + $0x38] sm:$0xff]  ;;  %v5437_v26 = vor.u32 %v7388_v12, %v5434_v13  ;;  %v6989_v30 = vor.u32 %v7774_v23, %v6986_v24  ;;  %v3651_v37 = vadd.f32 %v3650_v34, %v3638_v61  ;;  %v7517_v61 = vld [vmem:[%s11143_s1 + $0x474] sm:$0xf]  ;;  %v6994_v23 = vld [vmem:[%s11143_s1 + $0xe80] sm:$0xf0] }
  0xc8   :  { %132 = vst [vmem:[#allocation1 + $0x20] ss:$4 sm:$0xff] %v43_v25  ;;  %v7389_v13 = vld [vmem:[%s11143_s1 + $0x74] sm:$0xf]  ;;  %v7000_v24 = vld [vmem:[%s11143_s1 + $0xc88] sm:$0xf] }
  0xc9   :  { %v3664_v50 = vadd.f32 %v3663_v41, %v3651_v37  ;;  %v3689_v57 = vpop.f32.mrf.mxu3  ;;  %v3652_v58 = vpop.f32.mrf.mxu0  ;;  %v7840_v25 = vld [vmem:[%s11143_s1 + $0xe84] sm:$0xf0] }
  0xca   :  { %v3676_v55 = vpop.f32.mrf.mxu2  ;;  %v3665_v62 = vpop.f32.mrf.mxu1  ;;  %v7001_v34 = vor.u32 %v7840_v25, %v7000_v24  ;;  %v7008_v24 = vld [vmem:[%s11143_s1 + $0xc90] sm:$0xf] }
  0xcb   :  { %v3677_v56 = vadd.f32 %v3676_v55, %v3664_v50  ;;  %v6488_v50 = vld [vmem:[%s11143_s1 + $0x888] sm:$0xf]  ;;  %v6490_v55 = vld [vmem:[%s11143_s1 + $0xa88] sm:$0xf0]  ;;  %v7841_v25 = vld [vmem:[%s11143_s1 + $0xe8c] sm:$0xf0] }
  0xcd   :  { %3906 = vmatpush.bf16.xpose.msra.mxu0 %v6449_v46  ;;  %3919 = vmatpush.bf16.xpose.msra.mxu1 %v6453_v47  ;;  %v7710_v46 = vld [vmem:[%s11143_s1 + $0xa74] sm:$0xf0]  ;;  %v416_v47 = vpack.c.bf16 %v136_v35, %v136_v35  ;;  %v3690_v63 = vadd.f32 %v3689_v57, %v3677_v56 }
  0xce   :  { %3932 = vmatpush.bf16.xpose.msra.mxu2 %v6457_v48  ;;  %v7646_v48 = vld [vmem:[%s11143_s1 + $0x87c] sm:$0xf]  ;;  %v6473_v53 = vor.u32 %v7710_v46, %v6472_v45  ;;  %v7711_v45 = vld [vmem:[%s11143_s1 + $0xa7c] sm:$0xf0]  ;;  %v7647_v46 = vld [vmem:[%s11143_s1 + $0x884] sm:$0xf] }
  0xcf   :  { %3945 = vmatpush.bf16.xpose.msra.mxu3 %v6461_v49  ;;  %v6474_v49 = vld [vmem:[%s11143_s1 + $0xa78] sm:$0xf0]  ;;  %v139_v37 = vld.sshfl [vmem:[#allocation1 + $0x30] sm:$0xff pattern:$0x73625140]  ;;  %v6481_v56 = vor.u32 %v7711_v45, %v6480_v44 }
  0xd0   :  { %v6477_v54 = vor.u32 %v7646_v48, %v6474_v49  ;;  %v138_v38 = vld.sshfl [vmem:[#allocation1 + $0x28] sm:$0xff pattern:$0x73625140]  ;;  %v140_v40 = vld.sshfl [vmem:[#allocation1 + $0x38] sm:$0xff pattern:$0x73625140] }
  0xd1   :  { %v3691_v12 = vpop.f32.mrf.mxu3  ;;  %v418_v48 = vpack.c.bf16 %v138_v38, %v138_v38  ;;  %v6482_v49 = vld [vmem:[%s11143_s1 + $0xa80] sm:$0xf0] }
  0xd2   :  { %v3678_v9 = vpop.f32.mrf.mxu2  ;;  %v6485_v57 = vor.u32 %v7647_v46, %v6482_v49  ;;  %v6496_v49 = vld [vmem:[%s11143_s1 + $0x890] sm:$0xf] }
  0xd3   :  { %v5978_v9 = vld [vmem:[%s11143_s1 + $0x688] sm:$0xf0] }
  0xd5   :  { %3907 = vmatpush.bf16.xpose.msra.mxu0 %v5937_v0  ;;  %3920 = vmatpush.bf16.xpose.msra.mxu1 %v5941_v1  ;;  %v5954_v0 = vld [vmem:[%s11143_s1 + $0x670] sm:$0xf0]  ;;  %v5960_v1 = vld [vmem:[%s11143_s1 + $0x478] sm:$0xf] }
  0xd6   :  { %3933 = vmatpush.bf16.xpose.msra.mxu2 %v5945_v2  ;;  %v7582_v2 = vld [vmem:[%s11143_s1 + $0x674] sm:$0xf0]  ;;  %v5957_v6 = vor.u32 %v7517_v61, %v5954_v0  ;;  %v5968_v0 = vld [vmem:[%s11143_s1 + $0x480] sm:$0xf] }
  0xd7   :  { %3946 = vmatpush.bf16.xpose.msra.mxu3 %v5949_v3  ;;  %v7518_v3 = vld [vmem:[%s11143_s1 + $0x47c] sm:$0xf]  ;;  %v5961_v7 = vor.u32 %v7582_v2, %v5960_v1  ;;  %v7583_v1 = vld [vmem:[%s11143_s1 + $0x67c] sm:$0xf0]  ;;  %v7519_v2 = vld [vmem:[%s11143_s1 + $0x484] sm:$0xf] }
  0xd8   :  { %v5965_v8 = vor.u32 %v7518_v3, %v5962_v4 }
  0xdd   :  { %3908 = vmatpush.bf16.xpose.msra.mxu0 %v5425_v17  ;;  %3921 = vmatpush.bf16.xpose.msra.mxu1 %v5429_v21  ;;  %v7390_v17 = vld [vmem:[%s11143_s1 + $0x7c] sm:$0xf]  ;;  %v7775_v21 = vld [vmem:[%s11143_s1 + $0xc84] sm:$0xf] }
  0xde   :  { %3934 = vmatpush.bf16.xpose.msra.mxu2 %v5433_v22  ;;  %v5441_v22 = vor.u32 %v7453_v11, %v5440_v10  ;;  %v5453_v31 = vor.u32 %v7390_v17, %v5450_v18  ;;  %v6997_v33 = vor.u32 %v7775_v21, %v6994_v23  ;;  %v5969_v10 = vor.u32 %v7583_v1, %v5968_v0  ;;  %v7391_v18 = vld [vmem:[%s11143_s1 + $0x84] sm:$0xf]  ;;  %v7456_v21 = vld [vmem:[%s11143_s1 + $0x284] sm:$0xf0]  ;;  %v5466_v23 = vld [vmem:[%s11143_s1 + $0x288] sm:$0xf0] }
  0xdf   :  { %3947 = vmatpush.bf16.xpose.msra.mxu3 %v5437_v26  ;;  %v5445_v26 = vor.u32 %v7389_v13, %v5442_v14 }
  0xe1   :  { %v3702_v39 = vpop.f32.mrf.mxu0 }
  0xe2   :  { %v3703_v41 = vadd.f32 %v3702_v39, %v3690_v63 }
  0xe4   :  { %3909 = vmatmul.bf16.vlgmr.msra.gmra.mxu0 %v413_v36  ;;  %3922 = vmatmul.bf16.vlgmr.msra.gmra.mxu1 %v414_v43  ;;  %v137_v36 = vld.sshfl [vmem:[#allocation1 + $0x20] sm:$0xff pattern:$0x73625140]  ;;  %v3715_v43 = vpop.f32.mrf.mxu1 }
  0xe5   :  { %3957 = vmatpush.bf16.xpose.msrb.mxu0 %v6977_v27  ;;  %3970 = vmatpush.bf16.xpose.msrb.mxu1 %v6981_v28  ;;  %v5449_v27 = vor.u32 %v7454_v16, %v5448_v15  ;;  %v7776_v28 = vld [vmem:[%s11143_s1 + $0xc8c] sm:$0xf]  ;;  %v5456_v15 = vld [vmem:[%s11143_s1 + $0x80] sm:$0xf] }
  0xe6   :  { %3983 = vmatpush.bf16.xpose.msrb.mxu2 %v6985_v29  ;;  %3948 = vmatmul.bf16.vlgmr.msra.gmra.mxu3 %v416_v47  ;;  %v7002_v29 = vld [vmem:[%s11143_s1 + $0xe88] sm:$0xf0]  ;;  %v419_v47 = vpack.c.bf16 %v139_v37, %v139_v37  ;;  %v7455_v16 = vld [vmem:[%s11143_s1 + $0x27c] sm:$0xf0]  ;;  %v7009_v37 = vor.u32 %v7841_v25, %v7008_v24  ;;  %v5474_v24 = vld [vmem:[%s11143_s1 + $0x290] sm:$0xf0] }
  0xe7   :  { %3996 = vmatpush.bf16.xpose.msrb.mxu3 %v6989_v30  ;;  %3935 = vmatmul.bf16.vlgmr.msra.gmra.mxu2 %v415_v42  ;;  %v44_v30 = vld [vmem:[%s11144_s0 + $0x40] sm:$0xff]  ;;  %v7005_v35 = vor.u32 %v7776_v28, %v7002_v29  ;;  %v417_v42 = vpack.c.bf16 %v137_v36, %v137_v36  ;;  %v7010_v28 = vld [vmem:[%s11143_s1 + $0xe90] sm:$0xf0]  ;;  %v7016_v29 = vld [vmem:[%s11143_s1 + $0xc98] sm:$0xf] }
  0xe8   :  { %141 = vst [vmem:[#allocation1] ss:$4 sm:$0xff] %v44_v30  ;;  %v7842_v30 = vld [vmem:[%s11143_s1 + $0xe94] sm:$0xf0] }
  0xe9   :  { %v3741_v62 = vpop.f32.mrf.mxu3  ;;  %v3704_v63 = vpop.f32.mrf.mxu0  ;;  %v7017_v39 = vor.u32 %v7842_v30, %v7016_v29  ;;  %v5480_v25 = vld [vmem:[%s11143_s1 + $0x98] sm:$0xf]  ;;  %v7024_v29 = vld [vmem:[%s11143_s1 + $0xca0] sm:$0xf] }
  0xea   :  { %v3728_v60 = vpop.f32.mrf.mxu2  ;;  %v7843_v30 = vld [vmem:[%s11143_s1 + $0xe9c] sm:$0xf0] }
  0xec   :  { %v3717_v3 = vpop.f32.mrf.mxu1 }
  0xed   :  { %3958 = vmatpush.bf16.xpose.msrb.mxu0 %v6465_v51  ;;  %3971 = vmatpush.bf16.xpose.msrb.mxu1 %v6469_v52  ;;  %v7712_v51 = vld [vmem:[%s11143_s1 + $0xa84] sm:$0xf0]  ;;  %v3716_v52 = vadd.f32 %v3715_v43, %v3703_v41 }
  0xee   :  { %3984 = vmatpush.bf16.xpose.msrb.mxu2 %v6473_v53  ;;  %v420_v53 = vpack.c.bf16 %v140_v40, %v140_v40  ;;  %v6489_v58 = vor.u32 %v7712_v51, %v6488_v50  ;;  %v7713_v50 = vld [vmem:[%s11143_s1 + $0xa8c] sm:$0xf0]  ;;  %v7649_v51 = vld [vmem:[%s11143_s1 + $0x894] sm:$0xf] }
  0xef   :  { %3997 = vmatpush.bf16.xpose.msrb.mxu3 %v6477_v54  ;;  %v7648_v54 = vld [vmem:[%s11143_s1 + $0x88c] sm:$0xf]  ;;  %v3729_v61 = vadd.f32 %v3728_v60, %v3716_v52  ;;  %v143_v41 = vld.sshfl [vmem:[#allocation1] sm:$0xff pattern:$0x73625140] }
  0xf0   :  { %v6493_v59 = vor.u32 %v7648_v54, %v6490_v55  ;;  %v144_v43 = vld.sshfl [vmem:[#allocation1 + $0x8] sm:$0xff pattern:$0x73625140]  ;;  %v146_v45 = vld.sshfl [vmem:[#allocation1 + $0x18] sm:$0xff pattern:$0x73625140] }
  0xf1   :  { %v3742_v4 = vadd.f32 %v3741_v62, %v3729_v61  ;;  %v3743_v17 = vpop.f32.mrf.mxu3  ;;  %v6498_v54 = vld [vmem:[%s11143_s1 + $0xa90] sm:$0xf0]  ;;  %v6504_v55 = vld [vmem:[%s11143_s1 + $0x898] sm:$0xf]  ;;  %v6506_v60 = vld [vmem:[%s11143_s1 + $0xa98] sm:$0xf0]  ;;  %v6497_v61 = vor.u32 %v7713_v50, %v6496_v49 }
  0xf2   :  { %v3730_v14 = vpop.f32.mrf.mxu2  ;;  %v6501_v62 = vor.u32 %v7649_v51, %v6498_v54  ;;  %v6512_v54 = vld [vmem:[%s11143_s1 + $0x8a0] sm:$0xf] }
  0xf3   :  { %v5994_v14 = vld [vmem:[%s11143_s1 + $0x698] sm:$0xf0] }
  0xf5   :  { %3959 = vmatpush.bf16.xpose.msrb.mxu0 %v5953_v5  ;;  %3972 = vmatpush.bf16.xpose.msrb.mxu1 %v5957_v6  ;;  %v5970_v5 = vld [vmem:[%s11143_s1 + $0x680] sm:$0xf0]  ;;  %v5976_v6 = vld [vmem:[%s11143_s1 + $0x488] sm:$0xf] }
  0xf6   :  { %3985 = vmatpush.bf16.xpose.msrb.mxu2 %v5961_v7  ;;  %v7584_v7 = vld [vmem:[%s11143_s1 + $0x684] sm:$0xf0]  ;;  %v5973_v11 = vor.u32 %v7519_v2, %v5970_v5  ;;  %v5984_v5 = vld [vmem:[%s11143_s1 + $0x490] sm:$0xf] }
  0xf7   :  { %3998 = vmatpush.bf16.xpose.msrb.mxu3 %v5965_v8  ;;  %v7520_v8 = vld [vmem:[%s11143_s1 + $0x48c] sm:$0xf]  ;;  %v5977_v12 = vor.u32 %v7584_v7, %v5976_v6  ;;  %v7585_v6 = vld [vmem:[%s11143_s1 + $0x68c] sm:$0xf0]  ;;  %v7521_v7 = vld [vmem:[%s11143_s1 + $0x494] sm:$0xf] }
  0xf8   :  { %v5981_v13 = vor.u32 %v7520_v8, %v5978_v9 }
  0xfd   :  { %3960 = vmatpush.bf16.xpose.msrb.mxu0 %v5441_v22  ;;  %3973 = vmatpush.bf16.xpose.msrb.mxu1 %v5445_v26  ;;  %v7392_v22 = vld [vmem:[%s11143_s1 + $0x8c] sm:$0xf]  ;;  %v7777_v26 = vld [vmem:[%s11143_s1 + $0xc94] sm:$0xf] }
  0xfe   :  { %3986 = vmatpush.bf16.xpose.msrb.mxu2 %v5449_v27  ;;  %v5457_v27 = vor.u32 %v7455_v16, %v5456_v15  ;;  %v5469_v36 = vor.u32 %v7392_v22, %v5466_v23  ;;  %v7013_v38 = vor.u32 %v7777_v26, %v7010_v28  ;;  %v5985_v15 = vor.u32 %v7585_v6, %v5984_v5  ;;  %v7393_v23 = vld [vmem:[%s11143_s1 + $0x94] sm:$0xf]  ;;  %v7458_v26 = vld [vmem:[%s11143_s1 + $0x294] sm:$0xf0]  ;;  %v5482_v28 = vld [vmem:[%s11143_s1 + $0x298] sm:$0xf0] }
  0xff   :  { %3999 = vmatpush.bf16.xpose.msrb.mxu3 %v5453_v31  ;;  %v5461_v31 = vor.u32 %v7391_v18, %v5458_v19 }
 0x101   :  { %v3754_v44 = vpop.f32.mrf.mxu0 }
 0x102   :  { %v3755_v46 = vadd.f32 %v3754_v44, %v3742_v4 }
 0x104   :  { %3961 = vmatmul.bf16.vlgmr.msrb.gmra.mxu0 %v417_v42  ;;  %3974 = vmatmul.bf16.vlgmr.msrb.gmra.mxu1 %v418_v48  ;;  %v145_v42 = vld.sshfl [vmem:[#allocation1 + $0x10] sm:$0xff pattern:$0x73625140]  ;;  %v3767_v48 = vpop.f32.mrf.mxu1 }
 0x105   :  { %4009 = vmatpush.bf16.xpose.msra.mxu0 %v6993_v32  ;;  %4022 = vmatpush.bf16.xpose.msra.mxu1 %v6997_v33  ;;  %v5465_v32 = vor.u32 %v7456_v21, %v5464_v20  ;;  %v7778_v33 = vld [vmem:[%s11143_s1 + $0xc9c] sm:$0xf]  ;;  %v423_v52 = vpack.c.bf16 %v145_v42, %v145_v42  ;;  %v5472_v20 = vld [vmem:[%s11143_s1 + $0x90] sm:$0xf]  ;;  %v7025_v42 = vor.u32 %v7843_v30, %v7024_v29  ;;  %v5490_v29 = vld [vmem:[%s11143_s1 + $0x2a0] sm:$0xf0] }
 0x106   :  { %4035 = vmatpush.bf16.xpose.msra.mxu2 %v7001_v34  ;;  %4000 = vmatmul.bf16.vlgmr.msrb.gmra.mxu3 %v420_v53  ;;  %v7018_v34 = vld [vmem:[%s11143_s1 + $0xe98] sm:$0xf0]  ;;  %v422_v53 = vpack.c.bf16 %v144_v43, %v144_v43  ;;  %v7457_v21 = vld [vmem:[%s11143_s1 + $0x28c] sm:$0xf0]  ;;  %v5496_v30 = vld [vmem:[%s11143_s1 + $0xa8] sm:$0xf] }
 0x107   :  { %4048 = vmatpush.bf16.xpose.msra.mxu3 %v7005_v35  ;;  %3987 = vmatmul.bf16.vlgmr.msrb.gmra.mxu2 %v419_v47  ;;  %v45_v35 = vld [vmem:[%s11144_s0 + $0x48] sm:$0xff]  ;;  %v7021_v40 = vor.u32 %v7778_v33, %v7018_v34  ;;  %v421_v47 = vpack.c.bf16 %v143_v41, %v143_v41  ;;  %v7026_v33 = vld [vmem:[%s11143_s1 + $0xea0] sm:$0xf0] }
 0x108   :  { %142 = vst [vmem:[#allocation1 + $0x20] ss:$4 sm:$0xff] %v45_v35  ;;  %v7032_v34 = vld [vmem:[%s11143_s1 + $0xca8] sm:$0xf] }
 0x109   :  { %v3793_v3 = vpop.f32.mrf.mxu3  ;;  %v3756_v4 = vpop.f32.mrf.mxu0  ;;  %v7844_v35 = vld [vmem:[%s11143_s1 + $0xea4] sm:$0xf0] }
 0x10a   :  { %v3780_v1 = vpop.f32.mrf.mxu2  ;;  %v7033_v44 = vor.u32 %v7844_v35, %v7032_v34  ;;  %v7040_v34 = vld [vmem:[%s11143_s1 + $0xcb0] sm:$0xf] }
 0x10b   :  { %v7845_v35 = vld [vmem:[%s11143_s1 + $0xeac] sm:$0xf0] }
 0x10c   :  { %v3769_v8 = vpop.f32.mrf.mxu1 }
 0x10d   :  { %4010 = vmatpush.bf16.xpose.msra.mxu0 %v6481_v56  ;;  %4023 = vmatpush.bf16.xpose.msra.mxu1 %v6485_v57  ;;  %v7714_v56 = vld [vmem:[%s11143_s1 + $0xa94] sm:$0xf0]  ;;  %v3768_v57 = vadd.f32 %v3767_v48, %v3755_v46 }
 0x10e   :  { %4036 = vmatpush.bf16.xpose.msra.mxu2 %v6489_v58  ;;  %v424_v58 = vpack.c.bf16 %v146_v45, %v146_v45  ;;  %v6505_v63 = vor.u32 %v7714_v56, %v6504_v55  ;;  %v7715_v55 = vld [vmem:[%s11143_s1 + $0xa9c] sm:$0xf0]  ;;  %v7651_v56 = vld [vmem:[%s11143_s1 + $0x8a4] sm:$0xf] }
 0x10f   :  { %4049 = vmatpush.bf16.xpose.msra.mxu3 %v6493_v59  ;;  %v7650_v59 = vld [vmem:[%s11143_s1 + $0x89c] sm:$0xf]  ;;  %v3781_v2 = vadd.f32 %v3780_v1, %v3768_v57  ;;  %v147_v46 = vld.sshfl [vmem:[#allocation1 + $0x20] sm:$0xff pattern:$0x73625140] }
 0x110   :  { %v6509_v0 = vor.u32 %v7650_v59, %v6506_v60  ;;  %v148_v48 = vld.sshfl [vmem:[#allocation1 + $0x28] sm:$0xff pattern:$0x73625140]  ;;  %v150_v50 = vld.sshfl [vmem:[#allocation1 + $0x38] sm:$0xff pattern:$0x73625140] }
 0x111   :  { %v3794_v9 = vadd.f32 %v3793_v3, %v3781_v2  ;;  %v3795_v22 = vpop.f32.mrf.mxu3  ;;  %v6514_v59 = vld [vmem:[%s11143_s1 + $0xaa0] sm:$0xf0]  ;;  %v6520_v60 = vld [vmem:[%s11143_s1 + $0x8a8] sm:$0xf]  ;;  %v6522_v1 = vld [vmem:[%s11143_s1 + $0xaa8] sm:$0xf0]  ;;  %v6513_v2 = vor.u32 %v7715_v55, %v6512_v54 }
 0x112   :  { %v3782_v19 = vpop.f32.mrf.mxu2  ;;  %v6517_v3 = vor.u32 %v7651_v56, %v6514_v59  ;;  %v6528_v59 = vld [vmem:[%s11143_s1 + $0x8b0] sm:$0xf] }
 0x113   :  { %v6010_v19 = vld [vmem:[%s11143_s1 + $0x6a8] sm:$0xf0] }
 0x115   :  { %4011 = vmatpush.bf16.xpose.msra.mxu0 %v5969_v10  ;;  %4024 = vmatpush.bf16.xpose.msra.mxu1 %v5973_v11  ;;  %v5986_v10 = vld [vmem:[%s11143_s1 + $0x690] sm:$0xf0]  ;;  %v5992_v11 = vld [vmem:[%s11143_s1 + $0x498] sm:$0xf] }
 0x116   :  { %4037 = vmatpush.bf16.xpose.msra.mxu2 %v5977_v12  ;;  %v7586_v12 = vld [vmem:[%s11143_s1 + $0x694] sm:$0xf0]  ;;  %v5989_v16 = vor.u32 %v7521_v7, %v5986_v10  ;;  %v6000_v10 = vld [vmem:[%s11143_s1 + $0x4a0] sm:$0xf] }
 0x117   :  { %4050 = vmatpush.bf16.xpose.msra.mxu3 %v5981_v13  ;;  %v7522_v13 = vld [vmem:[%s11143_s1 + $0x49c] sm:$0xf]  ;;  %v5993_v17 = vor.u32 %v7586_v12, %v5992_v11  ;;  %v7587_v11 = vld [vmem:[%s11143_s1 + $0x69c] sm:$0xf0]  ;;  %v7523_v12 = vld [vmem:[%s11143_s1 + $0x4a4] sm:$0xf] }
 0x118   :  { %v5997_v18 = vor.u32 %v7522_v13, %v5994_v14 }
 0x11d   :  { %4012 = vmatpush.bf16.xpose.msra.mxu0 %v5457_v27  ;;  %4025 = vmatpush.bf16.xpose.msra.mxu1 %v5461_v31  ;;  %v7394_v27 = vld [vmem:[%s11143_s1 + $0x9c] sm:$0xf]  ;;  %v7779_v31 = vld [vmem:[%s11143_s1 + $0xca4] sm:$0xf] }
 0x11e   :  { %4038 = vmatpush.bf16.xpose.msra.mxu2 %v5465_v32  ;;  %v5473_v32 = vor.u32 %v7457_v21, %v5472_v20  ;;  %v5485_v41 = vor.u32 %v7394_v27, %v5482_v28  ;;  %v7029_v43 = vor.u32 %v7779_v31, %v7026_v33  ;;  %v6001_v20 = vor.u32 %v7587_v11, %v6000_v10  ;;  %v7395_v28 = vld [vmem:[%s11143_s1 + $0xa4] sm:$0xf]  ;;  %v7460_v31 = vld [vmem:[%s11143_s1 + $0x2a4] sm:$0xf0]  ;;  %v5498_v33 = vld [vmem:[%s11143_s1 + $0x2a8] sm:$0xf0] }
 0x11f   :  { %4051 = vmatpush.bf16.xpose.msra.mxu3 %v5469_v36  ;;  %v5477_v36 = vor.u32 %v7393_v23, %v5474_v24 }
 0x121   :  { %v3806_v49 = vpop.f32.mrf.mxu0 }
 0x122   :  { %v3807_v51 = vadd.f32 %v3806_v49, %v3794_v9 }
 0x124   :  { %4013 = vmatmul.bf16.vlgmr.msra.gmra.mxu0 %v421_v47  ;;  %4026 = vmatmul.bf16.vlgmr.msra.gmra.mxu1 %v422_v53  ;;  %v149_v47 = vld.sshfl [vmem:[#allocation1 + $0x30] sm:$0xff pattern:$0x73625140]  ;;  %v3819_v53 = vpop.f32.mrf.mxu1 }
 0x125   :  { %4061 = vmatpush.bf16.xpose.msrb.mxu0 %v7009_v37  ;;  %4074 = vmatpush.bf16.xpose.msrb.mxu1 %v7013_v38  ;;  %v5481_v37 = vor.u32 %v7458_v26, %v5480_v25  ;;  %v7780_v38 = vld [vmem:[%s11143_s1 + $0xcac] sm:$0xf]  ;;  %v427_v57 = vpack.c.bf16 %v149_v47, %v149_v47  ;;  %v5488_v25 = vld [vmem:[%s11143_s1 + $0xa0] sm:$0xf]  ;;  %v7041_v47 = vor.u32 %v7845_v35, %v7040_v34  ;;  %v5506_v34 = vld [vmem:[%s11143_s1 + $0x2b0] sm:$0xf0] }
 0x126   :  { %4087 = vmatpush.bf16.xpose.msrb.mxu2 %v7017_v39  ;;  %4052 = vmatmul.bf16.vlgmr.msra.gmra.mxu3 %v424_v58  ;;  %v7034_v39 = vld [vmem:[%s11143_s1 + $0xea8] sm:$0xf0]  ;;  %v426_v58 = vpack.c.bf16 %v148_v48, %v148_v48  ;;  %v7459_v26 = vld [vmem:[%s11143_s1 + $0x29c] sm:$0xf0]  ;;  %v5512_v35 = vld [vmem:[%s11143_s1 + $0xb8] sm:$0xf] }
 0x127   :  { %4100 = vmatpush.bf16.xpose.msrb.mxu3 %v7021_v40  ;;  %4039 = vmatmul.bf16.vlgmr.msra.gmra.mxu2 %v423_v52  ;;  %v46_v40 = vld [vmem:[%s11144_s0 + $0x50] sm:$0xff]  ;;  %v7037_v45 = vor.u32 %v7780_v38, %v7034_v39  ;;  %v425_v52 = vpack.c.bf16 %v147_v46, %v147_v46  ;;  %v7048_v39 = vld [vmem:[%s11143_s1 + $0xcb8] sm:$0xf] }
 0x128   :  { %151 = vst [vmem:[#allocation1] ss:$4 sm:$0xff] %v46_v40  ;;  %v7042_v38 = vld [vmem:[%s11143_s1 + $0xeb0] sm:$0xf0]  ;;  %v7846_v40 = vld [vmem:[%s11143_s1 + $0xeb4] sm:$0xf0] }
 0x129   :  { %v3845_v8 = vpop.f32.mrf.mxu3  ;;  %v3808_v9 = vpop.f32.mrf.mxu0  ;;  %v7049_v49 = vor.u32 %v7846_v40, %v7048_v39  ;;  %v7056_v39 = vld [vmem:[%s11143_s1 + $0xcc0] sm:$0xf] }
 0x12a   :  { %v3832_v6 = vpop.f32.mrf.mxu2  ;;  %v7847_v40 = vld [vmem:[%s11143_s1 + $0xebc] sm:$0xf0] }
 0x12c   :  { %v3821_v13 = vpop.f32.mrf.mxu1 }
 0x12d   :  { %4062 = vmatpush.bf16.xpose.msrb.mxu0 %v6497_v61  ;;  %4075 = vmatpush.bf16.xpose.msrb.mxu1 %v6501_v62  ;;  %v7716_v61 = vld [vmem:[%s11143_s1 + $0xaa4] sm:$0xf0]  ;;  %v3820_v62 = vadd.f32 %v3819_v53, %v3807_v51 }
 0x12e   :  { %4088 = vmatpush.bf16.xpose.msrb.mxu2 %v6505_v63  ;;  %v428_v63 = vpack.c.bf16 %v150_v50, %v150_v50  ;;  %v6521_v4 = vor.u32 %v7716_v61, %v6520_v60  ;;  %v7717_v60 = vld [vmem:[%s11143_s1 + $0xaac] sm:$0xf0]  ;;  %v7653_v61 = vld [vmem:[%s11143_s1 + $0x8b4] sm:$0xf] }
 0x12f   :  { %4101 = vmatpush.bf16.xpose.msrb.mxu3 %v6509_v0  ;;  %v7652_v0 = vld [vmem:[%s11143_s1 + $0x8ac] sm:$0xf]  ;;  %v3833_v7 = vadd.f32 %v3832_v6, %v3820_v62  ;;  %v153_v51 = vld.sshfl [vmem:[#allocation1] sm:$0xff pattern:$0x73625140] }
 0x130   :  { %v6525_v5 = vor.u32 %v7652_v0, %v6522_v1  ;;  %v154_v53 = vld.sshfl [vmem:[#allocation1 + $0x8] sm:$0xff pattern:$0x73625140]  ;;  %v156_v55 = vld.sshfl [vmem:[#allocation1 + $0x18] sm:$0xff pattern:$0x73625140] }
 0x131   :  { %v3846_v14 = vadd.f32 %v3845_v8, %v3833_v7  ;;  %v3847_v27 = vpop.f32.mrf.mxu3  ;;  %v6530_v0 = vld [vmem:[%s11143_s1 + $0xab0] sm:$0xf0]  ;;  %v6536_v1 = vld [vmem:[%s11143_s1 + $0x8b8] sm:$0xf]  ;;  %v6538_v6 = vld [vmem:[%s11143_s1 + $0xab8] sm:$0xf0]  ;;  %v6529_v7 = vor.u32 %v7717_v60, %v6528_v59 }
 0x132   :  { %v3834_v24 = vpop.f32.mrf.mxu2  ;;  %v6533_v8 = vor.u32 %v7653_v61, %v6530_v0  ;;  %v6544_v0 = vld [vmem:[%s11143_s1 + $0x8c0] sm:$0xf] }
 0x133   :  { %v6026_v24 = vld [vmem:[%s11143_s1 + $0x6b8] sm:$0xf0] }
 0x135   :  { %4063 = vmatpush.bf16.xpose.msrb.mxu0 %v5985_v15  ;;  %4076 = vmatpush.bf16.xpose.msrb.mxu1 %v5989_v16  ;;  %v6002_v15 = vld [vmem:[%s11143_s1 + $0x6a0] sm:$0xf0]  ;;  %v6008_v16 = vld [vmem:[%s11143_s1 + $0x4a8] sm:$0xf] }
 0x136   :  { %4089 = vmatpush.bf16.xpose.msrb.mxu2 %v5993_v17  ;;  %v7588_v17 = vld [vmem:[%s11143_s1 + $0x6a4] sm:$0xf0]  ;;  %v6005_v21 = vor.u32 %v7523_v12, %v6002_v15  ;;  %v6016_v15 = vld [vmem:[%s11143_s1 + $0x4b0] sm:$0xf] }
 0x137   :  { %4102 = vmatpush.bf16.xpose.msrb.mxu3 %v5997_v18  ;;  %v7524_v18 = vld [vmem:[%s11143_s1 + $0x4ac] sm:$0xf]  ;;  %v6009_v22 = vor.u32 %v7588_v17, %v6008_v16  ;;  %v7589_v16 = vld [vmem:[%s11143_s1 + $0x6ac] sm:$0xf0]  ;;  %v7525_v17 = vld [vmem:[%s11143_s1 + $0x4b4] sm:$0xf] }
 0x138   :  { %v6013_v23 = vor.u32 %v7524_v18, %v6010_v19 }
 0x13d   :  { %4064 = vmatpush.bf16.xpose.msrb.mxu0 %v5473_v32  ;;  %4077 = vmatpush.bf16.xpose.msrb.mxu1 %v5477_v36  ;;  %v7396_v32 = vld [vmem:[%s11143_s1 + $0xac] sm:$0xf]  ;;  %v7781_v36 = vld [vmem:[%s11143_s1 + $0xcb4] sm:$0xf] }
 0x13e   :  { %4090 = vmatpush.bf16.xpose.msrb.mxu2 %v5481_v37  ;;  %v5489_v37 = vor.u32 %v7459_v26, %v5488_v25  ;;  %v5501_v46 = vor.u32 %v7396_v32, %v5498_v33  ;;  %v7045_v48 = vor.u32 %v7781_v36, %v7042_v38  ;;  %v6017_v25 = vor.u32 %v7589_v16, %v6016_v15  ;;  %v7397_v33 = vld [vmem:[%s11143_s1 + $0xb4] sm:$0xf]  ;;  %v7462_v36 = vld [vmem:[%s11143_s1 + $0x2b4] sm:$0xf0]  ;;  %v5514_v38 = vld [vmem:[%s11143_s1 + $0x2b8] sm:$0xf0] }
 0x13f   :  { %4103 = vmatpush.bf16.xpose.msrb.mxu3 %v5485_v41  ;;  %v5493_v41 = vor.u32 %v7395_v28, %v5490_v29 }
 0x141   :  { %v3858_v54 = vpop.f32.mrf.mxu0 }
 0x142   :  { %v3859_v56 = vadd.f32 %v3858_v54, %v3846_v14 }
 0x144   :  { %4065 = vmatmul.bf16.vlgmr.msrb.gmra.mxu0 %v425_v52  ;;  %4078 = vmatmul.bf16.vlgmr.msrb.gmra.mxu1 %v426_v58  ;;  %v155_v52 = vld.sshfl [vmem:[#allocation1 + $0x10] sm:$0xff pattern:$0x73625140]  ;;  %v3871_v58 = vpop.f32.mrf.mxu1 }
 0x145   :  { %4113 = vmatpush.bf16.xpose.msra.mxu0 %v7025_v42  ;;  %4126 = vmatpush.bf16.xpose.msra.mxu1 %v7029_v43  ;;  %v5497_v42 = vor.u32 %v7460_v31, %v5496_v30  ;;  %v7782_v43 = vld [vmem:[%s11143_s1 + $0xcbc] sm:$0xf]  ;;  %v431_v62 = vpack.c.bf16 %v155_v52, %v155_v52  ;;  %v5504_v30 = vld [vmem:[%s11143_s1 + $0xb0] sm:$0xf]  ;;  %v7057_v52 = vor.u32 %v7847_v40, %v7056_v39  ;;  %v5522_v39 = vld [vmem:[%s11143_s1 + $0x2c0] sm:$0xf0] }
 0x146   :  { %4139 = vmatpush.bf16.xpose.msra.mxu2 %v7033_v44  ;;  %4104 = vmatmul.bf16.vlgmr.msrb.gmra.mxu3 %v428_v63  ;;  %v7050_v44 = vld [vmem:[%s11143_s1 + $0xeb8] sm:$0xf0]  ;;  %v430_v63 = vpack.c.bf16 %v154_v53, %v154_v53  ;;  %v7461_v31 = vld [vmem:[%s11143_s1 + $0x2ac] sm:$0xf0]  ;;  %v5528_v40 = vld [vmem:[%s11143_s1 + $0xc8] sm:$0xf] }
 0x147   :  { %4152 = vmatpush.bf16.xpose.msra.mxu3 %v7037_v45  ;;  %4091 = vmatmul.bf16.vlgmr.msrb.gmra.mxu2 %v427_v57  ;;  %v47_v45 = vld [vmem:[%s11144_s0 + $0x58] sm:$0xff]  ;;  %v7053_v50 = vor.u32 %v7782_v43, %v7050_v44  ;;  %v429_v57 = vpack.c.bf16 %v153_v51, %v153_v51  ;;  %v7058_v43 = vld [vmem:[%s11143_s1 + $0xec0] sm:$0xf0]  ;;  %v7064_v44 = vld [vmem:[%s11143_s1 + $0xcc8] sm:$0xf] }
 0x148   :  { %152 = vst [vmem:[#allocation1 + $0x20] ss:$4 sm:$0xff] %v47_v45  ;;  %v7848_v45 = vld [vmem:[%s11143_s1 + $0xec4] sm:$0xf0] }
 0x149   :  { %v3897_v13 = vpop.f32.mrf.mxu3  ;;  %v3860_v14 = vpop.f32.mrf.mxu0  ;;  %v7065_v54 = vor.u32 %v7848_v45, %v7064_v44  ;;  %v7072_v44 = vld [vmem:[%s11143_s1 + $0xcd0] sm:$0xf] }
 0x14a   :  { %v3884_v11 = vpop.f32.mrf.mxu2  ;;  %v7849_v45 = vld [vmem:[%s11143_s1 + $0xecc] sm:$0xf0] }
 0x14c   :  { %v3873_v18 = vpop.f32.mrf.mxu1 }
 0x14d   :  { %4114 = vmatpush.bf16.xpose.msra.mxu0 %v6513_v2  ;;  %4127 = vmatpush.bf16.xpose.msra.mxu1 %v6517_v3  ;;  %v7718_v2 = vld [vmem:[%s11143_s1 + $0xab4] sm:$0xf0]  ;;  %v3872_v3 = vadd.f32 %v3871_v58, %v3859_v56 }
 0x14e   :  { %4140 = vmatpush.bf16.xpose.msra.mxu2 %v6521_v4  ;;  %v432_v4 = vpack.c.bf16 %v156_v55, %v156_v55  ;;  %v6537_v9 = vor.u32 %v7718_v2, %v6536_v1  ;;  %v7719_v1 = vld [vmem:[%s11143_s1 + $0xabc] sm:$0xf0]  ;;  %v7655_v2 = vld [vmem:[%s11143_s1 + $0x8c4] sm:$0xf] }
 0x14f   :  { %4153 = vmatpush.bf16.xpose.msra.mxu3 %v6525_v5  ;;  %v7654_v5 = vld [vmem:[%s11143_s1 + $0x8bc] sm:$0xf]  ;;  %v3885_v12 = vadd.f32 %v3884_v11, %v3872_v3  ;;  %v157_v56 = vld.sshfl [vmem:[#allocation1 + $0x20] sm:$0xff pattern:$0x73625140] }
 0x150   :  { %v6541_v10 = vor.u32 %v7654_v5, %v6538_v6  ;;  %v158_v58 = vld.sshfl [vmem:[#allocation1 + $0x28] sm:$0xff pattern:$0x73625140]  ;;  %v160_v60 = vld.sshfl [vmem:[#allocation1 + $0x38] sm:$0xff pattern:$0x73625140] }
 0x151   :  { %v3898_v19 = vadd.f32 %v3897_v13, %v3885_v12  ;;  %v3899_v32 = vpop.f32.mrf.mxu3  ;;  %v6546_v5 = vld [vmem:[%s11143_s1 + $0xac0] sm:$0xf0]  ;;  %v6552_v6 = vld [vmem:[%s11143_s1 + $0x8c8] sm:$0xf]  ;;  %v6554_v11 = vld [vmem:[%s11143_s1 + $0xac8] sm:$0xf0]  ;;  %v6545_v12 = vor.u32 %v7719_v1, %v6544_v0 }
 0x152   :  { %v3886_v29 = vpop.f32.mrf.mxu2  ;;  %v6549_v13 = vor.u32 %v7655_v2, %v6546_v5  ;;  %v6560_v5 = vld [vmem:[%s11143_s1 + $0x8d0] sm:$0xf] }
 0x153   :  { %v6042_v29 = vld [vmem:[%s11143_s1 + $0x6c8] sm:$0xf0] }
 0x155   :  { %4115 = vmatpush.bf16.xpose.msra.mxu0 %v6001_v20  ;;  %4128 = vmatpush.bf16.xpose.msra.mxu1 %v6005_v21  ;;  %v6018_v20 = vld [vmem:[%s11143_s1 + $0x6b0] sm:$0xf0]  ;;  %v6024_v21 = vld [vmem:[%s11143_s1 + $0x4b8] sm:$0xf] }
 0x156   :  { %4141 = vmatpush.bf16.xpose.msra.mxu2 %v6009_v22  ;;  %v7590_v22 = vld [vmem:[%s11143_s1 + $0x6b4] sm:$0xf0]  ;;  %v6021_v26 = vor.u32 %v7525_v17, %v6018_v20  ;;  %v6032_v20 = vld [vmem:[%s11143_s1 + $0x4c0] sm:$0xf] }
 0x157   :  { %4154 = vmatpush.bf16.xpose.msra.mxu3 %v6013_v23  ;;  %v7526_v23 = vld [vmem:[%s11143_s1 + $0x4bc] sm:$0xf]  ;;  %v6025_v27 = vor.u32 %v7590_v22, %v6024_v21  ;;  %v7591_v21 = vld [vmem:[%s11143_s1 + $0x6bc] sm:$0xf0]  ;;  %v7527_v22 = vld [vmem:[%s11143_s1 + $0x4c4] sm:$0xf] }
 0x158   :  { %v6029_v28 = vor.u32 %v7526_v23, %v6026_v24 }
 0x15d   :  { %4116 = vmatpush.bf16.xpose.msra.mxu0 %v5489_v37  ;;  %4129 = vmatpush.bf16.xpose.msra.mxu1 %v5493_v41  ;;  %v7398_v37 = vld [vmem:[%s11143_s1 + $0xbc] sm:$0xf]  ;;  %v7783_v41 = vld [vmem:[%s11143_s1 + $0xcc4] sm:$0xf] }
 0x15e   :  { %4142 = vmatpush.bf16.xpose.msra.mxu2 %v5497_v42  ;;  %v5505_v42 = vor.u32 %v7461_v31, %v5504_v30  ;;  %v5517_v51 = vor.u32 %v7398_v37, %v5514_v38  ;;  %v7061_v53 = vor.u32 %v7783_v41, %v7058_v43  ;;  %v6033_v30 = vor.u32 %v7591_v21, %v6032_v20  ;;  %v7399_v38 = vld [vmem:[%s11143_s1 + $0xc4] sm:$0xf]  ;;  %v7464_v41 = vld [vmem:[%s11143_s1 + $0x2c4] sm:$0xf0]  ;;  %v5530_v43 = vld [vmem:[%s11143_s1 + $0x2c8] sm:$0xf0] }
 0x15f   :  { %4155 = vmatpush.bf16.xpose.msra.mxu3 %v5501_v46  ;;  %v5509_v46 = vor.u32 %v7397_v33, %v5506_v34 }
 0x161   :  { %v3910_v59 = vpop.f32.mrf.mxu0 }
 0x162   :  { %v3911_v61 = vadd.f32 %v3910_v59, %v3898_v19 }
 0x164   :  { %4117 = vmatmul.bf16.vlgmr.msra.gmra.mxu0 %v429_v57  ;;  %4130 = vmatmul.bf16.vlgmr.msra.gmra.mxu1 %v430_v63  ;;  %v159_v57 = vld.sshfl [vmem:[#allocation1 + $0x30] sm:$0xff pattern:$0x73625140]  ;;  %v3923_v63 = vpop.f32.mrf.mxu1 }
 0x165   :  { %4165 = vmatpush.bf16.xpose.msrb.mxu0 %v7041_v47  ;;  %4178 = vmatpush.bf16.xpose.msrb.mxu1 %v7045_v48  ;;  %v5513_v47 = vor.u32 %v7462_v36, %v5512_v35  ;;  %v7784_v48 = vld [vmem:[%s11143_s1 + $0xccc] sm:$0xf]  ;;  %v435_v3 = vpack.c.bf16 %v159_v57, %v159_v57  ;;  %v5520_v35 = vld [vmem:[%s11143_s1 + $0xc0] sm:$0xf]  ;;  %v7073_v57 = vor.u32 %v7849_v45, %v7072_v44  ;;  %v5538_v44 = vld [vmem:[%s11143_s1 + $0x2d0] sm:$0xf0] }
 0x166   :  { %4191 = vmatpush.bf16.xpose.msrb.mxu2 %v7049_v49  ;;  %4156 = vmatmul.bf16.vlgmr.msra.gmra.mxu3 %v432_v4  ;;  %v7066_v49 = vld [vmem:[%s11143_s1 + $0xec8] sm:$0xf0]  ;;  %v434_v4 = vpack.c.bf16 %v158_v58, %v158_v58  ;;  %v7463_v36 = vld [vmem:[%s11143_s1 + $0x2bc] sm:$0xf0]  ;;  %v5544_v45 = vld [vmem:[%s11143_s1 + $0xd8] sm:$0xf] }
 0x167   :  { %4204 = vmatpush.bf16.xpose.msrb.mxu3 %v7053_v50  ;;  %4143 = vmatmul.bf16.vlgmr.msra.gmra.mxu2 %v431_v62  ;;  %v48_v50 = vld [vmem:[%s11144_s0 + $0x60] sm:$0xff]  ;;  %v7069_v55 = vor.u32 %v7784_v48, %v7066_v49  ;;  %v433_v62 = vpack.c.bf16 %v157_v56, %v157_v56  ;;  %v7074_v48 = vld [vmem:[%s11143_s1 + $0xed0] sm:$0xf0]  ;;  %v7080_v49 = vld [vmem:[%s11143_s1 + $0xcd8] sm:$0xf] }
 0x168   :  { %161 = vst [vmem:[#allocation1] ss:$4 sm:$0xff] %v48_v50  ;;  %v7850_v50 = vld [vmem:[%s11143_s1 + $0xed4] sm:$0xf0] }
 0x169   :  { %v3949_v18 = vpop.f32.mrf.mxu3  ;;  %v3912_v19 = vpop.f32.mrf.mxu0  ;;  %v7081_v59 = vor.u32 %v7850_v50, %v7080_v49  ;;  %v7088_v49 = vld [vmem:[%s11143_s1 + $0xce0] sm:$0xf] }
 0x16a   :  { %v3936_v16 = vpop.f32.mrf.mxu2  ;;  %v7851_v50 = vld [vmem:[%s11143_s1 + $0xedc] sm:$0xf0] }
 0x16c   :  { %v3925_v23 = vpop.f32.mrf.mxu1 }
 0x16d   :  { %4166 = vmatpush.bf16.xpose.msrb.mxu0 %v6529_v7  ;;  %4179 = vmatpush.bf16.xpose.msrb.mxu1 %v6533_v8  ;;  %v7720_v7 = vld [vmem:[%s11143_s1 + $0xac4] sm:$0xf0]  ;;  %v3924_v8 = vadd.f32 %v3923_v63, %v3911_v61 }
 0x16e   :  { %4192 = vmatpush.bf16.xpose.msrb.mxu2 %v6537_v9  ;;  %v436_v9 = vpack.c.bf16 %v160_v60, %v160_v60  ;;  %v6553_v14 = vor.u32 %v7720_v7, %v6552_v6  ;;  %v7721_v6 = vld [vmem:[%s11143_s1 + $0xacc] sm:$0xf0]  ;;  %v7657_v7 = vld [vmem:[%s11143_s1 + $0x8d4] sm:$0xf] }
 0x16f   :  { %4205 = vmatpush.bf16.xpose.msrb.mxu3 %v6541_v10  ;;  %v7656_v10 = vld [vmem:[%s11143_s1 + $0x8cc] sm:$0xf]  ;;  %v3937_v17 = vadd.f32 %v3936_v16, %v3924_v8  ;;  %v163_v61 = vld.sshfl [vmem:[#allocation1] sm:$0xff pattern:$0x73625140] }
 0x170   :  { %v6557_v15 = vor.u32 %v7656_v10, %v6554_v11  ;;  %v164_v63 = vld.sshfl [vmem:[#allocation1 + $0x8] sm:$0xff pattern:$0x73625140]  ;;  %v166_v1 = vld.sshfl [vmem:[#allocation1 + $0x18] sm:$0xff pattern:$0x73625140] }
 0x171   :  { %v3950_v24 = vadd.f32 %v3949_v18, %v3937_v17  ;;  %v3951_v37 = vpop.f32.mrf.mxu3  ;;  %v6562_v10 = vld [vmem:[%s11143_s1 + $0xad0] sm:$0xf0]  ;;  %v6568_v11 = vld [vmem:[%s11143_s1 + $0x8d8] sm:$0xf]  ;;  %v6570_v16 = vld [vmem:[%s11143_s1 + $0xad8] sm:$0xf0]  ;;  %v6561_v17 = vor.u32 %v7721_v6, %v6560_v5 }
 0x172   :  { %v3938_v34 = vpop.f32.mrf.mxu2  ;;  %v6565_v18 = vor.u32 %v7657_v7, %v6562_v10  ;;  %v6576_v10 = vld [vmem:[%s11143_s1 + $0x8e0] sm:$0xf] }
 0x173   :  { %v6058_v34 = vld [vmem:[%s11143_s1 + $0x6d8] sm:$0xf0] }
 0x175   :  { %4167 = vmatpush.bf16.xpose.msrb.mxu0 %v6017_v25  ;;  %4180 = vmatpush.bf16.xpose.msrb.mxu1 %v6021_v26  ;;  %v6034_v25 = vld [vmem:[%s11143_s1 + $0x6c0] sm:$0xf0]  ;;  %v6040_v26 = vld [vmem:[%s11143_s1 + $0x4c8] sm:$0xf] }
 0x176   :  { %4193 = vmatpush.bf16.xpose.msrb.mxu2 %v6025_v27  ;;  %v7592_v27 = vld [vmem:[%s11143_s1 + $0x6c4] sm:$0xf0]  ;;  %v6037_v31 = vor.u32 %v7527_v22, %v6034_v25  ;;  %v6048_v25 = vld [vmem:[%s11143_s1 + $0x4d0] sm:$0xf] }
 0x177   :  { %4206 = vmatpush.bf16.xpose.msrb.mxu3 %v6029_v28  ;;  %v7528_v28 = vld [vmem:[%s11143_s1 + $0x4cc] sm:$0xf]  ;;  %v6041_v32 = vor.u32 %v7592_v27, %v6040_v26  ;;  %v7593_v26 = vld [vmem:[%s11143_s1 + $0x6cc] sm:$0xf0]  ;;  %v7529_v27 = vld [vmem:[%s11143_s1 + $0x4d4] sm:$0xf] }
 0x178   :  { %v6045_v33 = vor.u32 %v7528_v28, %v6042_v29 }
 0x17d   :  { %4168 = vmatpush.bf16.xpose.msrb.mxu0 %v5505_v42  ;;  %4181 = vmatpush.bf16.xpose.msrb.mxu1 %v5509_v46  ;;  %v7400_v42 = vld [vmem:[%s11143_s1 + $0xcc] sm:$0xf]  ;;  %v7785_v46 = vld [vmem:[%s11143_s1 + $0xcd4] sm:$0xf] }
 0x17e   :  { %4194 = vmatpush.bf16.xpose.msrb.mxu2 %v5513_v47  ;;  %v5521_v47 = vor.u32 %v7463_v36, %v5520_v35  ;;  %v5533_v56 = vor.u32 %v7400_v42, %v5530_v43  ;;  %v7077_v58 = vor.u32 %v7785_v46, %v7074_v48  ;;  %v6049_v35 = vor.u32 %v7593_v26, %v6048_v25  ;;  %v7401_v43 = vld [vmem:[%s11143_s1 + $0xd4] sm:$0xf]  ;;  %v7466_v46 = vld [vmem:[%s11143_s1 + $0x2d4] sm:$0xf0]  ;;  %v5546_v48 = vld [vmem:[%s11143_s1 + $0x2d8] sm:$0xf0] }
 0x17f   :  { %4207 = vmatpush.bf16.xpose.msrb.mxu3 %v5517_v51  ;;  %v5525_v51 = vor.u32 %v7399_v38, %v5522_v39 }
 0x181   :  { %v3962_v0 = vpop.f32.mrf.mxu0 }
 0x182   :  { %v3963_v2 = vadd.f32 %v3962_v0, %v3950_v24 }
 0x184   :  { %4169 = vmatmul.bf16.vlgmr.msrb.gmra.mxu0 %v433_v62  ;;  %4182 = vmatmul.bf16.vlgmr.msrb.gmra.mxu1 %v434_v4  ;;  %v165_v62 = vld.sshfl [vmem:[#allocation1 + $0x10] sm:$0xff pattern:$0x73625140]  ;;  %v3975_v4 = vpop.f32.mrf.mxu1 }
 0x185   :  { %4217 = vmatpush.bf16.xpose.msra.mxu0 %v7057_v52  ;;  %4230 = vmatpush.bf16.xpose.msra.mxu1 %v7061_v53  ;;  %v5529_v52 = vor.u32 %v7464_v41, %v5528_v40  ;;  %v7786_v53 = vld [vmem:[%s11143_s1 + $0xcdc] sm:$0xf]  ;;  %v439_v8 = vpack.c.bf16 %v165_v62, %v165_v62  ;;  %v5536_v40 = vld [vmem:[%s11143_s1 + $0xd0] sm:$0xf]  ;;  %v7089_v62 = vor.u32 %v7851_v50, %v7088_v49  ;;  %v5554_v49 = vld [vmem:[%s11143_s1 + $0x2e0] sm:$0xf0] }
 0x186   :  { %4243 = vmatpush.bf16.xpose.msra.mxu2 %v7065_v54  ;;  %4208 = vmatmul.bf16.vlgmr.msrb.gmra.mxu3 %v436_v9  ;;  %v7082_v54 = vld [vmem:[%s11143_s1 + $0xed8] sm:$0xf0]  ;;  %v438_v9 = vpack.c.bf16 %v164_v63, %v164_v63  ;;  %v7465_v41 = vld [vmem:[%s11143_s1 + $0x2cc] sm:$0xf0]  ;;  %v5560_v50 = vld [vmem:[%s11143_s1 + $0xe8] sm:$0xf] }
 0x187   :  { %4256 = vmatpush.bf16.xpose.msra.mxu3 %v7069_v55  ;;  %4195 = vmatmul.bf16.vlgmr.msrb.gmra.mxu2 %v435_v3  ;;  %v49_v55 = vld [vmem:[%s11144_s0 + $0x68] sm:$0xff]  ;;  %v7085_v60 = vor.u32 %v7786_v53, %v7082_v54  ;;  %v437_v3 = vpack.c.bf16 %v163_v61, %v163_v61  ;;  %v7090_v53 = vld [vmem:[%s11143_s1 + $0xee0] sm:$0xf0] }
 0x188   :  { %162 = vst [vmem:[#allocation1 + $0x20] ss:$4 sm:$0xff] %v49_v55  ;;  %v7096_v54 = vld [vmem:[%s11143_s1 + $0xce8] sm:$0xf] }
 0x189   :  { %v4001_v23 = vpop.f32.mrf.mxu3  ;;  %v3964_v24 = vpop.f32.mrf.mxu0  ;;  %v7852_v55 = vld [vmem:[%s11143_s1 + $0xee4] sm:$0xf0] }
 0x18a   :  { %v3988_v21 = vpop.f32.mrf.mxu2  ;;  %v7097_v0 = vor.u32 %v7852_v55, %v7096_v54  ;;  %v7104_v54 = vld [vmem:[%s11143_s1 + $0xcf0] sm:$0xf] }
 0x18b   :  { %v7853_v55 = vld [vmem:[%s11143_s1 + $0xeec] sm:$0xf0] }
 0x18c   :  { %v3977_v28 = vpop.f32.mrf.mxu1 }
 0x18d   :  { %4218 = vmatpush.bf16.xpose.msra.mxu0 %v6545_v12  ;;  %4231 = vmatpush.bf16.xpose.msra.mxu1 %v6549_v13  ;;  %v7722_v12 = vld [vmem:[%s11143_s1 + $0xad4] sm:$0xf0]  ;;  %v3976_v13 = vadd.f32 %v3975_v4, %v3963_v2 }
 0x18e   :  { %4244 = vmatpush.bf16.xpose.msra.mxu2 %v6553_v14  ;;  %v440_v14 = vpack.c.bf16 %v166_v1, %v166_v1  ;;  %v6569_v19 = vor.u32 %v7722_v12, %v6568_v11  ;;  %v7723_v11 = vld [vmem:[%s11143_s1 + $0xadc] sm:$0xf0]  ;;  %v7659_v12 = vld [vmem:[%s11143_s1 + $0x8e4] sm:$0xf] }
 0x18f   :  { %4257 = vmatpush.bf16.xpose.msra.mxu3 %v6557_v15  ;;  %v7658_v15 = vld [vmem:[%s11143_s1 + $0x8dc] sm:$0xf]  ;;  %v3989_v22 = vadd.f32 %v3988_v21, %v3976_v13  ;;  %v167_v2 = vld.sshfl [vmem:[#allocation1 + $0x20] sm:$0xff pattern:$0x73625140] }
 0x190   :  { %v6573_v20 = vor.u32 %v7658_v15, %v6570_v16  ;;  %v168_v4 = vld.sshfl [vmem:[#allocation1 + $0x28] sm:$0xff pattern:$0x73625140]  ;;  %v170_v6 = vld.sshfl [vmem:[#allocation1 + $0x38] sm:$0xff pattern:$0x73625140] }
 0x191   :  { %v4002_v29 = vadd.f32 %v4001_v23, %v3989_v22  ;;  %v4003_v42 = vpop.f32.mrf.mxu3  ;;  %v6578_v15 = vld [vmem:[%s11143_s1 + $0xae0] sm:$0xf0]  ;;  %v6584_v16 = vld [vmem:[%s11143_s1 + $0x8e8] sm:$0xf]  ;;  %v6586_v21 = vld [vmem:[%s11143_s1 + $0xae8] sm:$0xf0]  ;;  %v6577_v22 = vor.u32 %v7723_v11, %v6576_v10 }
 0x192   :  { %v3990_v39 = vpop.f32.mrf.mxu2  ;;  %v6581_v23 = vor.u32 %v7659_v12, %v6578_v15  ;;  %v6592_v15 = vld [vmem:[%s11143_s1 + $0x8f0] sm:$0xf] }
 0x193   :  { %v6074_v39 = vld [vmem:[%s11143_s1 + $0x6e8] sm:$0xf0] }
 0x195   :  { %4219 = vmatpush.bf16.xpose.msra.mxu0 %v6033_v30  ;;  %4232 = vmatpush.bf16.xpose.msra.mxu1 %v6037_v31  ;;  %v6050_v30 = vld [vmem:[%s11143_s1 + $0x6d0] sm:$0xf0]  ;;  %v6056_v31 = vld [vmem:[%s11143_s1 + $0x4d8] sm:$0xf] }
 0x196   :  { %4245 = vmatpush.bf16.xpose.msra.mxu2 %v6041_v32  ;;  %v7594_v32 = vld [vmem:[%s11143_s1 + $0x6d4] sm:$0xf0]  ;;  %v6053_v36 = vor.u32 %v7529_v27, %v6050_v30  ;;  %v6064_v30 = vld [vmem:[%s11143_s1 + $0x4e0] sm:$0xf] }
 0x197   :  { %4258 = vmatpush.bf16.xpose.msra.mxu3 %v6045_v33  ;;  %v7530_v33 = vld [vmem:[%s11143_s1 + $0x4dc] sm:$0xf]  ;;  %v6057_v37 = vor.u32 %v7594_v32, %v6056_v31  ;;  %v7595_v31 = vld [vmem:[%s11143_s1 + $0x6dc] sm:$0xf0]  ;;  %v7531_v32 = vld [vmem:[%s11143_s1 + $0x4e4] sm:$0xf] }
 0x198   :  { %v6061_v38 = vor.u32 %v7530_v33, %v6058_v34 }
 0x19d   :  { %4220 = vmatpush.bf16.xpose.msra.mxu0 %v5521_v47  ;;  %4233 = vmatpush.bf16.xpose.msra.mxu1 %v5525_v51  ;;  %v7402_v47 = vld [vmem:[%s11143_s1 + $0xdc] sm:$0xf]  ;;  %v7787_v51 = vld [vmem:[%s11143_s1 + $0xce4] sm:$0xf] }
 0x19e   :  { %4246 = vmatpush.bf16.xpose.msra.mxu2 %v5529_v52  ;;  %v5537_v52 = vor.u32 %v7465_v41, %v5536_v40  ;;  %v5549_v61 = vor.u32 %v7402_v47, %v5546_v48  ;;  %v7093_v63 = vor.u32 %v7787_v51, %v7090_v53  ;;  %v6065_v40 = vor.u32 %v7595_v31, %v6064_v30  ;;  %v7403_v48 = vld [vmem:[%s11143_s1 + $0xe4] sm:$0xf]  ;;  %v7468_v51 = vld [vmem:[%s11143_s1 + $0x2e4] sm:$0xf0]  ;;  %v5562_v53 = vld [vmem:[%s11143_s1 + $0x2e8] sm:$0xf0] }
 0x19f   :  { %4259 = vmatpush.bf16.xpose.msra.mxu3 %v5533_v56  ;;  %v5541_v56 = vor.u32 %v7401_v43, %v5538_v44 }
 0x1a1   :  { %v4014_v5 = vpop.f32.mrf.mxu0 }
 0x1a2   :  { %v4015_v7 = vadd.f32 %v4014_v5, %v4002_v29 }
 0x1a4   :  { %4221 = vmatmul.bf16.vlgmr.msra.gmra.mxu0 %v437_v3  ;;  %4234 = vmatmul.bf16.vlgmr.msra.gmra.mxu1 %v438_v9  ;;  %v169_v3 = vld.sshfl [vmem:[#allocation1 + $0x30] sm:$0xff pattern:$0x73625140]  ;;  %v4027_v9 = vpop.f32.mrf.mxu1 }
 0x1a5   :  { %4269 = vmatpush.bf16.xpose.msrb.mxu0 %v7073_v57  ;;  %4282 = vmatpush.bf16.xpose.msrb.mxu1 %v7077_v58  ;;  %v5545_v57 = vor.u32 %v7466_v46, %v5544_v45  ;;  %v7788_v58 = vld [vmem:[%s11143_s1 + $0xcec] sm:$0xf]  ;;  %v443_v13 = vpack.c.bf16 %v169_v3, %v169_v3  ;;  %v5552_v45 = vld [vmem:[%s11143_s1 + $0xe0] sm:$0xf]  ;;  %v7105_v3 = vor.u32 %v7853_v55, %v7104_v54  ;;  %v5570_v54 = vld [vmem:[%s11143_s1 + $0x2f0] sm:$0xf0] }
 0x1a6   :  { %4295 = vmatpush.bf16.xpose.msrb.mxu2 %v7081_v59  ;;  %4260 = vmatmul.bf16.vlgmr.msra.gmra.mxu3 %v440_v14  ;;  %v7098_v59 = vld [vmem:[%s11143_s1 + $0xee8] sm:$0xf0]  ;;  %v442_v14 = vpack.c.bf16 %v168_v4, %v168_v4  ;;  %v7467_v46 = vld [vmem:[%s11143_s1 + $0x2dc] sm:$0xf0]  ;;  %v5576_v55 = vld [vmem:[%s11143_s1 + $0xf8] sm:$0xf] }
 0x1a7   :  { %4308 = vmatpush.bf16.xpose.msrb.mxu3 %v7085_v60  ;;  %4247 = vmatmul.bf16.vlgmr.msra.gmra.mxu2 %v439_v8  ;;  %v50_v60 = vld [vmem:[%s11144_s0 + $0x70] sm:$0xff]  ;;  %v7101_v1 = vor.u32 %v7788_v58, %v7098_v59  ;;  %v441_v8 = vpack.c.bf16 %v167_v2, %v167_v2  ;;  %v7112_v59 = vld [vmem:[%s11143_s1 + $0xcf8] sm:$0xf] }
 0x1a8   :  { %171 = vst [vmem:[#allocation1] ss:$4 sm:$0xff] %v50_v60  ;;  %v7106_v58 = vld [vmem:[%s11143_s1 + $0xef0] sm:$0xf0]  ;;  %v7854_v60 = vld [vmem:[%s11143_s1 + $0xef4] sm:$0xf0] }
 0x1a9   :  { %v4053_v28 = vpop.f32.mrf.mxu3  ;;  %v4016_v29 = vpop.f32.mrf.mxu0  ;;  %v7113_v5 = vor.u32 %v7854_v60, %v7112_v59  ;;  %v7120_v59 = vld [vmem:[%s11143_s1 + $0xd00] sm:$0xf] }
 0x1aa   :  { %v4040_v26 = vpop.f32.mrf.mxu2  ;;  %v7855_v60 = vld [vmem:[%s11143_s1 + $0xefc] sm:$0xf0] }
 0x1ac   :  { %v4029_v33 = vpop.f32.mrf.mxu1 }
 0x1ad   :  { %4270 = vmatpush.bf16.xpose.msrb.mxu0 %v6561_v17  ;;  %4283 = vmatpush.bf16.xpose.msrb.mxu1 %v6565_v18  ;;  %v7724_v17 = vld [vmem:[%s11143_s1 + $0xae4] sm:$0xf0]  ;;  %v4028_v18 = vadd.f32 %v4027_v9, %v4015_v7 }
 0x1ae   :  { %4296 = vmatpush.bf16.xpose.msrb.mxu2 %v6569_v19  ;;  %v444_v19 = vpack.c.bf16 %v170_v6, %v170_v6  ;;  %v6585_v24 = vor.u32 %v7724_v17, %v6584_v16  ;;  %v7725_v16 = vld [vmem:[%s11143_s1 + $0xaec] sm:$0xf0]  ;;  %v7661_v17 = vld [vmem:[%s11143_s1 + $0x8f4] sm:$0xf] }
 0x1af   :  { %4309 = vmatpush.bf16.xpose.msrb.mxu3 %v6573_v20  ;;  %v7660_v20 = vld [vmem:[%s11143_s1 + $0x8ec] sm:$0xf]  ;;  %v4041_v27 = vadd.f32 %v4040_v26, %v4028_v18  ;;  %v173_v7 = vld.sshfl [vmem:[#allocation1] sm:$0xff pattern:$0x73625140] }
 0x1b0   :  { %v6589_v25 = vor.u32 %v7660_v20, %v6586_v21  ;;  %v174_v9 = vld.sshfl [vmem:[#allocation1 + $0x8] sm:$0xff pattern:$0x73625140]  ;;  %v176_v11 = vld.sshfl [vmem:[#allocation1 + $0x18] sm:$0xff pattern:$0x73625140] }
 0x1b1   :  { %v4054_v34 = vadd.f32 %v4053_v28, %v4041_v27  ;;  %v4055_v47 = vpop.f32.mrf.mxu3  ;;  %v6594_v20 = vld [vmem:[%s11143_s1 + $0xaf0] sm:$0xf0]  ;;  %v6600_v21 = vld [vmem:[%s11143_s1 + $0x8f8] sm:$0xf]  ;;  %v6602_v26 = vld [vmem:[%s11143_s1 + $0xaf8] sm:$0xf0]  ;;  %v6593_v27 = vor.u32 %v7725_v16, %v6592_v15 }
 0x1b2   :  { %v4042_v44 = vpop.f32.mrf.mxu2  ;;  %v6597_v28 = vor.u32 %v7661_v17, %v6594_v20  ;;  %v6608_v20 = vld [vmem:[%s11143_s1 + $0x900] sm:$0xf] }
 0x1b3   :  { %v6090_v44 = vld [vmem:[%s11143_s1 + $0x6f8] sm:$0xf0] }
 0x1b5   :  { %4271 = vmatpush.bf16.xpose.msrb.mxu0 %v6049_v35  ;;  %4284 = vmatpush.bf16.xpose.msrb.mxu1 %v6053_v36  ;;  %v6066_v35 = vld [vmem:[%s11143_s1 + $0x6e0] sm:$0xf0]  ;;  %v6072_v36 = vld [vmem:[%s11143_s1 + $0x4e8] sm:$0xf] }
 0x1b6   :  { %4297 = vmatpush.bf16.xpose.msrb.mxu2 %v6057_v37  ;;  %v7596_v37 = vld [vmem:[%s11143_s1 + $0x6e4] sm:$0xf0]  ;;  %v6069_v41 = vor.u32 %v7531_v32, %v6066_v35  ;;  %v6080_v35 = vld [vmem:[%s11143_s1 + $0x4f0] sm:$0xf] }
 0x1b7   :  { %4310 = vmatpush.bf16.xpose.msrb.mxu3 %v6061_v38  ;;  %v7532_v38 = vld [vmem:[%s11143_s1 + $0x4ec] sm:$0xf]  ;;  %v6073_v42 = vor.u32 %v7596_v37, %v6072_v36  ;;  %v7597_v36 = vld [vmem:[%s11143_s1 + $0x6ec] sm:$0xf0]  ;;  %v7533_v37 = vld [vmem:[%s11143_s1 + $0x4f4] sm:$0xf] }
 0x1b8   :  { %v6077_v43 = vor.u32 %v7532_v38, %v6074_v39 }
 0x1bd   :  { %4272 = vmatpush.bf16.xpose.msrb.mxu0 %v5537_v52  ;;  %4285 = vmatpush.bf16.xpose.msrb.mxu1 %v5541_v56  ;;  %v7404_v52 = vld [vmem:[%s11143_s1 + $0xec] sm:$0xf]  ;;  %v7789_v56 = vld [vmem:[%s11143_s1 + $0xcf4] sm:$0xf] }
 0x1be   :  { %4298 = vmatpush.bf16.xpose.msrb.mxu2 %v5545_v57  ;;  %v5553_v57 = vor.u32 %v7467_v46, %v5552_v45  ;;  %v5565_v2 = vor.u32 %v7404_v52, %v5562_v53  ;;  %v7109_v4 = vor.u32 %v7789_v56, %v7106_v58  ;;  %v6081_v45 = vor.u32 %v7597_v36, %v6080_v35  ;;  %v7405_v53 = vld [vmem:[%s11143_s1 + $0xf4] sm:$0xf]  ;;  %v7470_v56 = vld [vmem:[%s11143_s1 + $0x2f4] sm:$0xf0]  ;;  %v5578_v58 = vld [vmem:[%s11143_s1 + $0x2f8] sm:$0xf0] }
 0x1bf   :  { %4311 = vmatpush.bf16.xpose.msrb.mxu3 %v5549_v61  ;;  %v5557_v61 = vor.u32 %v7403_v48, %v5554_v49 }
 0x1c1   :  { %v4066_v10 = vpop.f32.mrf.mxu0 }
 0x1c2   :  { %v4067_v12 = vadd.f32 %v4066_v10, %v4054_v34 }
 0x1c4   :  { %4273 = vmatmul.bf16.vlgmr.msrb.gmra.mxu0 %v441_v8  ;;  %4286 = vmatmul.bf16.vlgmr.msrb.gmra.mxu1 %v442_v14  ;;  %v175_v8 = vld.sshfl [vmem:[#allocation1 + $0x10] sm:$0xff pattern:$0x73625140]  ;;  %v4079_v14 = vpop.f32.mrf.mxu1 }
 0x1c5   :  { %4321 = vmatpush.bf16.xpose.msra.mxu0 %v7089_v62  ;;  %4334 = vmatpush.bf16.xpose.msra.mxu1 %v7093_v63  ;;  %v5561_v62 = vor.u32 %v7468_v51, %v5560_v50  ;;  %v7790_v63 = vld [vmem:[%s11143_s1 + $0xcfc] sm:$0xf]  ;;  %v447_v18 = vpack.c.bf16 %v175_v8, %v175_v8  ;;  %v5568_v50 = vld [vmem:[%s11143_s1 + $0xf0] sm:$0xf]  ;;  %v7121_v8 = vor.u32 %v7855_v60, %v7120_v59  ;;  %v5586_v59 = vld [vmem:[%s11143_s1 + $0x300] sm:$0xf0] }
 0x1c6   :  { %4347 = vmatpush.bf16.xpose.msra.mxu2 %v7097_v0  ;;  %4312 = vmatmul.bf16.vlgmr.msrb.gmra.mxu3 %v444_v19  ;;  %v7114_v0 = vld [vmem:[%s11143_s1 + $0xef8] sm:$0xf0]  ;;  %v446_v19 = vpack.c.bf16 %v174_v9, %v174_v9  ;;  %v7469_v51 = vld [vmem:[%s11143_s1 + $0x2ec] sm:$0xf0]  ;;  %v5592_v60 = vld [vmem:[%s11143_s1 + $0x108] sm:$0xf] }
 0x1c7   :  { %4360 = vmatpush.bf16.xpose.msra.mxu3 %v7101_v1  ;;  %4299 = vmatmul.bf16.vlgmr.msrb.gmra.mxu2 %v443_v13  ;;  %v51_v1 = vld [vmem:[%s11144_s0 + $0x78] sm:$0xff]  ;;  %v7117_v6 = vor.u32 %v7790_v63, %v7114_v0  ;;  %v445_v13 = vpack.c.bf16 %v173_v7, %v173_v7  ;;  %v7122_v63 = vld [vmem:[%s11143_s1 + $0xf00] sm:$0xf0]  ;;  %v7128_v0 = vld [vmem:[%s11143_s1 + $0xd08] sm:$0xf] }
 0x1c8   :  { %172 = vst [vmem:[#allocation1 + $0x20] ss:$4 sm:$0xff] %v51_v1  ;;  %v7856_v1 = vld [vmem:[%s11143_s1 + $0xf04] sm:$0xf0] }
 0x1c9   :  { %v4105_v33 = vpop.f32.mrf.mxu3  ;;  %v4068_v34 = vpop.f32.mrf.mxu0  ;;  %v7129_v10 = vor.u32 %v7856_v1, %v7128_v0  ;;  %v7136_v0 = vld [vmem:[%s11143_s1 + $0xd10] sm:$0xf] }
 0x1ca   :  { %v4092_v31 = vpop.f32.mrf.mxu2  ;;  %v7857_v1 = vld [vmem:[%s11143_s1 + $0xf0c] sm:$0xf0] }
 0x1cc   :  { %v4081_v38 = vpop.f32.mrf.mxu1 }
 0x1cd   :  { %4322 = vmatpush.bf16.xpose.msra.mxu0 %v6577_v22  ;;  %4335 = vmatpush.bf16.xpose.msra.mxu1 %v6581_v23  ;;  %v7726_v22 = vld [vmem:[%s11143_s1 + $0xaf4] sm:$0xf0]  ;;  %v4080_v23 = vadd.f32 %v4079_v14, %v4067_v12 }
 0x1ce   :  { %4348 = vmatpush.bf16.xpose.msra.mxu2 %v6585_v24  ;;  %v448_v24 = vpack.c.bf16 %v176_v11, %v176_v11  ;;  %v6601_v29 = vor.u32 %v7726_v22, %v6600_v21  ;;  %v7727_v21 = vld [vmem:[%s11143_s1 + $0xafc] sm:$0xf0]  ;;  %v7663_v22 = vld [vmem:[%s11143_s1 + $0x904] sm:$0xf] }
 0x1cf   :  { %4361 = vmatpush.bf16.xpose.msra.mxu3 %v6589_v25  ;;  %v7662_v25 = vld [vmem:[%s11143_s1 + $0x8fc] sm:$0xf]  ;;  %v4093_v32 = vadd.f32 %v4092_v31, %v4080_v23  ;;  %v177_v12 = vld.sshfl [vmem:[#allocation1 + $0x20] sm:$0xff pattern:$0x73625140] }
 0x1d0   :  { %v6605_v30 = vor.u32 %v7662_v25, %v6602_v26  ;;  %v178_v14 = vld.sshfl [vmem:[#allocation1 + $0x28] sm:$0xff pattern:$0x73625140]  ;;  %v180_v16 = vld.sshfl [vmem:[#allocation1 + $0x38] sm:$0xff pattern:$0x73625140] }
 0x1d1   :  { %v4106_v39 = vadd.f32 %v4105_v33, %v4093_v32  ;;  %v4107_v52 = vpop.f32.mrf.mxu3  ;;  %v6610_v25 = vld [vmem:[%s11143_s1 + $0xb00] sm:$0xf0]  ;;  %v6616_v26 = vld [vmem:[%s11143_s1 + $0x908] sm:$0xf]  ;;  %v6618_v31 = vld [vmem:[%s11143_s1 + $0xb08] sm:$0xf0]  ;;  %v6609_v32 = vor.u32 %v7727_v21, %v6608_v20 }
 0x1d2   :  { %v4094_v49 = vpop.f32.mrf.mxu2  ;;  %v6613_v33 = vor.u32 %v7663_v22, %v6610_v25  ;;  %v6624_v25 = vld [vmem:[%s11143_s1 + $0x910] sm:$0xf] }
 0x1d3   :  { %v6106_v49 = vld [vmem:[%s11143_s1 + $0x708] sm:$0xf0] }
 0x1d5   :  { %4323 = vmatpush.bf16.xpose.msra.mxu0 %v6065_v40  ;;  %4336 = vmatpush.bf16.xpose.msra.mxu1 %v6069_v41  ;;  %v6082_v40 = vld [vmem:[%s11143_s1 + $0x6f0] sm:$0xf0]  ;;  %v6088_v41 = vld [vmem:[%s11143_s1 + $0x4f8] sm:$0xf] }
 0x1d6   :  { %4349 = vmatpush.bf16.xpose.msra.mxu2 %v6073_v42  ;;  %v7598_v42 = vld [vmem:[%s11143_s1 + $0x6f4] sm:$0xf0]  ;;  %v6085_v46 = vor.u32 %v7533_v37, %v6082_v40  ;;  %v6096_v40 = vld [vmem:[%s11143_s1 + $0x500] sm:$0xf] }
 0x1d7   :  { %4362 = vmatpush.bf16.xpose.msra.mxu3 %v6077_v43  ;;  %v7534_v43 = vld [vmem:[%s11143_s1 + $0x4fc] sm:$0xf]  ;;  %v6089_v47 = vor.u32 %v7598_v42, %v6088_v41  ;;  %v7599_v41 = vld [vmem:[%s11143_s1 + $0x6fc] sm:$0xf0]  ;;  %v7535_v42 = vld [vmem:[%s11143_s1 + $0x504] sm:$0xf] }
 0x1d8   :  { %v6093_v48 = vor.u32 %v7534_v43, %v6090_v44 }
 0x1dd   :  { %4324 = vmatpush.bf16.xpose.msra.mxu0 %v5553_v57  ;;  %4337 = vmatpush.bf16.xpose.msra.mxu1 %v5557_v61  ;;  %v7406_v57 = vld [vmem:[%s11143_s1 + $0xfc] sm:$0xf]  ;;  %v7791_v61 = vld [vmem:[%s11143_s1 + $0xd04] sm:$0xf] }
 0x1de   :  { %4350 = vmatpush.bf16.xpose.msra.mxu2 %v5561_v62  ;;  %v5569_v62 = vor.u32 %v7469_v51, %v5568_v50  ;;  %v5581_v7 = vor.u32 %v7406_v57, %v5578_v58  ;;  %v7125_v9 = vor.u32 %v7791_v61, %v7122_v63  ;;  %v6097_v50 = vor.u32 %v7599_v41, %v6096_v40  ;;  %v7407_v58 = vld [vmem:[%s11143_s1 + $0x104] sm:$0xf]  ;;  %v7472_v61 = vld [vmem:[%s11143_s1 + $0x304] sm:$0xf0]  ;;  %v5594_v63 = vld [vmem:[%s11143_s1 + $0x308] sm:$0xf0] }
 0x1df   :  { %4363 = vmatpush.bf16.xpose.msra.mxu3 %v5565_v2  ;;  %v5573_v2 = vor.u32 %v7405_v53, %v5570_v54 }
 0x1e1   :  { %v4118_v15 = vpop.f32.mrf.mxu0 }
 0x1e2   :  { %v4119_v17 = vadd.f32 %v4118_v15, %v4106_v39 }
 0x1e4   :  { %4325 = vmatmul.bf16.vlgmr.msra.gmra.mxu0 %v445_v13  ;;  %4338 = vmatmul.bf16.vlgmr.msra.gmra.mxu1 %v446_v19  ;;  %v179_v13 = vld.sshfl [vmem:[#allocation1 + $0x30] sm:$0xff pattern:$0x73625140]  ;;  %v4131_v19 = vpop.f32.mrf.mxu1 }
 0x1e5   :  { %4373 = vmatpush.bf16.xpose.msrb.mxu0 %v7105_v3  ;;  %4386 = vmatpush.bf16.xpose.msrb.mxu1 %v7109_v4  ;;  %v5577_v3 = vor.u32 %v7470_v56, %v5576_v55  ;;  %v7792_v4 = vld [vmem:[%s11143_s1 + $0xd0c] sm:$0xf]  ;;  %v451_v23 = vpack.c.bf16 %v179_v13, %v179_v13  ;;  %v5584_v55 = vld [vmem:[%s11143_s1 + $0x100] sm:$0xf]  ;;  %v7137_v13 = vor.u32 %v7857_v1, %v7136_v0  ;;  %v5602_v0 = vld [vmem:[%s11143_s1 + $0x310] sm:$0xf0] }
 0x1e6   :  { %4399 = vmatpush.bf16.xpose.msrb.mxu2 %v7113_v5  ;;  %4364 = vmatmul.bf16.vlgmr.msra.gmra.mxu3 %v448_v24  ;;  %v7130_v5 = vld [vmem:[%s11143_s1 + $0xf08] sm:$0xf0]  ;;  %v450_v24 = vpack.c.bf16 %v178_v14, %v178_v14  ;;  %v7471_v56 = vld [vmem:[%s11143_s1 + $0x2fc] sm:$0xf0]  ;;  %v5608_v1 = vld [vmem:[%s11143_s1 + $0x118] sm:$0xf] }
 0x1e7   :  { %4412 = vmatpush.bf16.xpose.msrb.mxu3 %v7117_v6  ;;  %4351 = vmatmul.bf16.vlgmr.msra.gmra.mxu2 %v447_v18  ;;  %v52_v6 = vld [vmem:[%s11144_s0 + $0x80] sm:$0xff]  ;;  %v7133_v11 = vor.u32 %v7792_v4, %v7130_v5  ;;  %v449_v18 = vpack.c.bf16 %v177_v12, %v177_v12  ;;  %v7138_v4 = vld [vmem:[%s11143_s1 + $0xf10] sm:$0xf0]  ;;  %v7144_v5 = vld [vmem:[%s11143_s1 + $0xd18] sm:$0xf] }
 0x1e8   :  { %181 = vst [vmem:[#allocation1] ss:$4 sm:$0xff] %v52_v6  ;;  %v7858_v6 = vld [vmem:[%s11143_s1 + $0xf14] sm:$0xf0] }
 0x1e9   :  { %v4157_v38 = vpop.f32.mrf.mxu3  ;;  %v4120_v39 = vpop.f32.mrf.mxu0  ;;  %v7145_v15 = vor.u32 %v7858_v6, %v7144_v5  ;;  %v7152_v5 = vld [vmem:[%s11143_s1 + $0xd20] sm:$0xf] }
 0x1ea   :  { %v4144_v36 = vpop.f32.mrf.mxu2  ;;  %v7859_v6 = vld [vmem:[%s11143_s1 + $0xf1c] sm:$0xf0] }
 0x1ec   :  { %v4133_v43 = vpop.f32.mrf.mxu1 }
 0x1ed   :  { %4374 = vmatpush.bf16.xpose.msrb.mxu0 %v6593_v27  ;;  %4387 = vmatpush.bf16.xpose.msrb.mxu1 %v6597_v28  ;;  %v7728_v27 = vld [vmem:[%s11143_s1 + $0xb04] sm:$0xf0]  ;;  %v4132_v28 = vadd.f32 %v4131_v19, %v4119_v17 }
 0x1ee   :  { %4400 = vmatpush.bf16.xpose.msrb.mxu2 %v6601_v29  ;;  %v452_v29 = vpack.c.bf16 %v180_v16, %v180_v16  ;;  %v6617_v34 = vor.u32 %v7728_v27, %v6616_v26  ;;  %v7729_v26 = vld [vmem:[%s11143_s1 + $0xb0c] sm:$0xf0]  ;;  %v7665_v27 = vld [vmem:[%s11143_s1 + $0x914] sm:$0xf] }
 0x1ef   :  { %4413 = vmatpush.bf16.xpose.msrb.mxu3 %v6605_v30  ;;  %v7664_v30 = vld [vmem:[%s11143_s1 + $0x90c] sm:$0xf]  ;;  %v4145_v37 = vadd.f32 %v4144_v36, %v4132_v28  ;;  %v183_v17 = vld.sshfl [vmem:[#allocation1] sm:$0xff pattern:$0x73625140] }
 0x1f0   :  { %v6621_v35 = vor.u32 %v7664_v30, %v6618_v31  ;;  %v184_v19 = vld.sshfl [vmem:[#allocation1 + $0x8] sm:$0xff pattern:$0x73625140]  ;;  %v186_v21 = vld.sshfl [vmem:[#allocation1 + $0x18] sm:$0xff pattern:$0x73625140] }
 0x1f1   :  { %v4158_v44 = vadd.f32 %v4157_v38, %v4145_v37  ;;  %v4159_v57 = vpop.f32.mrf.mxu3  ;;  %v6626_v30 = vld [vmem:[%s11143_s1 + $0xb10] sm:$0xf0]  ;;  %v6632_v31 = vld [vmem:[%s11143_s1 + $0x918] sm:$0xf]  ;;  %v6634_v36 = vld [vmem:[%s11143_s1 + $0xb18] sm:$0xf0]  ;;  %v6625_v37 = vor.u32 %v7729_v26, %v6624_v25 }
 0x1f2   :  { %v4146_v54 = vpop.f32.mrf.mxu2  ;;  %v6629_v38 = vor.u32 %v7665_v27, %v6626_v30  ;;  %v6640_v30 = vld [vmem:[%s11143_s1 + $0x920] sm:$0xf] }
 0x1f3   :  { %v6122_v54 = vld [vmem:[%s11143_s1 + $0x718] sm:$0xf0] }
 0x1f5   :  { %4375 = vmatpush.bf16.xpose.msrb.mxu0 %v6081_v45  ;;  %4388 = vmatpush.bf16.xpose.msrb.mxu1 %v6085_v46  ;;  %v6098_v45 = vld [vmem:[%s11143_s1 + $0x700] sm:$0xf0]  ;;  %v6104_v46 = vld [vmem:[%s11143_s1 + $0x508] sm:$0xf] }
 0x1f6   :  { %4401 = vmatpush.bf16.xpose.msrb.mxu2 %v6089_v47  ;;  %v7600_v47 = vld [vmem:[%s11143_s1 + $0x704] sm:$0xf0]  ;;  %v6101_v51 = vor.u32 %v7535_v42, %v6098_v45  ;;  %v6112_v45 = vld [vmem:[%s11143_s1 + $0x510] sm:$0xf] }
 0x1f7   :  { %4414 = vmatpush.bf16.xpose.msrb.mxu3 %v6093_v48  ;;  %v7536_v48 = vld [vmem:[%s11143_s1 + $0x50c] sm:$0xf]  ;;  %v6105_v52 = vor.u32 %v7600_v47, %v6104_v46  ;;  %v7601_v46 = vld [vmem:[%s11143_s1 + $0x70c] sm:$0xf0]  ;;  %v7537_v47 = vld [vmem:[%s11143_s1 + $0x514] sm:$0xf] }
 0x1f8   :  { %v6109_v53 = vor.u32 %v7536_v48, %v6106_v49 }
 0x1fd   :  { %4376 = vmatpush.bf16.xpose.msrb.mxu0 %v5569_v62  ;;  %4389 = vmatpush.bf16.xpose.msrb.mxu1 %v5573_v2  ;;  %v7408_v62 = vld [vmem:[%s11143_s1 + $0x10c] sm:$0xf]  ;;  %v7793_v2 = vld [vmem:[%s11143_s1 + $0xd14] sm:$0xf] }
 0x1fe   :  { %4402 = vmatpush.bf16.xpose.msrb.mxu2 %v5577_v3  ;;  %v5585_v3 = vor.u32 %v7471_v56, %v5584_v55  ;;  %v5597_v12 = vor.u32 %v7408_v62, %v5594_v63  ;;  %v7141_v14 = vor.u32 %v7793_v2, %v7138_v4  ;;  %v6113_v55 = vor.u32 %v7601_v46, %v6112_v45  ;;  %v7409_v63 = vld [vmem:[%s11143_s1 + $0x114] sm:$0xf]  ;;  %v7474_v2 = vld [vmem:[%s11143_s1 + $0x314] sm:$0xf0]  ;;  %v5610_v4 = vld [vmem:[%s11143_s1 + $0x318] sm:$0xf0] }
 0x1ff   :  { %4415 = vmatpush.bf16.xpose.msrb.mxu3 %v5581_v7  ;;  %v5589_v7 = vor.u32 %v7407_v58, %v5586_v59 }
 0x201   :  { %v4170_v20 = vpop.f32.mrf.mxu0 }
 0x202   :  { %v4171_v22 = vadd.f32 %v4170_v20, %v4158_v44 }
 0x204   :  { %4377 = vmatmul.bf16.vlgmr.msrb.gmra.mxu0 %v449_v18  ;;  %4390 = vmatmul.bf16.vlgmr.msrb.gmra.mxu1 %v450_v24  ;;  %v185_v18 = vld.sshfl [vmem:[#allocation1 + $0x10] sm:$0xff pattern:$0x73625140]  ;;  %v4183_v24 = vpop.f32.mrf.mxu1 }
 0x205   :  { %4425 = vmatpush.bf16.xpose.msra.mxu0 %v7121_v8  ;;  %4438 = vmatpush.bf16.xpose.msra.mxu1 %v7125_v9  ;;  %v5593_v8 = vor.u32 %v7472_v61, %v5592_v60  ;;  %v7794_v9 = vld [vmem:[%s11143_s1 + $0xd1c] sm:$0xf]  ;;  %v455_v28 = vpack.c.bf16 %v185_v18, %v185_v18  ;;  %v5600_v60 = vld [vmem:[%s11143_s1 + $0x110] sm:$0xf]  ;;  %v7153_v18 = vor.u32 %v7859_v6, %v7152_v5  ;;  %v5618_v5 = vld [vmem:[%s11143_s1 + $0x320] sm:$0xf0] }
 0x206   :  { %4451 = vmatpush.bf16.xpose.msra.mxu2 %v7129_v10  ;;  %4416 = vmatmul.bf16.vlgmr.msrb.gmra.mxu3 %v452_v29  ;;  %v7146_v10 = vld [vmem:[%s11143_s1 + $0xf18] sm:$0xf0]  ;;  %v454_v29 = vpack.c.bf16 %v184_v19, %v184_v19  ;;  %v7473_v61 = vld [vmem:[%s11143_s1 + $0x30c] sm:$0xf0]  ;;  %v5624_v6 = vld [vmem:[%s11143_s1 + $0x128] sm:$0xf] }
 0x207   :  { %4464 = vmatpush.bf16.xpose.msra.mxu3 %v7133_v11  ;;  %4403 = vmatmul.bf16.vlgmr.msrb.gmra.mxu2 %v451_v23  ;;  %v53_v11 = vld [vmem:[%s11144_s0 + $0x88] sm:$0xff]  ;;  %v7149_v16 = vor.u32 %v7794_v9, %v7146_v10  ;;  %v453_v23 = vpack.c.bf16 %v183_v17, %v183_v17  ;;  %v7154_v9 = vld [vmem:[%s11143_s1 + $0xf20] sm:$0xf0] }
 0x208   :  { %182 = vst [vmem:[#allocation1 + $0x20] ss:$4 sm:$0xff] %v53_v11  ;;  %v7160_v10 = vld [vmem:[%s11143_s1 + $0xd28] sm:$0xf] }
 0x209   :  { %v4209_v43 = vpop.f32.mrf.mxu3  ;;  %v4172_v44 = vpop.f32.mrf.mxu0  ;;  %v7860_v11 = vld [vmem:[%s11143_s1 + $0xf24] sm:$0xf0] }
 0x20a   :  { %v4196_v41 = vpop.f32.mrf.mxu2  ;;  %v7161_v20 = vor.u32 %v7860_v11, %v7160_v10  ;;  %v7168_v10 = vld [vmem:[%s11143_s1 + $0xd30] sm:$0xf] }
 0x20b   :  { %v7861_v11 = vld [vmem:[%s11143_s1 + $0xf2c] sm:$0xf0] }
 0x20c   :  { %v4185_v48 = vpop.f32.mrf.mxu1 }
 0x20d   :  { %4426 = vmatpush.bf16.xpose.msra.mxu0 %v6609_v32  ;;  %4439 = vmatpush.bf16.xpose.msra.mxu1 %v6613_v33  ;;  %v7730_v32 = vld [vmem:[%s11143_s1 + $0xb14] sm:$0xf0]  ;;  %v4184_v33 = vadd.f32 %v4183_v24, %v4171_v22 }
 0x20e   :  { %4452 = vmatpush.bf16.xpose.msra.mxu2 %v6617_v34  ;;  %v456_v34 = vpack.c.bf16 %v186_v21, %v186_v21  ;;  %v6633_v39 = vor.u32 %v7730_v32, %v6632_v31  ;;  %v7731_v31 = vld [vmem:[%s11143_s1 + $0xb1c] sm:$0xf0]  ;;  %v7667_v32 = vld [vmem:[%s11143_s1 + $0x924] sm:$0xf] }
 0x20f   :  { %4465 = vmatpush.bf16.xpose.msra.mxu3 %v6621_v35  ;;  %v7666_v35 = vld [vmem:[%s11143_s1 + $0x91c] sm:$0xf]  ;;  %v4197_v42 = vadd.f32 %v4196_v41, %v4184_v33  ;;  %v187_v22 = vld.sshfl [vmem:[#allocation1 + $0x20] sm:$0xff pattern:$0x73625140] }
 0x210   :  { %v6637_v40 = vor.u32 %v7666_v35, %v6634_v36  ;;  %v188_v24 = vld.sshfl [vmem:[#allocation1 + $0x28] sm:$0xff pattern:$0x73625140]  ;;  %v190_v26 = vld.sshfl [vmem:[#allocation1 + $0x38] sm:$0xff pattern:$0x73625140] }
 0x211   :  { %v4210_v49 = vadd.f32 %v4209_v43, %v4197_v42  ;;  %v4211_v62 = vpop.f32.mrf.mxu3  ;;  %v6642_v35 = vld [vmem:[%s11143_s1 + $0xb20] sm:$0xf0]  ;;  %v6648_v36 = vld [vmem:[%s11143_s1 + $0x928] sm:$0xf]  ;;  %v6650_v41 = vld [vmem:[%s11143_s1 + $0xb28] sm:$0xf0]  ;;  %v6641_v42 = vor.u32 %v7731_v31, %v6640_v30 }
 0x212   :  { %v4198_v59 = vpop.f32.mrf.mxu2  ;;  %v6645_v43 = vor.u32 %v7667_v32, %v6642_v35  ;;  %v6656_v35 = vld [vmem:[%s11143_s1 + $0x930] sm:$0xf] }
 0x213   :  { %v6138_v59 = vld [vmem:[%s11143_s1 + $0x728] sm:$0xf0] }
 0x215   :  { %4427 = vmatpush.bf16.xpose.msra.mxu0 %v6097_v50  ;;  %4440 = vmatpush.bf16.xpose.msra.mxu1 %v6101_v51  ;;  %v6114_v50 = vld [vmem:[%s11143_s1 + $0x710] sm:$0xf0]  ;;  %v6120_v51 = vld [vmem:[%s11143_s1 + $0x518] sm:$0xf] }
 0x216   :  { %4453 = vmatpush.bf16.xpose.msra.mxu2 %v6105_v52  ;;  %v7602_v52 = vld [vmem:[%s11143_s1 + $0x714] sm:$0xf0]  ;;  %v6117_v56 = vor.u32 %v7537_v47, %v6114_v50  ;;  %v6128_v50 = vld [vmem:[%s11143_s1 + $0x520] sm:$0xf] }
 0x217   :  { %4466 = vmatpush.bf16.xpose.msra.mxu3 %v6109_v53  ;;  %v7538_v53 = vld [vmem:[%s11143_s1 + $0x51c] sm:$0xf]  ;;  %v6121_v57 = vor.u32 %v7602_v52, %v6120_v51  ;;  %v7603_v51 = vld [vmem:[%s11143_s1 + $0x71c] sm:$0xf0]  ;;  %v7539_v52 = vld [vmem:[%s11143_s1 + $0x524] sm:$0xf] }
 0x218   :  { %v6125_v58 = vor.u32 %v7538_v53, %v6122_v54 }
 0x21d   :  { %4428 = vmatpush.bf16.xpose.msra.mxu0 %v5585_v3  ;;  %4441 = vmatpush.bf16.xpose.msra.mxu1 %v5589_v7  ;;  %v7410_v3 = vld [vmem:[%s11143_s1 + $0x11c] sm:$0xf]  ;;  %v7795_v7 = vld [vmem:[%s11143_s1 + $0xd24] sm:$0xf] }
 0x21e   :  { %4454 = vmatpush.bf16.xpose.msra.mxu2 %v5593_v8  ;;  %v5601_v8 = vor.u32 %v7473_v61, %v5600_v60  ;;  %v5613_v17 = vor.u32 %v7410_v3, %v5610_v4  ;;  %v7157_v19 = vor.u32 %v7795_v7, %v7154_v9  ;;  %v6129_v60 = vor.u32 %v7603_v51, %v6128_v50  ;;  %v7411_v4 = vld [vmem:[%s11143_s1 + $0x124] sm:$0xf]  ;;  %v7476_v7 = vld [vmem:[%s11143_s1 + $0x324] sm:$0xf0]  ;;  %v5626_v9 = vld [vmem:[%s11143_s1 + $0x328] sm:$0xf0] }
 0x21f   :  { %4467 = vmatpush.bf16.xpose.msra.mxu3 %v5597_v12  ;;  %v5605_v12 = vor.u32 %v7409_v63, %v5602_v0 }
 0x221   :  { %v4222_v25 = vpop.f32.mrf.mxu0 }
 0x222   :  { %v4223_v27 = vadd.f32 %v4222_v25, %v4210_v49 }
 0x224   :  { %4429 = vmatmul.bf16.vlgmr.msra.gmra.mxu0 %v453_v23  ;;  %4442 = vmatmul.bf16.vlgmr.msra.gmra.mxu1 %v454_v29  ;;  %v189_v23 = vld.sshfl [vmem:[#allocation1 + $0x30] sm:$0xff pattern:$0x73625140]  ;;  %v4235_v29 = vpop.f32.mrf.mxu1 }
 0x225   :  { %4477 = vmatpush.bf16.xpose.msrb.mxu0 %v7137_v13  ;;  %4490 = vmatpush.bf16.xpose.msrb.mxu1 %v7141_v14  ;;  %v5609_v13 = vor.u32 %v7474_v2, %v5608_v1  ;;  %v7796_v14 = vld [vmem:[%s11143_s1 + $0xd2c] sm:$0xf]  ;;  %v459_v33 = vpack.c.bf16 %v189_v23, %v189_v23  ;;  %v5616_v1 = vld [vmem:[%s11143_s1 + $0x120] sm:$0xf]  ;;  %v7169_v23 = vor.u32 %v7861_v11, %v7168_v10  ;;  %v5634_v10 = vld [vmem:[%s11143_s1 + $0x330] sm:$0xf0] }
 0x226   :  { %4503 = vmatpush.bf16.xpose.msrb.mxu2 %v7145_v15  ;;  %4468 = vmatmul.bf16.vlgmr.msra.gmra.mxu3 %v456_v34  ;;  %v7162_v15 = vld [vmem:[%s11143_s1 + $0xf28] sm:$0xf0]  ;;  %v458_v34 = vpack.c.bf16 %v188_v24, %v188_v24  ;;  %v7475_v2 = vld [vmem:[%s11143_s1 + $0x31c] sm:$0xf0]  ;;  %v5640_v11 = vld [vmem:[%s11143_s1 + $0x138] sm:$0xf] }
 0x227   :  { %4516 = vmatpush.bf16.xpose.msrb.mxu3 %v7149_v16  ;;  %4455 = vmatmul.bf16.vlgmr.msra.gmra.mxu2 %v455_v28  ;;  %v54_v16 = vld [vmem:[%s11144_s0 + $0x90] sm:$0xff]  ;;  %v7165_v21 = vor.u32 %v7796_v14, %v7162_v15  ;;  %v457_v28 = vpack.c.bf16 %v187_v22, %v187_v22  ;;  %v7176_v15 = vld [vmem:[%s11143_s1 + $0xd38] sm:$0xf] }
 0x228   :  { %191 = vst [vmem:[#allocation1] ss:$4 sm:$0xff] %v54_v16  ;;  %v7170_v14 = vld [vmem:[%s11143_s1 + $0xf30] sm:$0xf0]  ;;  %v7862_v16 = vld [vmem:[%s11143_s1 + $0xf34] sm:$0xf0] }
 0x229   :  { %v4261_v48 = vpop.f32.mrf.mxu3  ;;  %v4224_v49 = vpop.f32.mrf.mxu0  ;;  %v7177_v25 = vor.u32 %v7862_v16, %v7176_v15  ;;  %v7184_v15 = vld [vmem:[%s11143_s1 + $0xd40] sm:$0xf] }
 0x22a   :  { %v4248_v46 = vpop.f32.mrf.mxu2  ;;  %v7863_v16 = vld [vmem:[%s11143_s1 + $0xf3c] sm:$0xf0] }
 0x22c   :  { %v4237_v53 = vpop.f32.mrf.mxu1 }
 0x22d   :  { %4478 = vmatpush.bf16.xpose.msrb.mxu0 %v6625_v37  ;;  %4491 = vmatpush.bf16.xpose.msrb.mxu1 %v6629_v38  ;;  %v7732_v37 = vld [vmem:[%s11143_s1 + $0xb24] sm:$0xf0]  ;;  %v4236_v38 = vadd.f32 %v4235_v29, %v4223_v27 }
 0x22e   :  { %4504 = vmatpush.bf16.xpose.msrb.mxu2 %v6633_v39  ;;  %v460_v39 = vpack.c.bf16 %v190_v26, %v190_v26  ;;  %v6649_v44 = vor.u32 %v7732_v37, %v6648_v36  ;;  %v7733_v36 = vld [vmem:[%s11143_s1 + $0xb2c] sm:$0xf0]  ;;  %v7669_v37 = vld [vmem:[%s11143_s1 + $0x934] sm:$0xf] }
 0x22f   :  { %4517 = vmatpush.bf16.xpose.msrb.mxu3 %v6637_v40  ;;  %v7668_v40 = vld [vmem:[%s11143_s1 + $0x92c] sm:$0xf]  ;;  %v4249_v47 = vadd.f32 %v4248_v46, %v4236_v38  ;;  %v193_v27 = vld.sshfl [vmem:[#allocation1] sm:$0xff pattern:$0x73625140] }
 0x230   :  { %v6653_v45 = vor.u32 %v7668_v40, %v6650_v41  ;;  %v194_v29 = vld.sshfl [vmem:[#allocation1 + $0x8] sm:$0xff pattern:$0x73625140]  ;;  %v196_v31 = vld.sshfl [vmem:[#allocation1 + $0x18] sm:$0xff pattern:$0x73625140] }
 0x231   :  { %v4262_v54 = vadd.f32 %v4261_v48, %v4249_v47  ;;  %v4263_v3 = vpop.f32.mrf.mxu3  ;;  %v6658_v40 = vld [vmem:[%s11143_s1 + $0xb30] sm:$0xf0]  ;;  %v6664_v41 = vld [vmem:[%s11143_s1 + $0x938] sm:$0xf]  ;;  %v6666_v46 = vld [vmem:[%s11143_s1 + $0xb38] sm:$0xf0]  ;;  %v6657_v47 = vor.u32 %v7733_v36, %v6656_v35 }
 0x232   :  { %v4250_v0 = vpop.f32.mrf.mxu2  ;;  %v6661_v48 = vor.u32 %v7669_v37, %v6658_v40  ;;  %v6672_v40 = vld [vmem:[%s11143_s1 + $0x940] sm:$0xf] }
 0x233   :  { %v6154_v0 = vld [vmem:[%s11143_s1 + $0x738] sm:$0xf0] }
 0x235   :  { %4479 = vmatpush.bf16.xpose.msrb.mxu0 %v6113_v55  ;;  %4492 = vmatpush.bf16.xpose.msrb.mxu1 %v6117_v56  ;;  %v6130_v55 = vld [vmem:[%s11143_s1 + $0x720] sm:$0xf0]  ;;  %v6136_v56 = vld [vmem:[%s11143_s1 + $0x528] sm:$0xf] }
 0x236   :  { %4505 = vmatpush.bf16.xpose.msrb.mxu2 %v6121_v57  ;;  %v7604_v57 = vld [vmem:[%s11143_s1 + $0x724] sm:$0xf0]  ;;  %v6133_v61 = vor.u32 %v7539_v52, %v6130_v55  ;;  %v6144_v55 = vld [vmem:[%s11143_s1 + $0x530] sm:$0xf] }
 0x237   :  { %4518 = vmatpush.bf16.xpose.msrb.mxu3 %v6125_v58  ;;  %v7540_v58 = vld [vmem:[%s11143_s1 + $0x52c] sm:$0xf]  ;;  %v6137_v62 = vor.u32 %v7604_v57, %v6136_v56  ;;  %v7605_v56 = vld [vmem:[%s11143_s1 + $0x72c] sm:$0xf0]  ;;  %v7541_v57 = vld [vmem:[%s11143_s1 + $0x534] sm:$0xf] }
 0x238   :  { %v6141_v63 = vor.u32 %v7540_v58, %v6138_v59 }
 0x23d   :  { %4480 = vmatpush.bf16.xpose.msrb.mxu0 %v5601_v8  ;;  %4493 = vmatpush.bf16.xpose.msrb.mxu1 %v5605_v12  ;;  %v7412_v8 = vld [vmem:[%s11143_s1 + $0x12c] sm:$0xf]  ;;  %v7797_v12 = vld [vmem:[%s11143_s1 + $0xd34] sm:$0xf] }
 0x23e   :  { %4506 = vmatpush.bf16.xpose.msrb.mxu2 %v5609_v13  ;;  %v5617_v13 = vor.u32 %v7475_v2, %v5616_v1  ;;  %v5629_v22 = vor.u32 %v7412_v8, %v5626_v9  ;;  %v7173_v24 = vor.u32 %v7797_v12, %v7170_v14  ;;  %v6145_v1 = vor.u32 %v7605_v56, %v6144_v55  ;;  %v7413_v9 = vld [vmem:[%s11143_s1 + $0x134] sm:$0xf]  ;;  %v7478_v12 = vld [vmem:[%s11143_s1 + $0x334] sm:$0xf0]  ;;  %v5642_v14 = vld [vmem:[%s11143_s1 + $0x338] sm:$0xf0] }
 0x23f   :  { %4519 = vmatpush.bf16.xpose.msrb.mxu3 %v5613_v17  ;;  %v5621_v17 = vor.u32 %v7411_v4, %v5618_v5 }
 0x241   :  { %v4274_v30 = vpop.f32.mrf.mxu0 }
 0x242   :  { %v4275_v32 = vadd.f32 %v4274_v30, %v4262_v54 }
 0x244   :  { %4481 = vmatmul.bf16.vlgmr.msrb.gmra.mxu0 %v457_v28  ;;  %4494 = vmatmul.bf16.vlgmr.msrb.gmra.mxu1 %v458_v34  ;;  %v195_v28 = vld.sshfl [vmem:[#allocation1 + $0x10] sm:$0xff pattern:$0x73625140]  ;;  %v4287_v34 = vpop.f32.mrf.mxu1 }
 0x245   :  { %4529 = vmatpush.bf16.xpose.msra.mxu0 %v7153_v18  ;;  %4542 = vmatpush.bf16.xpose.msra.mxu1 %v7157_v19  ;;  %v5625_v18 = vor.u32 %v7476_v7, %v5624_v6  ;;  %v7798_v19 = vld [vmem:[%s11143_s1 + $0xd3c] sm:$0xf]  ;;  %v463_v38 = vpack.c.bf16 %v195_v28, %v195_v28  ;;  %v5632_v6 = vld [vmem:[%s11143_s1 + $0x130] sm:$0xf]  ;;  %v7185_v28 = vor.u32 %v7863_v16, %v7184_v15  ;;  %v5650_v15 = vld [vmem:[%s11143_s1 + $0x340] sm:$0xf0] }
 0x246   :  { %4555 = vmatpush.bf16.xpose.msra.mxu2 %v7161_v20  ;;  %4520 = vmatmul.bf16.vlgmr.msrb.gmra.mxu3 %v460_v39  ;;  %v7178_v20 = vld [vmem:[%s11143_s1 + $0xf38] sm:$0xf0]  ;;  %v462_v39 = vpack.c.bf16 %v194_v29, %v194_v29  ;;  %v7477_v7 = vld [vmem:[%s11143_s1 + $0x32c] sm:$0xf0]  ;;  %v5656_v16 = vld [vmem:[%s11143_s1 + $0x148] sm:$0xf] }
 0x247   :  { %4568 = vmatpush.bf16.xpose.msra.mxu3 %v7165_v21  ;;  %4507 = vmatmul.bf16.vlgmr.msrb.gmra.mxu2 %v459_v33  ;;  %v55_v21 = vld [vmem:[%s11144_s0 + $0x98] sm:$0xff]  ;;  %v7181_v26 = vor.u32 %v7798_v19, %v7178_v20  ;;  %v461_v33 = vpack.c.bf16 %v193_v27, %v193_v27  ;;  %v7186_v19 = vld [vmem:[%s11143_s1 + $0xf40] sm:$0xf0]  ;;  %v7192_v20 = vld [vmem:[%s11143_s1 + $0xd48] sm:$0xf] }
 0x248   :  { %192 = vst [vmem:[#allocation1 + $0x20] ss:$4 sm:$0xff] %v55_v21  ;;  %v7864_v21 = vld [vmem:[%s11143_s1 + $0xf44] sm:$0xf0] }
 0x249   :  { %v4313_v53 = vpop.f32.mrf.mxu3  ;;  %v4276_v54 = vpop.f32.mrf.mxu0  ;;  %v7193_v30 = vor.u32 %v7864_v21, %v7192_v20  ;;  %v7200_v20 = vld [vmem:[%s11143_s1 + $0xd50] sm:$0xf] }
 0x24a   :  { %v4300_v51 = vpop.f32.mrf.mxu2  ;;  %v7865_v21 = vld [vmem:[%s11143_s1 + $0xf4c] sm:$0xf0] }
 0x24c   :  { %v4289_v58 = vpop.f32.mrf.mxu1 }
 0x24d   :  { %4530 = vmatpush.bf16.xpose.msra.mxu0 %v6641_v42  ;;  %4543 = vmatpush.bf16.xpose.msra.mxu1 %v6645_v43  ;;  %v7734_v42 = vld [vmem:[%s11143_s1 + $0xb34] sm:$0xf0]  ;;  %v4288_v43 = vadd.f32 %v4287_v34, %v4275_v32 }
 0x24e   :  { %4556 = vmatpush.bf16.xpose.msra.mxu2 %v6649_v44  ;;  %v464_v44 = vpack.c.bf16 %v196_v31, %v196_v31  ;;  %v6665_v49 = vor.u32 %v7734_v42, %v6664_v41  ;;  %v7735_v41 = vld [vmem:[%s11143_s1 + $0xb3c] sm:$0xf0]  ;;  %v7671_v42 = vld [vmem:[%s11143_s1 + $0x944] sm:$0xf] }
 0x24f   :  { %4569 = vmatpush.bf16.xpose.msra.mxu3 %v6653_v45  ;;  %v7670_v45 = vld [vmem:[%s11143_s1 + $0x93c] sm:$0xf]  ;;  %v4301_v52 = vadd.f32 %v4300_v51, %v4288_v43  ;;  %v197_v32 = vld.sshfl [vmem:[#allocation1 + $0x20] sm:$0xff pattern:$0x73625140] }
 0x250   :  { %v6669_v50 = vor.u32 %v7670_v45, %v6666_v46  ;;  %v198_v34 = vld.sshfl [vmem:[#allocation1 + $0x28] sm:$0xff pattern:$0x73625140]  ;;  %v200_v36 = vld.sshfl [vmem:[#allocation1 + $0x38] sm:$0xff pattern:$0x73625140] }
 0x251   :  { %v4314_v59 = vadd.f32 %v4313_v53, %v4301_v52  ;;  %v4315_v8 = vpop.f32.mrf.mxu3  ;;  %v6674_v45 = vld [vmem:[%s11143_s1 + $0xb40] sm:$0xf0]  ;;  %v6680_v46 = vld [vmem:[%s11143_s1 + $0x948] sm:$0xf]  ;;  %v6682_v51 = vld [vmem:[%s11143_s1 + $0xb48] sm:$0xf0]  ;;  %v6673_v52 = vor.u32 %v7735_v41, %v6672_v40 }
 0x252   :  { %v4302_v5 = vpop.f32.mrf.mxu2  ;;  %v6677_v53 = vor.u32 %v7671_v42, %v6674_v45  ;;  %v6688_v45 = vld [vmem:[%s11143_s1 + $0x950] sm:$0xf] }
 0x253   :  { %v6170_v5 = vld [vmem:[%s11143_s1 + $0x748] sm:$0xf0] }
 0x255   :  { %4531 = vmatpush.bf16.xpose.msra.mxu0 %v6129_v60  ;;  %4544 = vmatpush.bf16.xpose.msra.mxu1 %v6133_v61  ;;  %v6146_v60 = vld [vmem:[%s11143_s1 + $0x730] sm:$0xf0]  ;;  %v6152_v61 = vld [vmem:[%s11143_s1 + $0x538] sm:$0xf] }
 0x256   :  { %4557 = vmatpush.bf16.xpose.msra.mxu2 %v6137_v62  ;;  %v7606_v62 = vld [vmem:[%s11143_s1 + $0x734] sm:$0xf0]  ;;  %v6149_v2 = vor.u32 %v7541_v57, %v6146_v60  ;;  %v6160_v60 = vld [vmem:[%s11143_s1 + $0x540] sm:$0xf] }
 0x257   :  { %4570 = vmatpush.bf16.xpose.msra.mxu3 %v6141_v63  ;;  %v7542_v63 = vld [vmem:[%s11143_s1 + $0x53c] sm:$0xf]  ;;  %v6153_v3 = vor.u32 %v7606_v62, %v6152_v61  ;;  %v7607_v61 = vld [vmem:[%s11143_s1 + $0x73c] sm:$0xf0]  ;;  %v7543_v62 = vld [vmem:[%s11143_s1 + $0x544] sm:$0xf] }
 0x258   :  { %v6157_v4 = vor.u32 %v7542_v63, %v6154_v0 }
 0x25d   :  { %4532 = vmatpush.bf16.xpose.msra.mxu0 %v5617_v13  ;;  %4545 = vmatpush.bf16.xpose.msra.mxu1 %v5621_v17  ;;  %v7414_v13 = vld [vmem:[%s11143_s1 + $0x13c] sm:$0xf]  ;;  %v7799_v17 = vld [vmem:[%s11143_s1 + $0xd44] sm:$0xf] }
 0x25e   :  { %4558 = vmatpush.bf16.xpose.msra.mxu2 %v5625_v18  ;;  %v5633_v18 = vor.u32 %v7477_v7, %v5632_v6  ;;  %v5645_v27 = vor.u32 %v7414_v13, %v5642_v14  ;;  %v7189_v29 = vor.u32 %v7799_v17, %v7186_v19  ;;  %v6161_v6 = vor.u32 %v7607_v61, %v6160_v60  ;;  %v7415_v14 = vld [vmem:[%s11143_s1 + $0x144] sm:$0xf]  ;;  %v7480_v17 = vld [vmem:[%s11143_s1 + $0x344] sm:$0xf0]  ;;  %v5658_v19 = vld [vmem:[%s11143_s1 + $0x348] sm:$0xf0] }
 0x25f   :  { %4571 = vmatpush.bf16.xpose.msra.mxu3 %v5629_v22  ;;  %v5637_v22 = vor.u32 %v7413_v9, %v5634_v10 }
 0x261   :  { %v4326_v35 = vpop.f32.mrf.mxu0 }
 0x262   :  { %v4327_v37 = vadd.f32 %v4326_v35, %v4314_v59 }
 0x264   :  { %4533 = vmatmul.bf16.vlgmr.msra.gmra.mxu0 %v461_v33  ;;  %4546 = vmatmul.bf16.vlgmr.msra.gmra.mxu1 %v462_v39  ;;  %v199_v33 = vld.sshfl [vmem:[#allocation1 + $0x30] sm:$0xff pattern:$0x73625140]  ;;  %v4339_v39 = vpop.f32.mrf.mxu1 }
 0x265   :  { %4581 = vmatpush.bf16.xpose.msrb.mxu0 %v7169_v23  ;;  %4594 = vmatpush.bf16.xpose.msrb.mxu1 %v7173_v24  ;;  %v5641_v23 = vor.u32 %v7478_v12, %v5640_v11  ;;  %v7800_v24 = vld [vmem:[%s11143_s1 + $0xd4c] sm:$0xf]  ;;  %v467_v43 = vpack.c.bf16 %v199_v33, %v199_v33  ;;  %v5648_v11 = vld [vmem:[%s11143_s1 + $0x140] sm:$0xf]  ;;  %v7201_v33 = vor.u32 %v7865_v21, %v7200_v20  ;;  %v5666_v20 = vld [vmem:[%s11143_s1 + $0x350] sm:$0xf0] }
 0x266   :  { %4607 = vmatpush.bf16.xpose.msrb.mxu2 %v7177_v25  ;;  %4572 = vmatmul.bf16.vlgmr.msra.gmra.mxu3 %v464_v44  ;;  %v7194_v25 = vld [vmem:[%s11143_s1 + $0xf48] sm:$0xf0]  ;;  %v466_v44 = vpack.c.bf16 %v198_v34, %v198_v34  ;;  %v7479_v12 = vld [vmem:[%s11143_s1 + $0x33c] sm:$0xf0]  ;;  %v5672_v21 = vld [vmem:[%s11143_s1 + $0x158] sm:$0xf] }
 0x267   :  { %4620 = vmatpush.bf16.xpose.msrb.mxu3 %v7181_v26  ;;  %4559 = vmatmul.bf16.vlgmr.msra.gmra.mxu2 %v463_v38  ;;  %v56_v26 = vld [vmem:[%s11144_s0 + $0xa0] sm:$0xff]  ;;  %v7197_v31 = vor.u32 %v7800_v24, %v7194_v25  ;;  %v465_v38 = vpack.c.bf16 %v197_v32, %v197_v32  ;;  %v7202_v24 = vld [vmem:[%s11143_s1 + $0xf50] sm:$0xf0]  ;;  %v7208_v25 = vld [vmem:[%s11143_s1 + $0xd58] sm:$0xf] }
 0x268   :  { %201 = vst [vmem:[#allocation1] ss:$4 sm:$0xff] %v56_v26  ;;  %v7866_v26 = vld [vmem:[%s11143_s1 + $0xf54] sm:$0xf0] }
 0x269   :  { %v4365_v58 = vpop.f32.mrf.mxu3  ;;  %v4328_v59 = vpop.f32.mrf.mxu0  ;;  %v7209_v35 = vor.u32 %v7866_v26, %v7208_v25  ;;  %v7216_v25 = vld [vmem:[%s11143_s1 + $0xd60] sm:$0xf] }
 0x26a   :  { %v4352_v56 = vpop.f32.mrf.mxu2  ;;  %v7867_v26 = vld [vmem:[%s11143_s1 + $0xf5c] sm:$0xf0] }
 0x26c   :  { %v4341_v63 = vpop.f32.mrf.mxu1 }
 0x26d   :  { %4582 = vmatpush.bf16.xpose.msrb.mxu0 %v6657_v47  ;;  %4595 = vmatpush.bf16.xpose.msrb.mxu1 %v6661_v48  ;;  %v7736_v47 = vld [vmem:[%s11143_s1 + $0xb44] sm:$0xf0]  ;;  %v4340_v48 = vadd.f32 %v4339_v39, %v4327_v37 }
 0x26e   :  { %4608 = vmatpush.bf16.xpose.msrb.mxu2 %v6665_v49  ;;  %v468_v49 = vpack.c.bf16 %v200_v36, %v200_v36  ;;  %v6681_v54 = vor.u32 %v7736_v47, %v6680_v46  ;;  %v7737_v46 = vld [vmem:[%s11143_s1 + $0xb4c] sm:$0xf0]  ;;  %v7673_v47 = vld [vmem:[%s11143_s1 + $0x954] sm:$0xf] }
 0x26f   :  { %4621 = vmatpush.bf16.xpose.msrb.mxu3 %v6669_v50  ;;  %v7672_v50 = vld [vmem:[%s11143_s1 + $0x94c] sm:$0xf]  ;;  %v4353_v57 = vadd.f32 %v4352_v56, %v4340_v48  ;;  %v203_v37 = vld.sshfl [vmem:[#allocation1] sm:$0xff pattern:$0x73625140] }
 0x270   :  { %v6685_v55 = vor.u32 %v7672_v50, %v6682_v51  ;;  %v204_v39 = vld.sshfl [vmem:[#allocation1 + $0x8] sm:$0xff pattern:$0x73625140]  ;;  %v206_v41 = vld.sshfl [vmem:[#allocation1 + $0x18] sm:$0xff pattern:$0x73625140] }
 0x271   :  { %v4366_v0 = vadd.f32 %v4365_v58, %v4353_v57  ;;  %v4367_v13 = vpop.f32.mrf.mxu3  ;;  %v6690_v50 = vld [vmem:[%s11143_s1 + $0xb50] sm:$0xf0]  ;;  %v6696_v51 = vld [vmem:[%s11143_s1 + $0x958] sm:$0xf]  ;;  %v6698_v56 = vld [vmem:[%s11143_s1 + $0xb58] sm:$0xf0]  ;;  %v6689_v57 = vor.u32 %v7737_v46, %v6688_v45 }
 0x272   :  { %v4354_v10 = vpop.f32.mrf.mxu2  ;;  %v6693_v58 = vor.u32 %v7673_v47, %v6690_v50  ;;  %v6704_v50 = vld [vmem:[%s11143_s1 + $0x960] sm:$0xf] }
 0x273   :  { %v6186_v10 = vld [vmem:[%s11143_s1 + $0x758] sm:$0xf0] }
 0x275   :  { %4583 = vmatpush.bf16.xpose.msrb.mxu0 %v6145_v1  ;;  %4596 = vmatpush.bf16.xpose.msrb.mxu1 %v6149_v2  ;;  %v6162_v1 = vld [vmem:[%s11143_s1 + $0x740] sm:$0xf0]  ;;  %v6168_v2 = vld [vmem:[%s11143_s1 + $0x548] sm:$0xf] }
 0x276   :  { %4609 = vmatpush.bf16.xpose.msrb.mxu2 %v6153_v3  ;;  %v7608_v3 = vld [vmem:[%s11143_s1 + $0x744] sm:$0xf0]  ;;  %v6165_v7 = vor.u32 %v7543_v62, %v6162_v1  ;;  %v6176_v1 = vld [vmem:[%s11143_s1 + $0x550] sm:$0xf] }
 0x277   :  { %4622 = vmatpush.bf16.xpose.msrb.mxu3 %v6157_v4  ;;  %v7544_v4 = vld [vmem:[%s11143_s1 + $0x54c] sm:$0xf]  ;;  %v6169_v8 = vor.u32 %v7608_v3, %v6168_v2  ;;  %v7609_v2 = vld [vmem:[%s11143_s1 + $0x74c] sm:$0xf0]  ;;  %v7545_v3 = vld [vmem:[%s11143_s1 + $0x554] sm:$0xf] }
 0x278   :  { %v6173_v9 = vor.u32 %v7544_v4, %v6170_v5 }
 0x27d   :  { %4584 = vmatpush.bf16.xpose.msrb.mxu0 %v5633_v18  ;;  %4597 = vmatpush.bf16.xpose.msrb.mxu1 %v5637_v22  ;;  %v7416_v18 = vld [vmem:[%s11143_s1 + $0x14c] sm:$0xf]  ;;  %v7801_v22 = vld [vmem:[%s11143_s1 + $0xd54] sm:$0xf] }
 0x27e   :  { %4610 = vmatpush.bf16.xpose.msrb.mxu2 %v5641_v23  ;;  %v5649_v23 = vor.u32 %v7479_v12, %v5648_v11  ;;  %v5661_v32 = vor.u32 %v7416_v18, %v5658_v19  ;;  %v7205_v34 = vor.u32 %v7801_v22, %v7202_v24  ;;  %v6177_v11 = vor.u32 %v7609_v2, %v6176_v1  ;;  %v7417_v19 = vld [vmem:[%s11143_s1 + $0x154] sm:$0xf]  ;;  %v7482_v22 = vld [vmem:[%s11143_s1 + $0x354] sm:$0xf0]  ;;  %v5674_v24 = vld [vmem:[%s11143_s1 + $0x358] sm:$0xf0] }
 0x27f   :  { %4623 = vmatpush.bf16.xpose.msrb.mxu3 %v5645_v27  ;;  %v5653_v27 = vor.u32 %v7415_v14, %v5650_v15 }
 0x281   :  { %v4378_v40 = vpop.f32.mrf.mxu0 }
 0x282   :  { %v4379_v42 = vadd.f32 %v4378_v40, %v4366_v0 }
 0x284   :  { %4585 = vmatmul.bf16.vlgmr.msrb.gmra.mxu0 %v465_v38  ;;  %4598 = vmatmul.bf16.vlgmr.msrb.gmra.mxu1 %v466_v44  ;;  %v205_v38 = vld.sshfl [vmem:[#allocation1 + $0x10] sm:$0xff pattern:$0x73625140]  ;;  %v4391_v44 = vpop.f32.mrf.mxu1 }
 0x285   :  { %4633 = vmatpush.bf16.xpose.msra.mxu0 %v7185_v28  ;;  %4646 = vmatpush.bf16.xpose.msra.mxu1 %v7189_v29  ;;  %v5657_v28 = vor.u32 %v7480_v17, %v5656_v16  ;;  %v7802_v29 = vld [vmem:[%s11143_s1 + $0xd5c] sm:$0xf]  ;;  %v471_v48 = vpack.c.bf16 %v205_v38, %v205_v38  ;;  %v5664_v16 = vld [vmem:[%s11143_s1 + $0x150] sm:$0xf]  ;;  %v7217_v38 = vor.u32 %v7867_v26, %v7216_v25  ;;  %v5682_v25 = vld [vmem:[%s11143_s1 + $0x360] sm:$0xf0] }
 0x286   :  { %4659 = vmatpush.bf16.xpose.msra.mxu2 %v7193_v30  ;;  %4624 = vmatmul.bf16.vlgmr.msrb.gmra.mxu3 %v468_v49  ;;  %v7210_v30 = vld [vmem:[%s11143_s1 + $0xf58] sm:$0xf0]  ;;  %v470_v49 = vpack.c.bf16 %v204_v39, %v204_v39  ;;  %v7481_v17 = vld [vmem:[%s11143_s1 + $0x34c] sm:$0xf0]  ;;  %v5688_v26 = vld [vmem:[%s11143_s1 + $0x168] sm:$0xf] }
 0x287   :  { %4672 = vmatpush.bf16.xpose.msra.mxu3 %v7197_v31  ;;  %4611 = vmatmul.bf16.vlgmr.msrb.gmra.mxu2 %v467_v43  ;;  %v57_v31 = vld [vmem:[%s11144_s0 + $0xa8] sm:$0xff]  ;;  %v7213_v36 = vor.u32 %v7802_v29, %v7210_v30  ;;  %v469_v43 = vpack.c.bf16 %v203_v37, %v203_v37  ;;  %v7218_v29 = vld [vmem:[%s11143_s1 + $0xf60] sm:$0xf0] }
 0x288   :  { %202 = vst [vmem:[#allocation1 + $0x20] ss:$4 sm:$0xff] %v57_v31  ;;  %v7224_v30 = vld [vmem:[%s11143_s1 + $0xd68] sm:$0xf] }
 0x289   :  { %v4417_v63 = vpop.f32.mrf.mxu3  ;;  %v4380_v0 = vpop.f32.mrf.mxu0  ;;  %v7868_v31 = vld [vmem:[%s11143_s1 + $0xf64] sm:$0xf0] }
 0x28a   :  { %v4404_v61 = vpop.f32.mrf.mxu2  ;;  %v7225_v40 = vor.u32 %v7868_v31, %v7224_v30  ;;  %v7232_v30 = vld [vmem:[%s11143_s1 + $0xd70] sm:$0xf] }
 0x28b   :  { %v7869_v31 = vld [vmem:[%s11143_s1 + $0xf6c] sm:$0xf0] }
 0x28c   :  { %v4393_v4 = vpop.f32.mrf.mxu1 }
 0x28d   :  { %4634 = vmatpush.bf16.xpose.msra.mxu0 %v6673_v52  ;;  %4647 = vmatpush.bf16.xpose.msra.mxu1 %v6677_v53  ;;  %v7738_v52 = vld [vmem:[%s11143_s1 + $0xb54] sm:$0xf0]  ;;  %v4392_v53 = vadd.f32 %v4391_v44, %v4379_v42 }
 0x28e   :  { %4660 = vmatpush.bf16.xpose.msra.mxu2 %v6681_v54  ;;  %v472_v54 = vpack.c.bf16 %v206_v41, %v206_v41  ;;  %v6697_v59 = vor.u32 %v7738_v52, %v6696_v51  ;;  %v7739_v51 = vld [vmem:[%s11143_s1 + $0xb5c] sm:$0xf0]  ;;  %v7675_v52 = vld [vmem:[%s11143_s1 + $0x964] sm:$0xf] }
 0x28f   :  { %4673 = vmatpush.bf16.xpose.msra.mxu3 %v6685_v55  ;;  %v7674_v55 = vld [vmem:[%s11143_s1 + $0x95c] sm:$0xf]  ;;  %v4405_v62 = vadd.f32 %v4404_v61, %v4392_v53  ;;  %v207_v42 = vld.sshfl [vmem:[#allocation1 + $0x20] sm:$0xff pattern:$0x73625140] }
 0x290   :  { %v6701_v60 = vor.u32 %v7674_v55, %v6698_v56  ;;  %v208_v44 = vld.sshfl [vmem:[#allocation1 + $0x28] sm:$0xff pattern:$0x73625140]  ;;  %v210_v46 = vld.sshfl [vmem:[#allocation1 + $0x38] sm:$0xff pattern:$0x73625140] }
 0x291   :  { %v4418_v5 = vadd.f32 %v4417_v63, %v4405_v62  ;;  %v4419_v18 = vpop.f32.mrf.mxu3  ;;  %v6706_v55 = vld [vmem:[%s11143_s1 + $0xb60] sm:$0xf0]  ;;  %v6712_v56 = vld [vmem:[%s11143_s1 + $0x968] sm:$0xf]  ;;  %v6714_v61 = vld [vmem:[%s11143_s1 + $0xb68] sm:$0xf0]  ;;  %v6705_v62 = vor.u32 %v7739_v51, %v6704_v50 }
 0x292   :  { %v4406_v15 = vpop.f32.mrf.mxu2  ;;  %v6709_v63 = vor.u32 %v7675_v52, %v6706_v55  ;;  %v6720_v55 = vld [vmem:[%s11143_s1 + $0x970] sm:$0xf] }
 0x293   :  { %v6202_v15 = vld [vmem:[%s11143_s1 + $0x768] sm:$0xf0] }
 0x295   :  { %4635 = vmatpush.bf16.xpose.msra.mxu0 %v6161_v6  ;;  %4648 = vmatpush.bf16.xpose.msra.mxu1 %v6165_v7  ;;  %v6178_v6 = vld [vmem:[%s11143_s1 + $0x750] sm:$0xf0]  ;;  %v6184_v7 = vld [vmem:[%s11143_s1 + $0x558] sm:$0xf] }
 0x296   :  { %4661 = vmatpush.bf16.xpose.msra.mxu2 %v6169_v8  ;;  %v7610_v8 = vld [vmem:[%s11143_s1 + $0x754] sm:$0xf0]  ;;  %v6181_v12 = vor.u32 %v7545_v3, %v6178_v6  ;;  %v6192_v6 = vld [vmem:[%s11143_s1 + $0x560] sm:$0xf] }
 0x297   :  { %4674 = vmatpush.bf16.xpose.msra.mxu3 %v6173_v9  ;;  %v7546_v9 = vld [vmem:[%s11143_s1 + $0x55c] sm:$0xf]  ;;  %v6185_v13 = vor.u32 %v7610_v8, %v6184_v7  ;;  %v7611_v7 = vld [vmem:[%s11143_s1 + $0x75c] sm:$0xf0]  ;;  %v7547_v8 = vld [vmem:[%s11143_s1 + $0x564] sm:$0xf] }
 0x298   :  { %v6189_v14 = vor.u32 %v7546_v9, %v6186_v10 }
 0x29d   :  { %4636 = vmatpush.bf16.xpose.msra.mxu0 %v5649_v23  ;;  %4649 = vmatpush.bf16.xpose.msra.mxu1 %v5653_v27  ;;  %v7418_v23 = vld [vmem:[%s11143_s1 + $0x15c] sm:$0xf]  ;;  %v7803_v27 = vld [vmem:[%s11143_s1 + $0xd64] sm:$0xf] }
 0x29e   :  { %4662 = vmatpush.bf16.xpose.msra.mxu2 %v5657_v28  ;;  %v5665_v28 = vor.u32 %v7481_v17, %v5664_v16  ;;  %v5677_v37 = vor.u32 %v7418_v23, %v5674_v24  ;;  %v7221_v39 = vor.u32 %v7803_v27, %v7218_v29  ;;  %v6193_v16 = vor.u32 %v7611_v7, %v6192_v6  ;;  %v7419_v24 = vld [vmem:[%s11143_s1 + $0x164] sm:$0xf]  ;;  %v7484_v27 = vld [vmem:[%s11143_s1 + $0x364] sm:$0xf0]  ;;  %v5690_v29 = vld [vmem:[%s11143_s1 + $0x368] sm:$0xf0] }
 0x29f   :  { %4675 = vmatpush.bf16.xpose.msra.mxu3 %v5661_v32  ;;  %v5669_v32 = vor.u32 %v7417_v19, %v5666_v20 }
 0x2a1   :  { %v4430_v45 = vpop.f32.mrf.mxu0 }
 0x2a2   :  { %v4431_v47 = vadd.f32 %v4430_v45, %v4418_v5 }
 0x2a4   :  { %4637 = vmatmul.bf16.vlgmr.msra.gmra.mxu0 %v469_v43  ;;  %4650 = vmatmul.bf16.vlgmr.msra.gmra.mxu1 %v470_v49  ;;  %v209_v43 = vld.sshfl [vmem:[#allocation1 + $0x30] sm:$0xff pattern:$0x73625140]  ;;  %v4443_v49 = vpop.f32.mrf.mxu1 }
 0x2a5   :  { %4685 = vmatpush.bf16.xpose.msrb.mxu0 %v7201_v33  ;;  %4698 = vmatpush.bf16.xpose.msrb.mxu1 %v7205_v34  ;;  %v5673_v33 = vor.u32 %v7482_v22, %v5672_v21  ;;  %v7804_v34 = vld [vmem:[%s11143_s1 + $0xd6c] sm:$0xf]  ;;  %v475_v53 = vpack.c.bf16 %v209_v43, %v209_v43  ;;  %v5680_v21 = vld [vmem:[%s11143_s1 + $0x160] sm:$0xf]  ;;  %v7233_v43 = vor.u32 %v7869_v31, %v7232_v30  ;;  %v5698_v30 = vld [vmem:[%s11143_s1 + $0x370] sm:$0xf0] }
 0x2a6   :  { %4711 = vmatpush.bf16.xpose.msrb.mxu2 %v7209_v35  ;;  %4676 = vmatmul.bf16.vlgmr.msra.gmra.mxu3 %v472_v54  ;;  %v7226_v35 = vld [vmem:[%s11143_s1 + $0xf68] sm:$0xf0]  ;;  %v474_v54 = vpack.c.bf16 %v208_v44, %v208_v44  ;;  %v7483_v22 = vld [vmem:[%s11143_s1 + $0x35c] sm:$0xf0]  ;;  %v5704_v31 = vld [vmem:[%s11143_s1 + $0x178] sm:$0xf] }
 0x2a7   :  { %4724 = vmatpush.bf16.xpose.msrb.mxu3 %v7213_v36  ;;  %4663 = vmatmul.bf16.vlgmr.msra.gmra.mxu2 %v471_v48  ;;  %v58_v36 = vld [vmem:[%s11144_s0 + $0xb0] sm:$0xff]  ;;  %v7229_v41 = vor.u32 %v7804_v34, %v7226_v35  ;;  %v473_v48 = vpack.c.bf16 %v207_v42, %v207_v42  ;;  %v7240_v35 = vld [vmem:[%s11143_s1 + $0xd78] sm:$0xf] }
 0x2a8   :  { %211 = vst [vmem:[#allocation1] ss:$4 sm:$0xff] %v58_v36  ;;  %v7234_v34 = vld [vmem:[%s11143_s1 + $0xf70] sm:$0xf0]  ;;  %v7870_v36 = vld [vmem:[%s11143_s1 + $0xf74] sm:$0xf0] }
 0x2a9   :  { %v4469_v4 = vpop.f32.mrf.mxu3  ;;  %v4432_v5 = vpop.f32.mrf.mxu0  ;;  %v7241_v45 = vor.u32 %v7870_v36, %v7240_v35  ;;  %v7248_v35 = vld [vmem:[%s11143_s1 + $0xd80] sm:$0xf] }
 0x2aa   :  { %v4456_v2 = vpop.f32.mrf.mxu2  ;;  %v7871_v36 = vld [vmem:[%s11143_s1 + $0xf7c] sm:$0xf0] }
 0x2ac   :  { %v4445_v9 = vpop.f32.mrf.mxu1 }
 0x2ad   :  { %4686 = vmatpush.bf16.xpose.msrb.mxu0 %v6689_v57  ;;  %4699 = vmatpush.bf16.xpose.msrb.mxu1 %v6693_v58  ;;  %v7740_v57 = vld [vmem:[%s11143_s1 + $0xb64] sm:$0xf0]  ;;  %v4444_v58 = vadd.f32 %v4443_v49, %v4431_v47 }
 0x2ae   :  { %4712 = vmatpush.bf16.xpose.msrb.mxu2 %v6697_v59  ;;  %v476_v59 = vpack.c.bf16 %v210_v46, %v210_v46  ;;  %v6713_v0 = vor.u32 %v7740_v57, %v6712_v56  ;;  %v7741_v56 = vld [vmem:[%s11143_s1 + $0xb6c] sm:$0xf0]  ;;  %v7677_v57 = vld [vmem:[%s11143_s1 + $0x974] sm:$0xf] }
 0x2af   :  { %4725 = vmatpush.bf16.xpose.msrb.mxu3 %v6701_v60  ;;  %v7676_v60 = vld [vmem:[%s11143_s1 + $0x96c] sm:$0xf]  ;;  %v4457_v3 = vadd.f32 %v4456_v2, %v4444_v58  ;;  %v213_v47 = vld.sshfl [vmem:[#allocation1] sm:$0xff pattern:$0x73625140] }
 0x2b0   :  { %v6717_v1 = vor.u32 %v7676_v60, %v6714_v61  ;;  %v214_v49 = vld.sshfl [vmem:[#allocation1 + $0x8] sm:$0xff pattern:$0x73625140]  ;;  %v216_v51 = vld.sshfl [vmem:[#allocation1 + $0x18] sm:$0xff pattern:$0x73625140] }
 0x2b1   :  { %v4470_v10 = vadd.f32 %v4469_v4, %v4457_v3  ;;  %v4471_v23 = vpop.f32.mrf.mxu3  ;;  %v6722_v60 = vld [vmem:[%s11143_s1 + $0xb70] sm:$0xf0]  ;;  %v6728_v61 = vld [vmem:[%s11143_s1 + $0x978] sm:$0xf]  ;;  %v6730_v2 = vld [vmem:[%s11143_s1 + $0xb78] sm:$0xf0]  ;;  %v6721_v3 = vor.u32 %v7741_v56, %v6720_v55 }
 0x2b2   :  { %v4458_v20 = vpop.f32.mrf.mxu2  ;;  %v6725_v4 = vor.u32 %v7677_v57, %v6722_v60  ;;  %v6736_v60 = vld [vmem:[%s11143_s1 + $0x980] sm:$0xf] }
 0x2b3   :  { %v6218_v20 = vld [vmem:[%s11143_s1 + $0x778] sm:$0xf0] }
 0x2b5   :  { %4687 = vmatpush.bf16.xpose.msrb.mxu0 %v6177_v11  ;;  %4700 = vmatpush.bf16.xpose.msrb.mxu1 %v6181_v12  ;;  %v6194_v11 = vld [vmem:[%s11143_s1 + $0x760] sm:$0xf0]  ;;  %v6200_v12 = vld [vmem:[%s11143_s1 + $0x568] sm:$0xf] }
 0x2b6   :  { %4713 = vmatpush.bf16.xpose.msrb.mxu2 %v6185_v13  ;;  %v7612_v13 = vld [vmem:[%s11143_s1 + $0x764] sm:$0xf0]  ;;  %v6197_v17 = vor.u32 %v7547_v8, %v6194_v11  ;;  %v6208_v11 = vld [vmem:[%s11143_s1 + $0x570] sm:$0xf] }
 0x2b7   :  { %4726 = vmatpush.bf16.xpose.msrb.mxu3 %v6189_v14  ;;  %v7548_v14 = vld [vmem:[%s11143_s1 + $0x56c] sm:$0xf]  ;;  %v6201_v18 = vor.u32 %v7612_v13, %v6200_v12  ;;  %v7613_v12 = vld [vmem:[%s11143_s1 + $0x76c] sm:$0xf0]  ;;  %v7549_v13 = vld [vmem:[%s11143_s1 + $0x574] sm:$0xf] }
 0x2b8   :  { %v6205_v19 = vor.u32 %v7548_v14, %v6202_v15 }
 0x2bd   :  { %4688 = vmatpush.bf16.xpose.msrb.mxu0 %v5665_v28  ;;  %4701 = vmatpush.bf16.xpose.msrb.mxu1 %v5669_v32  ;;  %v7420_v28 = vld [vmem:[%s11143_s1 + $0x16c] sm:$0xf]  ;;  %v7805_v32 = vld [vmem:[%s11143_s1 + $0xd74] sm:$0xf] }
 0x2be   :  { %4714 = vmatpush.bf16.xpose.msrb.mxu2 %v5673_v33  ;;  %v5681_v33 = vor.u32 %v7483_v22, %v5680_v21  ;;  %v5693_v42 = vor.u32 %v7420_v28, %v5690_v29  ;;  %v7237_v44 = vor.u32 %v7805_v32, %v7234_v34  ;;  %v6209_v21 = vor.u32 %v7613_v12, %v6208_v11  ;;  %v7421_v29 = vld [vmem:[%s11143_s1 + $0x174] sm:$0xf]  ;;  %v7486_v32 = vld [vmem:[%s11143_s1 + $0x374] sm:$0xf0]  ;;  %v5706_v34 = vld [vmem:[%s11143_s1 + $0x378] sm:$0xf0] }
 0x2bf   :  { %4727 = vmatpush.bf16.xpose.msrb.mxu3 %v5677_v37  ;;  %v5685_v37 = vor.u32 %v7419_v24, %v5682_v25 }
 0x2c1   :  { %v4482_v50 = vpop.f32.mrf.mxu0 }
 0x2c2   :  { %v4483_v52 = vadd.f32 %v4482_v50, %v4470_v10 }
 0x2c4   :  { %4689 = vmatmul.bf16.vlgmr.msrb.gmra.mxu0 %v473_v48  ;;  %4702 = vmatmul.bf16.vlgmr.msrb.gmra.mxu1 %v474_v54  ;;  %v215_v48 = vld.sshfl [vmem:[#allocation1 + $0x10] sm:$0xff pattern:$0x73625140]  ;;  %v4495_v54 = vpop.f32.mrf.mxu1 }
 0x2c5   :  { %4737 = vmatpush.bf16.xpose.msra.mxu0 %v7217_v38  ;;  %4750 = vmatpush.bf16.xpose.msra.mxu1 %v7221_v39  ;;  %v5689_v38 = vor.u32 %v7484_v27, %v5688_v26  ;;  %v7806_v39 = vld [vmem:[%s11143_s1 + $0xd7c] sm:$0xf]  ;;  %v479_v58 = vpack.c.bf16 %v215_v48, %v215_v48  ;;  %v5696_v26 = vld [vmem:[%s11143_s1 + $0x170] sm:$0xf]  ;;  %v7249_v48 = vor.u32 %v7871_v36, %v7248_v35  ;;  %v5714_v35 = vld [vmem:[%s11143_s1 + $0x380] sm:$0xf0] }
 0x2c6   :  { %4763 = vmatpush.bf16.xpose.msra.mxu2 %v7225_v40  ;;  %4728 = vmatmul.bf16.vlgmr.msrb.gmra.mxu3 %v476_v59  ;;  %v7242_v40 = vld [vmem:[%s11143_s1 + $0xf78] sm:$0xf0]  ;;  %v478_v59 = vpack.c.bf16 %v214_v49, %v214_v49  ;;  %v7485_v27 = vld [vmem:[%s11143_s1 + $0x36c] sm:$0xf0]  ;;  %v5720_v36 = vld [vmem:[%s11143_s1 + $0x188] sm:$0xf] }
 0x2c7   :  { %4776 = vmatpush.bf16.xpose.msra.mxu3 %v7229_v41  ;;  %4715 = vmatmul.bf16.vlgmr.msrb.gmra.mxu2 %v475_v53  ;;  %v59_v41 = vld [vmem:[%s11144_s0 + $0xb8] sm:$0xff]  ;;  %v7245_v46 = vor.u32 %v7806_v39, %v7242_v40  ;;  %v477_v53 = vpack.c.bf16 %v213_v47, %v213_v47  ;;  %v7250_v39 = vld [vmem:[%s11143_s1 + $0xf80] sm:$0xf0]  ;;  %v7256_v40 = vld [vmem:[%s11143_s1 + $0xd88] sm:$0xf] }
 0x2c8   :  { %212 = vst [vmem:[#allocation1 + $0x20] ss:$4 sm:$0xff] %v59_v41  ;;  %v7872_v41 = vld [vmem:[%s11143_s1 + $0xf84] sm:$0xf0] }
 0x2c9   :  { %v4521_v9 = vpop.f32.mrf.mxu3  ;;  %v4484_v10 = vpop.f32.mrf.mxu0  ;;  %v7257_v50 = vor.u32 %v7872_v41, %v7256_v40  ;;  %v7264_v40 = vld [vmem:[%s11143_s1 + $0xd90] sm:$0xf] }
 0x2ca   :  { %v4508_v7 = vpop.f32.mrf.mxu2  ;;  %v7873_v41 = vld [vmem:[%s11143_s1 + $0xf8c] sm:$0xf0] }
 0x2cc   :  { %v4497_v14 = vpop.f32.mrf.mxu1 }
 0x2cd   :  { %4738 = vmatpush.bf16.xpose.msra.mxu0 %v6705_v62  ;;  %4751 = vmatpush.bf16.xpose.msra.mxu1 %v6709_v63  ;;  %v7742_v62 = vld [vmem:[%s11143_s1 + $0xb74] sm:$0xf0]  ;;  %v4496_v63 = vadd.f32 %v4495_v54, %v4483_v52 }
 0x2ce   :  { %4764 = vmatpush.bf16.xpose.msra.mxu2 %v6713_v0  ;;  %v480_v0 = vpack.c.bf16 %v216_v51, %v216_v51  ;;  %v6729_v5 = vor.u32 %v7742_v62, %v6728_v61  ;;  %v7743_v61 = vld [vmem:[%s11143_s1 + $0xb7c] sm:$0xf0]  ;;  %v7679_v62 = vld [vmem:[%s11143_s1 + $0x984] sm:$0xf] }
 0x2cf   :  { %4777 = vmatpush.bf16.xpose.msra.mxu3 %v6717_v1  ;;  %v7678_v1 = vld [vmem:[%s11143_s1 + $0x97c] sm:$0xf]  ;;  %v4509_v8 = vadd.f32 %v4508_v7, %v4496_v63  ;;  %v217_v52 = vld.sshfl [vmem:[#allocation1 + $0x20] sm:$0xff pattern:$0x73625140] }
 0x2d0   :  { %v6733_v6 = vor.u32 %v7678_v1, %v6730_v2  ;;  %v218_v54 = vld.sshfl [vmem:[#allocation1 + $0x28] sm:$0xff pattern:$0x73625140]  ;;  %v220_v56 = vld.sshfl [vmem:[#allocation1 + $0x38] sm:$0xff pattern:$0x73625140] }
 0x2d1   :  { %v4522_v15 = vadd.f32 %v4521_v9, %v4509_v8  ;;  %v4523_v28 = vpop.f32.mrf.mxu3  ;;  %v6738_v1 = vld [vmem:[%s11143_s1 + $0xb80] sm:$0xf0]  ;;  %v6744_v2 = vld [vmem:[%s11143_s1 + $0x988] sm:$0xf]  ;;  %v6746_v7 = vld [vmem:[%s11143_s1 + $0xb88] sm:$0xf0]  ;;  %v6737_v8 = vor.u32 %v7743_v61, %v6736_v60 }
 0x2d2   :  { %v4510_v25 = vpop.f32.mrf.mxu2  ;;  %v6741_v9 = vor.u32 %v7679_v62, %v6738_v1  ;;  %v6752_v1 = vld [vmem:[%s11143_s1 + $0x990] sm:$0xf] }
 0x2d3   :  { %v6234_v25 = vld [vmem:[%s11143_s1 + $0x788] sm:$0xf0] }
 0x2d5   :  { %4739 = vmatpush.bf16.xpose.msra.mxu0 %v6193_v16  ;;  %4752 = vmatpush.bf16.xpose.msra.mxu1 %v6197_v17  ;;  %v6210_v16 = vld [vmem:[%s11143_s1 + $0x770] sm:$0xf0]  ;;  %v6216_v17 = vld [vmem:[%s11143_s1 + $0x578] sm:$0xf] }
 0x2d6   :  { %4765 = vmatpush.bf16.xpose.msra.mxu2 %v6201_v18  ;;  %v7614_v18 = vld [vmem:[%s11143_s1 + $0x774] sm:$0xf0]  ;;  %v6213_v22 = vor.u32 %v7549_v13, %v6210_v16  ;;  %v6224_v16 = vld [vmem:[%s11143_s1 + $0x580] sm:$0xf] }
 0x2d7   :  { %4778 = vmatpush.bf16.xpose.msra.mxu3 %v6205_v19  ;;  %v7550_v19 = vld [vmem:[%s11143_s1 + $0x57c] sm:$0xf]  ;;  %v6217_v23 = vor.u32 %v7614_v18, %v6216_v17  ;;  %v7615_v17 = vld [vmem:[%s11143_s1 + $0x77c] sm:$0xf0]  ;;  %v7551_v18 = vld [vmem:[%s11143_s1 + $0x584] sm:$0xf] }
 0x2d8   :  { %v6221_v24 = vor.u32 %v7550_v19, %v6218_v20 }
 0x2dd   :  { %4740 = vmatpush.bf16.xpose.msra.mxu0 %v5681_v33  ;;  %4753 = vmatpush.bf16.xpose.msra.mxu1 %v5685_v37  ;;  %v7422_v33 = vld [vmem:[%s11143_s1 + $0x17c] sm:$0xf]  ;;  %v7807_v37 = vld [vmem:[%s11143_s1 + $0xd84] sm:$0xf] }
 0x2de   :  { %4766 = vmatpush.bf16.xpose.msra.mxu2 %v5689_v38  ;;  %v5697_v38 = vor.u32 %v7485_v27, %v5696_v26  ;;  %v5709_v47 = vor.u32 %v7422_v33, %v5706_v34  ;;  %v7253_v49 = vor.u32 %v7807_v37, %v7250_v39  ;;  %v6225_v26 = vor.u32 %v7615_v17, %v6224_v16  ;;  %v7423_v34 = vld [vmem:[%s11143_s1 + $0x184] sm:$0xf]  ;;  %v7488_v37 = vld [vmem:[%s11143_s1 + $0x384] sm:$0xf0]  ;;  %v5722_v39 = vld [vmem:[%s11143_s1 + $0x388] sm:$0xf0] }
 0x2df   :  { %4779 = vmatpush.bf16.xpose.msra.mxu3 %v5693_v42  ;;  %v5701_v42 = vor.u32 %v7421_v29, %v5698_v30 }
 0x2e1   :  { %v4534_v55 = vpop.f32.mrf.mxu0 }
 0x2e2   :  { %v4535_v57 = vadd.f32 %v4534_v55, %v4522_v15 }
 0x2e4   :  { %4741 = vmatmul.bf16.vlgmr.msra.gmra.mxu0 %v477_v53  ;;  %4754 = vmatmul.bf16.vlgmr.msra.gmra.mxu1 %v478_v59  ;;  %v219_v53 = vld.sshfl [vmem:[#allocation1 + $0x30] sm:$0xff pattern:$0x73625140]  ;;  %v4547_v59 = vpop.f32.mrf.mxu1 }
 0x2e5   :  { %4789 = vmatpush.bf16.xpose.msrb.mxu0 %v7233_v43  ;;  %4802 = vmatpush.bf16.xpose.msrb.mxu1 %v7237_v44  ;;  %v5705_v43 = vor.u32 %v7486_v32, %v5704_v31  ;;  %v7808_v44 = vld [vmem:[%s11143_s1 + $0xd8c] sm:$0xf]  ;;  %v483_v63 = vpack.c.bf16 %v219_v53, %v219_v53  ;;  %v5712_v31 = vld [vmem:[%s11143_s1 + $0x180] sm:$0xf]  ;;  %v7265_v53 = vor.u32 %v7873_v41, %v7264_v40  ;;  %v5730_v40 = vld [vmem:[%s11143_s1 + $0x390] sm:$0xf0] }
 0x2e6   :  { %4815 = vmatpush.bf16.xpose.msrb.mxu2 %v7241_v45  ;;  %4780 = vmatmul.bf16.vlgmr.msra.gmra.mxu3 %v480_v0  ;;  %v7258_v45 = vld [vmem:[%s11143_s1 + $0xf88] sm:$0xf0]  ;;  %v482_v0 = vpack.c.bf16 %v218_v54, %v218_v54  ;;  %v7487_v32 = vld [vmem:[%s11143_s1 + $0x37c] sm:$0xf0]  ;;  %v5736_v41 = vld [vmem:[%s11143_s1 + $0x198] sm:$0xf] }
 0x2e7   :  { %4828 = vmatpush.bf16.xpose.msrb.mxu3 %v7245_v46  ;;  %4767 = vmatmul.bf16.vlgmr.msra.gmra.mxu2 %v479_v58  ;;  %v60_v46 = vld [vmem:[%s11144_s0 + $0xc0] sm:$0xff]  ;;  %v7261_v51 = vor.u32 %v7808_v44, %v7258_v45  ;;  %v481_v58 = vpack.c.bf16 %v217_v52, %v217_v52  ;;  %v7266_v44 = vld [vmem:[%s11143_s1 + $0xf90] sm:$0xf0]  ;;  %v7272_v45 = vld [vmem:[%s11143_s1 + $0xd98] sm:$0xf] }
 0x2e8   :  { %221 = vst [vmem:[#allocation1] ss:$4 sm:$0xff] %v60_v46  ;;  %v7874_v46 = vld [vmem:[%s11143_s1 + $0xf94] sm:$0xf0] }
 0x2e9   :  { %v4573_v14 = vpop.f32.mrf.mxu3  ;;  %v4536_v15 = vpop.f32.mrf.mxu0  ;;  %v7273_v55 = vor.u32 %v7874_v46, %v7272_v45  ;;  %v7280_v45 = vld [vmem:[%s11143_s1 + $0xda0] sm:$0xf] }
 0x2ea   :  { %v4560_v12 = vpop.f32.mrf.mxu2  ;;  %v7875_v46 = vld [vmem:[%s11143_s1 + $0xf9c] sm:$0xf0] }
 0x2ec   :  { %v4549_v19 = vpop.f32.mrf.mxu1 }
 0x2ed   :  { %4790 = vmatpush.bf16.xpose.msrb.mxu0 %v6721_v3  ;;  %4803 = vmatpush.bf16.xpose.msrb.mxu1 %v6725_v4  ;;  %v7744_v3 = vld [vmem:[%s11143_s1 + $0xb84] sm:$0xf0]  ;;  %v4548_v4 = vadd.f32 %v4547_v59, %v4535_v57 }
 0x2ee   :  { %4816 = vmatpush.bf16.xpose.msrb.mxu2 %v6729_v5  ;;  %v484_v5 = vpack.c.bf16 %v220_v56, %v220_v56  ;;  %v6745_v10 = vor.u32 %v7744_v3, %v6744_v2  ;;  %v7745_v2 = vld [vmem:[%s11143_s1 + $0xb8c] sm:$0xf0]  ;;  %v7681_v3 = vld [vmem:[%s11143_s1 + $0x994] sm:$0xf] }
 0x2ef   :  { %4829 = vmatpush.bf16.xpose.msrb.mxu3 %v6733_v6  ;;  %v7680_v6 = vld [vmem:[%s11143_s1 + $0x98c] sm:$0xf]  ;;  %v4561_v13 = vadd.f32 %v4560_v12, %v4548_v4  ;;  %v223_v57 = vld.sshfl [vmem:[#allocation1] sm:$0xff pattern:$0x73625140] }
 0x2f0   :  { %v6749_v11 = vor.u32 %v7680_v6, %v6746_v7  ;;  %v224_v59 = vld.sshfl [vmem:[#allocation1 + $0x8] sm:$0xff pattern:$0x73625140]  ;;  %v226_v61 = vld.sshfl [vmem:[#allocation1 + $0x18] sm:$0xff pattern:$0x73625140] }
 0x2f1   :  { %v4574_v20 = vadd.f32 %v4573_v14, %v4561_v13  ;;  %v4575_v33 = vpop.f32.mrf.mxu3  ;;  %v6754_v6 = vld [vmem:[%s11143_s1 + $0xb90] sm:$0xf0]  ;;  %v6760_v7 = vld [vmem:[%s11143_s1 + $0x998] sm:$0xf]  ;;  %v6762_v12 = vld [vmem:[%s11143_s1 + $0xb98] sm:$0xf0]  ;;  %v6753_v13 = vor.u32 %v7745_v2, %v6752_v1 }
 0x2f2   :  { %v4562_v30 = vpop.f32.mrf.mxu2  ;;  %v6757_v14 = vor.u32 %v7681_v3, %v6754_v6  ;;  %v6768_v6 = vld [vmem:[%s11143_s1 + $0x9a0] sm:$0xf] }
 0x2f3   :  { %v6250_v30 = vld [vmem:[%s11143_s1 + $0x798] sm:$0xf0] }
 0x2f5   :  { %4791 = vmatpush.bf16.xpose.msrb.mxu0 %v6209_v21  ;;  %4804 = vmatpush.bf16.xpose.msrb.mxu1 %v6213_v22  ;;  %v6226_v21 = vld [vmem:[%s11143_s1 + $0x780] sm:$0xf0]  ;;  %v6232_v22 = vld [vmem:[%s11143_s1 + $0x588] sm:$0xf] }
 0x2f6   :  { %4817 = vmatpush.bf16.xpose.msrb.mxu2 %v6217_v23  ;;  %v7616_v23 = vld [vmem:[%s11143_s1 + $0x784] sm:$0xf0]  ;;  %v6229_v27 = vor.u32 %v7551_v18, %v6226_v21  ;;  %v6240_v21 = vld [vmem:[%s11143_s1 + $0x590] sm:$0xf] }
 0x2f7   :  { %4830 = vmatpush.bf16.xpose.msrb.mxu3 %v6221_v24  ;;  %v7552_v24 = vld [vmem:[%s11143_s1 + $0x58c] sm:$0xf]  ;;  %v6233_v28 = vor.u32 %v7616_v23, %v6232_v22  ;;  %v7617_v22 = vld [vmem:[%s11143_s1 + $0x78c] sm:$0xf0]  ;;  %v7553_v23 = vld [vmem:[%s11143_s1 + $0x594] sm:$0xf] }
 0x2f8   :  { %v6237_v29 = vor.u32 %v7552_v24, %v6234_v25 }
 0x2fd   :  { %4792 = vmatpush.bf16.xpose.msrb.mxu0 %v5697_v38  ;;  %4805 = vmatpush.bf16.xpose.msrb.mxu1 %v5701_v42  ;;  %v7424_v38 = vld [vmem:[%s11143_s1 + $0x18c] sm:$0xf]  ;;  %v7809_v42 = vld [vmem:[%s11143_s1 + $0xd94] sm:$0xf] }
 0x2fe   :  { %4818 = vmatpush.bf16.xpose.msrb.mxu2 %v5705_v43  ;;  %v5713_v43 = vor.u32 %v7487_v32, %v5712_v31  ;;  %v5725_v52 = vor.u32 %v7424_v38, %v5722_v39  ;;  %v7269_v54 = vor.u32 %v7809_v42, %v7266_v44  ;;  %v6241_v31 = vor.u32 %v7617_v22, %v6240_v21  ;;  %v7425_v39 = vld [vmem:[%s11143_s1 + $0x194] sm:$0xf]  ;;  %v7490_v42 = vld [vmem:[%s11143_s1 + $0x394] sm:$0xf0]  ;;  %v5738_v44 = vld [vmem:[%s11143_s1 + $0x398] sm:$0xf0] }
 0x2ff   :  { %4831 = vmatpush.bf16.xpose.msrb.mxu3 %v5709_v47  ;;  %v5717_v47 = vor.u32 %v7423_v34, %v5714_v35 }
 0x301   :  { %v4586_v60 = vpop.f32.mrf.mxu0 }
 0x302   :  { %v4587_v62 = vadd.f32 %v4586_v60, %v4574_v20 }
 0x304   :  { %4793 = vmatmul.bf16.vlgmr.msrb.gmra.mxu0 %v481_v58  ;;  %4806 = vmatmul.bf16.vlgmr.msrb.gmra.mxu1 %v482_v0  ;;  %v225_v58 = vld.sshfl [vmem:[#allocation1 + $0x10] sm:$0xff pattern:$0x73625140]  ;;  %v4599_v0 = vpop.f32.mrf.mxu1 }
 0x305   :  { %4841 = vmatpush.bf16.xpose.msra.mxu0 %v7249_v48  ;;  %4854 = vmatpush.bf16.xpose.msra.mxu1 %v7253_v49  ;;  %v5721_v48 = vor.u32 %v7488_v37, %v5720_v36  ;;  %v7810_v49 = vld [vmem:[%s11143_s1 + $0xd9c] sm:$0xf]  ;;  %v487_v4 = vpack.c.bf16 %v225_v58, %v225_v58  ;;  %v5728_v36 = vld [vmem:[%s11143_s1 + $0x190] sm:$0xf]  ;;  %v7281_v58 = vor.u32 %v7875_v46, %v7280_v45  ;;  %v5746_v45 = vld [vmem:[%s11143_s1 + $0x3a0] sm:$0xf0] }
 0x306   :  { %4867 = vmatpush.bf16.xpose.msra.mxu2 %v7257_v50  ;;  %4832 = vmatmul.bf16.vlgmr.msrb.gmra.mxu3 %v484_v5  ;;  %v7274_v50 = vld [vmem:[%s11143_s1 + $0xf98] sm:$0xf0]  ;;  %v486_v5 = vpack.c.bf16 %v224_v59, %v224_v59  ;;  %v7489_v37 = vld [vmem:[%s11143_s1 + $0x38c] sm:$0xf0]  ;;  %v5752_v46 = vld [vmem:[%s11143_s1 + $0x1a8] sm:$0xf] }
 0x307   :  { %4880 = vmatpush.bf16.xpose.msra.mxu3 %v7261_v51  ;;  %4819 = vmatmul.bf16.vlgmr.msrb.gmra.mxu2 %v483_v63  ;;  %v61_v51 = vld [vmem:[%s11144_s0 + $0xc8] sm:$0xff]  ;;  %v7277_v56 = vor.u32 %v7810_v49, %v7274_v50  ;;  %v485_v63 = vpack.c.bf16 %v223_v57, %v223_v57  ;;  %v7282_v49 = vld [vmem:[%s11143_s1 + $0xfa0] sm:$0xf0] }
 0x308   :  { %222 = vst [vmem:[#allocation1 + $0x20] ss:$4 sm:$0xff] %v61_v51  ;;  %v7288_v50 = vld [vmem:[%s11143_s1 + $0xda8] sm:$0xf] }
 0x309   :  { %v4625_v19 = vpop.f32.mrf.mxu3  ;;  %v4588_v20 = vpop.f32.mrf.mxu0  ;;  %v7876_v51 = vld [vmem:[%s11143_s1 + $0xfa4] sm:$0xf0] }
 0x30a   :  { %v4612_v17 = vpop.f32.mrf.mxu2  ;;  %v7289_v60 = vor.u32 %v7876_v51, %v7288_v50  ;;  %v7296_v50 = vld [vmem:[%s11143_s1 + $0xdb0] sm:$0xf] }
 0x30b   :  { %v7877_v51 = vld [vmem:[%s11143_s1 + $0xfac] sm:$0xf0] }
 0x30c   :  { %v4601_v24 = vpop.f32.mrf.mxu1 }
 0x30d   :  { %4842 = vmatpush.bf16.xpose.msra.mxu0 %v6737_v8  ;;  %4855 = vmatpush.bf16.xpose.msra.mxu1 %v6741_v9  ;;  %v7746_v8 = vld [vmem:[%s11143_s1 + $0xb94] sm:$0xf0]  ;;  %v4600_v9 = vadd.f32 %v4599_v0, %v4587_v62 }
 0x30e   :  { %4868 = vmatpush.bf16.xpose.msra.mxu2 %v6745_v10  ;;  %v488_v10 = vpack.c.bf16 %v226_v61, %v226_v61  ;;  %v6761_v15 = vor.u32 %v7746_v8, %v6760_v7  ;;  %v7747_v7 = vld [vmem:[%s11143_s1 + $0xb9c] sm:$0xf0]  ;;  %v7683_v8 = vld [vmem:[%s11143_s1 + $0x9a4] sm:$0xf] }
 0x30f   :  { %4881 = vmatpush.bf16.xpose.msra.mxu3 %v6749_v11  ;;  %v7682_v11 = vld [vmem:[%s11143_s1 + $0x99c] sm:$0xf]  ;;  %v4613_v18 = vadd.f32 %v4612_v17, %v4600_v9  ;;  %v227_v62 = vld.sshfl [vmem:[#allocation1 + $0x20] sm:$0xff pattern:$0x73625140] }
 0x310   :  { %v6765_v16 = vor.u32 %v7682_v11, %v6762_v12  ;;  %v228_v0 = vld.sshfl [vmem:[#allocation1 + $0x28] sm:$0xff pattern:$0x73625140]  ;;  %v230_v2 = vld.sshfl [vmem:[#allocation1 + $0x38] sm:$0xff pattern:$0x73625140] }
 0x311   :  { %v4626_v25 = vadd.f32 %v4625_v19, %v4613_v18  ;;  %v4627_v38 = vpop.f32.mrf.mxu3  ;;  %v6770_v11 = vld [vmem:[%s11143_s1 + $0xba0] sm:$0xf0]  ;;  %v6776_v12 = vld [vmem:[%s11143_s1 + $0x9a8] sm:$0xf]  ;;  %v6778_v17 = vld [vmem:[%s11143_s1 + $0xba8] sm:$0xf0]  ;;  %v6769_v18 = vor.u32 %v7747_v7, %v6768_v6 }
 0x312   :  { %v4614_v35 = vpop.f32.mrf.mxu2  ;;  %v6773_v19 = vor.u32 %v7683_v8, %v6770_v11  ;;  %v6784_v11 = vld [vmem:[%s11143_s1 + $0x9b0] sm:$0xf] }
 0x313   :  { %v6266_v35 = vld [vmem:[%s11143_s1 + $0x7a8] sm:$0xf0] }
 0x315   :  { %4843 = vmatpush.bf16.xpose.msra.mxu0 %v6225_v26  ;;  %4856 = vmatpush.bf16.xpose.msra.mxu1 %v6229_v27  ;;  %v6242_v26 = vld [vmem:[%s11143_s1 + $0x790] sm:$0xf0]  ;;  %v6248_v27 = vld [vmem:[%s11143_s1 + $0x598] sm:$0xf] }
 0x316   :  { %4869 = vmatpush.bf16.xpose.msra.mxu2 %v6233_v28  ;;  %v7618_v28 = vld [vmem:[%s11143_s1 + $0x794] sm:$0xf0]  ;;  %v6245_v32 = vor.u32 %v7553_v23, %v6242_v26  ;;  %v6256_v26 = vld [vmem:[%s11143_s1 + $0x5a0] sm:$0xf] }
 0x317   :  { %4882 = vmatpush.bf16.xpose.msra.mxu3 %v6237_v29  ;;  %v7554_v29 = vld [vmem:[%s11143_s1 + $0x59c] sm:$0xf]  ;;  %v6249_v33 = vor.u32 %v7618_v28, %v6248_v27  ;;  %v7619_v27 = vld [vmem:[%s11143_s1 + $0x79c] sm:$0xf0]  ;;  %v7555_v28 = vld [vmem:[%s11143_s1 + $0x5a4] sm:$0xf] }
 0x318   :  { %v6253_v34 = vor.u32 %v7554_v29, %v6250_v30 }
 0x31d   :  { %4844 = vmatpush.bf16.xpose.msra.mxu0 %v5713_v43  ;;  %4857 = vmatpush.bf16.xpose.msra.mxu1 %v5717_v47  ;;  %v7426_v43 = vld [vmem:[%s11143_s1 + $0x19c] sm:$0xf]  ;;  %v7811_v47 = vld [vmem:[%s11143_s1 + $0xda4] sm:$0xf] }
 0x31e   :  { %4870 = vmatpush.bf16.xpose.msra.mxu2 %v5721_v48  ;;  %v5729_v48 = vor.u32 %v7489_v37, %v5728_v36  ;;  %v5741_v57 = vor.u32 %v7426_v43, %v5738_v44  ;;  %v7285_v59 = vor.u32 %v7811_v47, %v7282_v49  ;;  %v6257_v36 = vor.u32 %v7619_v27, %v6256_v26  ;;  %v7427_v44 = vld [vmem:[%s11143_s1 + $0x1a4] sm:$0xf]  ;;  %v7492_v47 = vld [vmem:[%s11143_s1 + $0x3a4] sm:$0xf0]  ;;  %v5754_v49 = vld [vmem:[%s11143_s1 + $0x3a8] sm:$0xf0] }
 0x31f   :  { %4883 = vmatpush.bf16.xpose.msra.mxu3 %v5725_v52  ;;  %v5733_v52 = vor.u32 %v7425_v39, %v5730_v40 }
 0x321   :  { %v4638_v1 = vpop.f32.mrf.mxu0 }
 0x322   :  { %v4639_v3 = vadd.f32 %v4638_v1, %v4626_v25 }
 0x324   :  { %4845 = vmatmul.bf16.vlgmr.msra.gmra.mxu0 %v485_v63  ;;  %4858 = vmatmul.bf16.vlgmr.msra.gmra.mxu1 %v486_v5  ;;  %v229_v63 = vld.sshfl [vmem:[#allocation1 + $0x30] sm:$0xff pattern:$0x73625140]  ;;  %v4651_v5 = vpop.f32.mrf.mxu1 }
 0x325   :  { %4893 = vmatpush.bf16.xpose.msrb.mxu0 %v7265_v53  ;;  %4906 = vmatpush.bf16.xpose.msrb.mxu1 %v7269_v54  ;;  %v5737_v53 = vor.u32 %v7490_v42, %v5736_v41  ;;  %v7812_v54 = vld [vmem:[%s11143_s1 + $0xdac] sm:$0xf]  ;;  %v491_v9 = vpack.c.bf16 %v229_v63, %v229_v63  ;;  %v5744_v41 = vld [vmem:[%s11143_s1 + $0x1a0] sm:$0xf]  ;;  %v7297_v63 = vor.u32 %v7877_v51, %v7296_v50  ;;  %v5762_v50 = vld [vmem:[%s11143_s1 + $0x3b0] sm:$0xf0] }
 0x326   :  { %4919 = vmatpush.bf16.xpose.msrb.mxu2 %v7273_v55  ;;  %4884 = vmatmul.bf16.vlgmr.msra.gmra.mxu3 %v488_v10  ;;  %v7290_v55 = vld [vmem:[%s11143_s1 + $0xfa8] sm:$0xf0]  ;;  %v490_v10 = vpack.c.bf16 %v228_v0, %v228_v0  ;;  %v7491_v42 = vld [vmem:[%s11143_s1 + $0x39c] sm:$0xf0]  ;;  %v5768_v51 = vld [vmem:[%s11143_s1 + $0x1b8] sm:$0xf] }
 0x327   :  { %4932 = vmatpush.bf16.xpose.msrb.mxu3 %v7277_v56  ;;  %4871 = vmatmul.bf16.vlgmr.msra.gmra.mxu2 %v487_v4  ;;  %v62_v56 = vld [vmem:[%s11144_s0 + $0xd0] sm:$0xff]  ;;  %v7293_v61 = vor.u32 %v7812_v54, %v7290_v55  ;;  %v489_v4 = vpack.c.bf16 %v227_v62, %v227_v62  ;;  %v7304_v55 = vld [vmem:[%s11143_s1 + $0xdb8] sm:$0xf] }
 0x328   :  { %231 = vst [vmem:[#allocation1] ss:$4 sm:$0xff] %v62_v56  ;;  %v7298_v54 = vld [vmem:[%s11143_s1 + $0xfb0] sm:$0xf0]  ;;  %v7878_v56 = vld [vmem:[%s11143_s1 + $0xfb4] sm:$0xf0] }
 0x329   :  { %v4677_v24 = vpop.f32.mrf.mxu3  ;;  %v4640_v25 = vpop.f32.mrf.mxu0  ;;  %v7305_v1 = vor.u32 %v7878_v56, %v7304_v55  ;;  %v7312_v55 = vld [vmem:[%s11143_s1 + $0xdc0] sm:$0xf] }
 0x32a   :  { %v4664_v22 = vpop.f32.mrf.mxu2  ;;  %v7879_v56 = vld [vmem:[%s11143_s1 + $0xfbc] sm:$0xf0] }
 0x32c   :  { %v4653_v29 = vpop.f32.mrf.mxu1 }
 0x32d   :  { %4894 = vmatpush.bf16.xpose.msrb.mxu0 %v6753_v13  ;;  %4907 = vmatpush.bf16.xpose.msrb.mxu1 %v6757_v14  ;;  %v7748_v13 = vld [vmem:[%s11143_s1 + $0xba4] sm:$0xf0]  ;;  %v4652_v14 = vadd.f32 %v4651_v5, %v4639_v3 }
 0x32e   :  { %4920 = vmatpush.bf16.xpose.msrb.mxu2 %v6761_v15  ;;  %v492_v15 = vpack.c.bf16 %v230_v2, %v230_v2  ;;  %v6777_v20 = vor.u32 %v7748_v13, %v6776_v12  ;;  %v7749_v12 = vld [vmem:[%s11143_s1 + $0xbac] sm:$0xf0]  ;;  %v7685_v13 = vld [vmem:[%s11143_s1 + $0x9b4] sm:$0xf] }
 0x32f   :  { %4933 = vmatpush.bf16.xpose.msrb.mxu3 %v6765_v16  ;;  %v7684_v16 = vld [vmem:[%s11143_s1 + $0x9ac] sm:$0xf]  ;;  %v4665_v23 = vadd.f32 %v4664_v22, %v4652_v14  ;;  %v233_v3 = vld.sshfl [vmem:[#allocation1] sm:$0xff pattern:$0x73625140] }
 0x330   :  { %v6781_v21 = vor.u32 %v7684_v16, %v6778_v17  ;;  %v234_v5 = vld.sshfl [vmem:[#allocation1 + $0x8] sm:$0xff pattern:$0x73625140]  ;;  %v236_v7 = vld.sshfl [vmem:[#allocation1 + $0x18] sm:$0xff pattern:$0x73625140] }
 0x331   :  { %v4678_v30 = vadd.f32 %v4677_v24, %v4665_v23  ;;  %v4679_v43 = vpop.f32.mrf.mxu3  ;;  %v6786_v16 = vld [vmem:[%s11143_s1 + $0xbb0] sm:$0xf0]  ;;  %v6792_v17 = vld [vmem:[%s11143_s1 + $0x9b8] sm:$0xf]  ;;  %v6794_v22 = vld [vmem:[%s11143_s1 + $0xbb8] sm:$0xf0]  ;;  %v6785_v23 = vor.u32 %v7749_v12, %v6784_v11 }
 0x332   :  { %v4666_v40 = vpop.f32.mrf.mxu2  ;;  %v6789_v24 = vor.u32 %v7685_v13, %v6786_v16  ;;  %v6800_v16 = vld [vmem:[%s11143_s1 + $0x9c0] sm:$0xf] }
 0x333   :  { %v6282_v40 = vld [vmem:[%s11143_s1 + $0x7b8] sm:$0xf0] }
 0x335   :  { %4895 = vmatpush.bf16.xpose.msrb.mxu0 %v6241_v31  ;;  %4908 = vmatpush.bf16.xpose.msrb.mxu1 %v6245_v32  ;;  %v6258_v31 = vld [vmem:[%s11143_s1 + $0x7a0] sm:$0xf0]  ;;  %v6264_v32 = vld [vmem:[%s11143_s1 + $0x5a8] sm:$0xf] }
 0x336   :  { %4921 = vmatpush.bf16.xpose.msrb.mxu2 %v6249_v33  ;;  %v7620_v33 = vld [vmem:[%s11143_s1 + $0x7a4] sm:$0xf0]  ;;  %v6261_v37 = vor.u32 %v7555_v28, %v6258_v31  ;;  %v6272_v31 = vld [vmem:[%s11143_s1 + $0x5b0] sm:$0xf] }
 0x337   :  { %4934 = vmatpush.bf16.xpose.msrb.mxu3 %v6253_v34  ;;  %v7556_v34 = vld [vmem:[%s11143_s1 + $0x5ac] sm:$0xf]  ;;  %v6265_v38 = vor.u32 %v7620_v33, %v6264_v32  ;;  %v7621_v32 = vld [vmem:[%s11143_s1 + $0x7ac] sm:$0xf0]  ;;  %v7557_v33 = vld [vmem:[%s11143_s1 + $0x5b4] sm:$0xf] }
 0x338   :  { %v6269_v39 = vor.u32 %v7556_v34, %v6266_v35 }
 0x33d   :  { %4896 = vmatpush.bf16.xpose.msrb.mxu0 %v5729_v48  ;;  %4909 = vmatpush.bf16.xpose.msrb.mxu1 %v5733_v52  ;;  %v7428_v48 = vld [vmem:[%s11143_s1 + $0x1ac] sm:$0xf]  ;;  %v7813_v52 = vld [vmem:[%s11143_s1 + $0xdb4] sm:$0xf] }
 0x33e   :  { %4922 = vmatpush.bf16.xpose.msrb.mxu2 %v5737_v53  ;;  %v5745_v53 = vor.u32 %v7491_v42, %v5744_v41  ;;  %v5757_v62 = vor.u32 %v7428_v48, %v5754_v49  ;;  %v7301_v0 = vor.u32 %v7813_v52, %v7298_v54  ;;  %v6273_v41 = vor.u32 %v7621_v32, %v6272_v31  ;;  %v7429_v49 = vld [vmem:[%s11143_s1 + $0x1b4] sm:$0xf]  ;;  %v7494_v52 = vld [vmem:[%s11143_s1 + $0x3b4] sm:$0xf0]  ;;  %v5770_v54 = vld [vmem:[%s11143_s1 + $0x3b8] sm:$0xf0] }
 0x33f   :  { %4935 = vmatpush.bf16.xpose.msrb.mxu3 %v5741_v57  ;;  %v5749_v57 = vor.u32 %v7427_v44, %v5746_v45 }
 0x341   :  { %v4690_v6 = vpop.f32.mrf.mxu0 }
 0x342   :  { %v4691_v8 = vadd.f32 %v4690_v6, %v4678_v30 }
 0x344   :  { %4897 = vmatmul.bf16.vlgmr.msrb.gmra.mxu0 %v489_v4  ;;  %4910 = vmatmul.bf16.vlgmr.msrb.gmra.mxu1 %v490_v10  ;;  %v235_v4 = vld.sshfl [vmem:[#allocation1 + $0x10] sm:$0xff pattern:$0x73625140]  ;;  %v4703_v10 = vpop.f32.mrf.mxu1 }
 0x345   :  { %4945 = vmatpush.bf16.xpose.msra.mxu0 %v7281_v58  ;;  %4958 = vmatpush.bf16.xpose.msra.mxu1 %v7285_v59  ;;  %v5753_v58 = vor.u32 %v7492_v47, %v5752_v46  ;;  %v7814_v59 = vld [vmem:[%s11143_s1 + $0xdbc] sm:$0xf]  ;;  %v495_v14 = vpack.c.bf16 %v235_v4, %v235_v4  ;;  %v5760_v46 = vld [vmem:[%s11143_s1 + $0x1b0] sm:$0xf]  ;;  %v7313_v4 = vor.u32 %v7879_v56, %v7312_v55  ;;  %v5778_v55 = vld [vmem:[%s11143_s1 + $0x3c0] sm:$0xf0] }
 0x346   :  { %4971 = vmatpush.bf16.xpose.msra.mxu2 %v7289_v60  ;;  %4936 = vmatmul.bf16.vlgmr.msrb.gmra.mxu3 %v492_v15  ;;  %v7306_v60 = vld [vmem:[%s11143_s1 + $0xfb8] sm:$0xf0]  ;;  %v494_v15 = vpack.c.bf16 %v234_v5, %v234_v5  ;;  %v7493_v47 = vld [vmem:[%s11143_s1 + $0x3ac] sm:$0xf0]  ;;  %v5784_v56 = vld [vmem:[%s11143_s1 + $0x1c8] sm:$0xf] }
 0x347   :  { %4984 = vmatpush.bf16.xpose.msra.mxu3 %v7293_v61  ;;  %4923 = vmatmul.bf16.vlgmr.msrb.gmra.mxu2 %v491_v9  ;;  %v63_v61 = vld [vmem:[%s11144_s0 + $0xd8] sm:$0xff]  ;;  %v7309_v2 = vor.u32 %v7814_v59, %v7306_v60  ;;  %v493_v9 = vpack.c.bf16 %v233_v3, %v233_v3  ;;  %v7314_v59 = vld [vmem:[%s11143_s1 + $0xfc0] sm:$0xf0]  ;;  %v7320_v60 = vld [vmem:[%s11143_s1 + $0xdc8] sm:$0xf] }
 0x348   :  { %232 = vst [vmem:[#allocation1 + $0x20] ss:$4 sm:$0xff] %v63_v61  ;;  %v7880_v61 = vld [vmem:[%s11143_s1 + $0xfc4] sm:$0xf0] }
 0x349   :  { %v4729_v29 = vpop.f32.mrf.mxu3  ;;  %v4692_v30 = vpop.f32.mrf.mxu0  ;;  %v7321_v6 = vor.u32 %v7880_v61, %v7320_v60  ;;  %v7328_v60 = vld [vmem:[%s11143_s1 + $0xdd0] sm:$0xf] }
 0x34a   :  { %v4716_v27 = vpop.f32.mrf.mxu2  ;;  %v7881_v61 = vld [vmem:[%s11143_s1 + $0xfcc] sm:$0xf0] }
 0x34c   :  { %v4705_v34 = vpop.f32.mrf.mxu1 }
 0x34d   :  { %4946 = vmatpush.bf16.xpose.msra.mxu0 %v6769_v18  ;;  %4959 = vmatpush.bf16.xpose.msra.mxu1 %v6773_v19  ;;  %v7750_v18 = vld [vmem:[%s11143_s1 + $0xbb4] sm:$0xf0]  ;;  %v4704_v19 = vadd.f32 %v4703_v10, %v4691_v8 }
 0x34e   :  { %4972 = vmatpush.bf16.xpose.msra.mxu2 %v6777_v20  ;;  %v496_v20 = vpack.c.bf16 %v236_v7, %v236_v7  ;;  %v6793_v25 = vor.u32 %v7750_v18, %v6792_v17  ;;  %v7751_v17 = vld [vmem:[%s11143_s1 + $0xbbc] sm:$0xf0]  ;;  %v7687_v18 = vld [vmem:[%s11143_s1 + $0x9c4] sm:$0xf] }
 0x34f   :  { %4985 = vmatpush.bf16.xpose.msra.mxu3 %v6781_v21  ;;  %v7686_v21 = vld [vmem:[%s11143_s1 + $0x9bc] sm:$0xf]  ;;  %v4717_v28 = vadd.f32 %v4716_v27, %v4704_v19  ;;  %v237_v8 = vld.sshfl [vmem:[#allocation1 + $0x20] sm:$0xff pattern:$0x73625140] }
 0x350   :  { %v6797_v26 = vor.u32 %v7686_v21, %v6794_v22  ;;  %v238_v10 = vld.sshfl [vmem:[#allocation1 + $0x28] sm:$0xff pattern:$0x73625140]  ;;  %v240_v12 = vld.sshfl [vmem:[#allocation1 + $0x38] sm:$0xff pattern:$0x73625140] }
 0x351   :  { %v4730_v35 = vadd.f32 %v4729_v29, %v4717_v28  ;;  %v4731_v48 = vpop.f32.mrf.mxu3  ;;  %v6802_v21 = vld [vmem:[%s11143_s1 + $0xbc0] sm:$0xf0]  ;;  %v6808_v22 = vld [vmem:[%s11143_s1 + $0x9c8] sm:$0xf]  ;;  %v6810_v27 = vld [vmem:[%s11143_s1 + $0xbc8] sm:$0xf0]  ;;  %v6801_v28 = vor.u32 %v7751_v17, %v6800_v16 }
 0x352   :  { %v4718_v45 = vpop.f32.mrf.mxu2  ;;  %v6805_v29 = vor.u32 %v7687_v18, %v6802_v21  ;;  %v6816_v21 = vld [vmem:[%s11143_s1 + $0x9d0] sm:$0xf] }
 0x353   :  { %v6298_v45 = vld [vmem:[%s11143_s1 + $0x7c8] sm:$0xf0] }
 0x355   :  { %4947 = vmatpush.bf16.xpose.msra.mxu0 %v6257_v36  ;;  %4960 = vmatpush.bf16.xpose.msra.mxu1 %v6261_v37  ;;  %v6274_v36 = vld [vmem:[%s11143_s1 + $0x7b0] sm:$0xf0]  ;;  %v6280_v37 = vld [vmem:[%s11143_s1 + $0x5b8] sm:$0xf] }
 0x356   :  { %4973 = vmatpush.bf16.xpose.msra.mxu2 %v6265_v38  ;;  %v7622_v38 = vld [vmem:[%s11143_s1 + $0x7b4] sm:$0xf0]  ;;  %v6277_v42 = vor.u32 %v7557_v33, %v6274_v36  ;;  %v6288_v36 = vld [vmem:[%s11143_s1 + $0x5c0] sm:$0xf] }
 0x357   :  { %4986 = vmatpush.bf16.xpose.msra.mxu3 %v6269_v39  ;;  %v7558_v39 = vld [vmem:[%s11143_s1 + $0x5bc] sm:$0xf]  ;;  %v6281_v43 = vor.u32 %v7622_v38, %v6280_v37  ;;  %v7623_v37 = vld [vmem:[%s11143_s1 + $0x7bc] sm:$0xf0]  ;;  %v7559_v38 = vld [vmem:[%s11143_s1 + $0x5c4] sm:$0xf] }
 0x358   :  { %v6285_v44 = vor.u32 %v7558_v39, %v6282_v40 }
 0x35d   :  { %4948 = vmatpush.bf16.xpose.msra.mxu0 %v5745_v53  ;;  %4961 = vmatpush.bf16.xpose.msra.mxu1 %v5749_v57  ;;  %v7430_v53 = vld [vmem:[%s11143_s1 + $0x1bc] sm:$0xf]  ;;  %v7815_v57 = vld [vmem:[%s11143_s1 + $0xdc4] sm:$0xf] }
 0x35e   :  { %4974 = vmatpush.bf16.xpose.msra.mxu2 %v5753_v58  ;;  %v5761_v58 = vor.u32 %v7493_v47, %v5760_v46  ;;  %v5773_v3 = vor.u32 %v7430_v53, %v5770_v54  ;;  %v7317_v5 = vor.u32 %v7815_v57, %v7314_v59  ;;  %v6289_v46 = vor.u32 %v7623_v37, %v6288_v36  ;;  %v7431_v54 = vld [vmem:[%s11143_s1 + $0x1c4] sm:$0xf]  ;;  %v7496_v57 = vld [vmem:[%s11143_s1 + $0x3c4] sm:$0xf0]  ;;  %v5786_v59 = vld [vmem:[%s11143_s1 + $0x3c8] sm:$0xf0] }
 0x35f   :  { %4987 = vmatpush.bf16.xpose.msra.mxu3 %v5757_v62  ;;  %v5765_v62 = vor.u32 %v7429_v49, %v5762_v50 }
 0x361   :  { %v4742_v11 = vpop.f32.mrf.mxu0 }
 0x362   :  { %v4743_v13 = vadd.f32 %v4742_v11, %v4730_v35 }
 0x364   :  { %4949 = vmatmul.bf16.vlgmr.msra.gmra.mxu0 %v493_v9  ;;  %4962 = vmatmul.bf16.vlgmr.msra.gmra.mxu1 %v494_v15  ;;  %v239_v9 = vld.sshfl [vmem:[#allocation1 + $0x30] sm:$0xff pattern:$0x73625140]  ;;  %v4755_v15 = vpop.f32.mrf.mxu1 }
 0x365   :  { %4997 = vmatpush.bf16.xpose.msrb.mxu0 %v7297_v63  ;;  %5010 = vmatpush.bf16.xpose.msrb.mxu1 %v7301_v0  ;;  %v5769_v63 = vor.u32 %v7494_v52, %v5768_v51  ;;  %v7816_v0 = vld [vmem:[%s11143_s1 + $0xdcc] sm:$0xf]  ;;  %v499_v19 = vpack.c.bf16 %v239_v9, %v239_v9  ;;  %v5776_v51 = vld [vmem:[%s11143_s1 + $0x1c0] sm:$0xf]  ;;  %v7329_v9 = vor.u32 %v7881_v61, %v7328_v60  ;;  %v5794_v60 = vld [vmem:[%s11143_s1 + $0x3d0] sm:$0xf0] }
 0x366   :  { %5023 = vmatpush.bf16.xpose.msrb.mxu2 %v7305_v1  ;;  %4988 = vmatmul.bf16.vlgmr.msra.gmra.mxu3 %v496_v20  ;;  %v7322_v1 = vld [vmem:[%s11143_s1 + $0xfc8] sm:$0xf0]  ;;  %v498_v20 = vpack.c.bf16 %v238_v10, %v238_v10  ;;  %v7495_v52 = vld [vmem:[%s11143_s1 + $0x3bc] sm:$0xf0]  ;;  %v5800_v61 = vld [vmem:[%s11143_s1 + $0x1d8] sm:$0xf] }
 0x367   :  { %5036 = vmatpush.bf16.xpose.msrb.mxu3 %v7309_v2  ;;  %4975 = vmatmul.bf16.vlgmr.msra.gmra.mxu2 %v495_v14  ;;  %v64_v2 = vld [vmem:[%s11144_s0 + $0xe0] sm:$0xff]  ;;  %v7325_v7 = vor.u32 %v7816_v0, %v7322_v1  ;;  %v497_v14 = vpack.c.bf16 %v237_v8, %v237_v8  ;;  %v7330_v0 = vld [vmem:[%s11143_s1 + $0xfd0] sm:$0xf0]  ;;  %v7336_v1 = vld [vmem:[%s11143_s1 + $0xdd8] sm:$0xf] }
 0x368   :  { %241 = vst [vmem:[#allocation1] ss:$4 sm:$0xff] %v64_v2  ;;  %v7882_v2 = vld [vmem:[%s11143_s1 + $0xfd4] sm:$0xf0] }
 0x369   :  { %v4781_v34 = vpop.f32.mrf.mxu3  ;;  %v4744_v35 = vpop.f32.mrf.mxu0  ;;  %v7337_v11 = vor.u32 %v7882_v2, %v7336_v1  ;;  %v7344_v1 = vld [vmem:[%s11143_s1 + $0xde0] sm:$0xf] }
 0x36a   :  { %v4768_v32 = vpop.f32.mrf.mxu2  ;;  %v7883_v2 = vld [vmem:[%s11143_s1 + $0xfdc] sm:$0xf0] }
 0x36c   :  { %v4757_v39 = vpop.f32.mrf.mxu1 }
 0x36d   :  { %4998 = vmatpush.bf16.xpose.msrb.mxu0 %v6785_v23  ;;  %5011 = vmatpush.bf16.xpose.msrb.mxu1 %v6789_v24  ;;  %v7752_v23 = vld [vmem:[%s11143_s1 + $0xbc4] sm:$0xf0]  ;;  %v4756_v24 = vadd.f32 %v4755_v15, %v4743_v13 }
 0x36e   :  { %5024 = vmatpush.bf16.xpose.msrb.mxu2 %v6793_v25  ;;  %v500_v25 = vpack.c.bf16 %v240_v12, %v240_v12  ;;  %v6809_v30 = vor.u32 %v7752_v23, %v6808_v22  ;;  %v7753_v22 = vld [vmem:[%s11143_s1 + $0xbcc] sm:$0xf0]  ;;  %v7689_v23 = vld [vmem:[%s11143_s1 + $0x9d4] sm:$0xf] }
 0x36f   :  { %5037 = vmatpush.bf16.xpose.msrb.mxu3 %v6797_v26  ;;  %v7688_v26 = vld [vmem:[%s11143_s1 + $0x9cc] sm:$0xf]  ;;  %v4769_v33 = vadd.f32 %v4768_v32, %v4756_v24  ;;  %v243_v13 = vld.sshfl [vmem:[#allocation1] sm:$0xff pattern:$0x73625140] }
 0x370   :  { %v6813_v31 = vor.u32 %v7688_v26, %v6810_v27  ;;  %v244_v15 = vld.sshfl [vmem:[#allocation1 + $0x8] sm:$0xff pattern:$0x73625140]  ;;  %v246_v17 = vld.sshfl [vmem:[#allocation1 + $0x18] sm:$0xff pattern:$0x73625140] }
 0x371   :  { %v4782_v40 = vadd.f32 %v4781_v34, %v4769_v33  ;;  %v4783_v53 = vpop.f32.mrf.mxu3  ;;  %v6818_v26 = vld [vmem:[%s11143_s1 + $0xbd0] sm:$0xf0]  ;;  %v6824_v27 = vld [vmem:[%s11143_s1 + $0x9d8] sm:$0xf]  ;;  %v6826_v32 = vld [vmem:[%s11143_s1 + $0xbd8] sm:$0xf0]  ;;  %v6817_v33 = vor.u32 %v7753_v22, %v6816_v21 }
 0x372   :  { %v4770_v50 = vpop.f32.mrf.mxu2  ;;  %v6821_v34 = vor.u32 %v7689_v23, %v6818_v26  ;;  %v6832_v26 = vld [vmem:[%s11143_s1 + $0x9e0] sm:$0xf] }
 0x373   :  { %v6314_v50 = vld [vmem:[%s11143_s1 + $0x7d8] sm:$0xf0] }
 0x375   :  { %4999 = vmatpush.bf16.xpose.msrb.mxu0 %v6273_v41  ;;  %5012 = vmatpush.bf16.xpose.msrb.mxu1 %v6277_v42  ;;  %v6290_v41 = vld [vmem:[%s11143_s1 + $0x7c0] sm:$0xf0]  ;;  %v6296_v42 = vld [vmem:[%s11143_s1 + $0x5c8] sm:$0xf] }
 0x376   :  { %5025 = vmatpush.bf16.xpose.msrb.mxu2 %v6281_v43  ;;  %v7624_v43 = vld [vmem:[%s11143_s1 + $0x7c4] sm:$0xf0]  ;;  %v6293_v47 = vor.u32 %v7559_v38, %v6290_v41  ;;  %v6304_v41 = vld [vmem:[%s11143_s1 + $0x5d0] sm:$0xf] }
 0x377   :  { %5038 = vmatpush.bf16.xpose.msrb.mxu3 %v6285_v44  ;;  %v7560_v44 = vld [vmem:[%s11143_s1 + $0x5cc] sm:$0xf]  ;;  %v6297_v48 = vor.u32 %v7624_v43, %v6296_v42  ;;  %v7625_v42 = vld [vmem:[%s11143_s1 + $0x7cc] sm:$0xf0]  ;;  %v7561_v43 = vld [vmem:[%s11143_s1 + $0x5d4] sm:$0xf] }
 0x378   :  { %v6301_v49 = vor.u32 %v7560_v44, %v6298_v45 }
 0x37d   :  { %5000 = vmatpush.bf16.xpose.msrb.mxu0 %v5761_v58  ;;  %5013 = vmatpush.bf16.xpose.msrb.mxu1 %v5765_v62  ;;  %v7432_v58 = vld [vmem:[%s11143_s1 + $0x1cc] sm:$0xf]  ;;  %v7817_v62 = vld [vmem:[%s11143_s1 + $0xdd4] sm:$0xf] }
 0x37e   :  { %5026 = vmatpush.bf16.xpose.msrb.mxu2 %v5769_v63  ;;  %v5777_v63 = vor.u32 %v7495_v52, %v5776_v51  ;;  %v5789_v8 = vor.u32 %v7432_v58, %v5786_v59  ;;  %v7333_v10 = vor.u32 %v7817_v62, %v7330_v0  ;;  %v6305_v51 = vor.u32 %v7625_v42, %v6304_v41  ;;  %v7433_v59 = vld [vmem:[%s11143_s1 + $0x1d4] sm:$0xf]  ;;  %v7498_v62 = vld [vmem:[%s11143_s1 + $0x3d4] sm:$0xf0]  ;;  %v5802_v0 = vld [vmem:[%s11143_s1 + $0x3d8] sm:$0xf0] }
 0x37f   :  { %5039 = vmatpush.bf16.xpose.msrb.mxu3 %v5773_v3  ;;  %v5781_v3 = vor.u32 %v7431_v54, %v5778_v55 }
 0x381   :  { %v4794_v16 = vpop.f32.mrf.mxu0 }
 0x382   :  { %v4795_v18 = vadd.f32 %v4794_v16, %v4782_v40 }
 0x384   :  { %5001 = vmatmul.bf16.vlgmr.msrb.gmra.mxu0 %v497_v14  ;;  %5014 = vmatmul.bf16.vlgmr.msrb.gmra.mxu1 %v498_v20  ;;  %v245_v14 = vld.sshfl [vmem:[#allocation1 + $0x10] sm:$0xff pattern:$0x73625140]  ;;  %v4807_v20 = vpop.f32.mrf.mxu1 }
 0x385   :  { %5049 = vmatpush.bf16.xpose.msra.mxu0 %v7313_v4  ;;  %5062 = vmatpush.bf16.xpose.msra.mxu1 %v7317_v5  ;;  %v5785_v4 = vor.u32 %v7496_v57, %v5784_v56  ;;  %v7818_v5 = vld [vmem:[%s11143_s1 + $0xddc] sm:$0xf]  ;;  %v503_v24 = vpack.c.bf16 %v245_v14, %v245_v14  ;;  %v5792_v56 = vld [vmem:[%s11143_s1 + $0x1d0] sm:$0xf]  ;;  %v7345_v14 = vor.u32 %v7883_v2, %v7344_v1  ;;  %v5810_v2 = vld [vmem:[%s11143_s1 + $0x3e0] sm:$0xf0] }
 0x386   :  { %5075 = vmatpush.bf16.xpose.msra.mxu2 %v7321_v6  ;;  %5040 = vmatmul.bf16.vlgmr.msrb.gmra.mxu3 %v500_v25  ;;  %v7338_v6 = vld [vmem:[%s11143_s1 + $0xfd8] sm:$0xf0]  ;;  %v502_v25 = vpack.c.bf16 %v244_v15, %v244_v15  ;;  %v7497_v57 = vld [vmem:[%s11143_s1 + $0x3cc] sm:$0xf0] }
 0x387   :  { %5088 = vmatpush.bf16.xpose.msra.mxu3 %v7325_v7  ;;  %5027 = vmatmul.bf16.vlgmr.msrb.gmra.mxu2 %v499_v19  ;;  %v65_v7 = vld [vmem:[%s11144_s0 + $0xe8] sm:$0xff]  ;;  %v7341_v12 = vor.u32 %v7818_v5, %v7338_v6  ;;  %v501_v19 = vpack.c.bf16 %v243_v13, %v243_v13  ;;  %v7346_v5 = vld [vmem:[%s11143_s1 + $0xfe0] sm:$0xf0]  ;;  %v67_v1 = vld [vmem:[%s11144_s0 + $0xf8] sm:$0xff] }
 0x388   :  { %242 = vst [vmem:[#allocation1 + $0x20] ss:$4 sm:$0xff] %v65_v7  ;;  %v7352_v6 = vld [vmem:[%s11143_s1 + $0xde8] sm:$0xf] }
 0x389   :  { %v4833_v39 = vpop.f32.mrf.mxu3  ;;  %v4796_v40 = vpop.f32.mrf.mxu0  ;;  %v7884_v7 = vld [vmem:[%s11143_s1 + $0xfe4] sm:$0xf0] }
 0x38a   :  { %v4820_v37 = vpop.f32.mrf.mxu2  ;;  %v7353_v16 = vor.u32 %v7884_v7, %v7352_v6  ;;  %v5818_v6 = vld [vmem:[%s11143_s1 + $0x3e8] sm:$0xf0]  ;;  %v7360_v7 = vld [vmem:[%s11143_s1 + $0xdf0] sm:$0xf] }
 0x38c   :  { %v4809_v44 = vpop.f32.mrf.mxu1 }
 0x38d   :  { %5050 = vmatpush.bf16.xpose.msra.mxu0 %v6801_v28  ;;  %5063 = vmatpush.bf16.xpose.msra.mxu1 %v6805_v29  ;;  %v7754_v28 = vld [vmem:[%s11143_s1 + $0xbd4] sm:$0xf0]  ;;  %v4808_v29 = vadd.f32 %v4807_v20, %v4795_v18 }
 0x38e   :  { %5076 = vmatpush.bf16.xpose.msra.mxu2 %v6809_v30  ;;  %v504_v30 = vpack.c.bf16 %v246_v17, %v246_v17  ;;  %v6825_v35 = vor.u32 %v7754_v28, %v6824_v27  ;;  %v7755_v27 = vld [vmem:[%s11143_s1 + $0xbdc] sm:$0xf0]  ;;  %v7691_v28 = vld [vmem:[%s11143_s1 + $0x9e4] sm:$0xf] }
 0x38f   :  { %5089 = vmatpush.bf16.xpose.msra.mxu3 %v6813_v31  ;;  %v7690_v31 = vld [vmem:[%s11143_s1 + $0x9dc] sm:$0xf]  ;;  %v4821_v38 = vadd.f32 %v4820_v37, %v4808_v29  ;;  %v247_v18 = vld.sshfl [vmem:[#allocation1 + $0x20] sm:$0xff pattern:$0x73625140] }
 0x390   :  { %v6829_v36 = vor.u32 %v7690_v31, %v6826_v32  ;;  %v248_v20 = vld.sshfl [vmem:[#allocation1 + $0x28] sm:$0xff pattern:$0x73625140]  ;;  %v250_v22 = vld.sshfl [vmem:[#allocation1 + $0x38] sm:$0xff pattern:$0x73625140] }
 0x391   :  { %v4834_v45 = vadd.f32 %v4833_v39, %v4821_v38  ;;  %v4835_v58 = vpop.f32.mrf.mxu3  ;;  %v6834_v31 = vld [vmem:[%s11143_s1 + $0xbe0] sm:$0xf0]  ;;  %v6840_v32 = vld [vmem:[%s11143_s1 + $0x9e8] sm:$0xf]  ;;  %v6842_v37 = vld [vmem:[%s11143_s1 + $0xbe8] sm:$0xf0]  ;;  %v6833_v38 = vor.u32 %v7755_v27, %v6832_v26 }
 0x392   :  { %v4822_v55 = vpop.f32.mrf.mxu2  ;;  %v6837_v39 = vor.u32 %v7691_v28, %v6834_v31  ;;  %v6848_v31 = vld [vmem:[%s11143_s1 + $0x9f0] sm:$0xf] }
 0x393   :  { %v6330_v55 = vld [vmem:[%s11143_s1 + $0x7e8] sm:$0xf0] }
 0x395   :  { %5051 = vmatpush.bf16.xpose.msra.mxu0 %v6289_v46  ;;  %5064 = vmatpush.bf16.xpose.msra.mxu1 %v6293_v47  ;;  %v6306_v46 = vld [vmem:[%s11143_s1 + $0x7d0] sm:$0xf0]  ;;  %v6312_v47 = vld [vmem:[%s11143_s1 + $0x5d8] sm:$0xf] }
 0x396   :  { %5077 = vmatpush.bf16.xpose.msra.mxu2 %v6297_v48  ;;  %v7626_v48 = vld [vmem:[%s11143_s1 + $0x7d4] sm:$0xf0]  ;;  %v6309_v52 = vor.u32 %v7561_v43, %v6306_v46  ;;  %v6320_v46 = vld [vmem:[%s11143_s1 + $0x5e0] sm:$0xf] }
 0x397   :  { %5090 = vmatpush.bf16.xpose.msra.mxu3 %v6301_v49  ;;  %v7562_v49 = vld [vmem:[%s11143_s1 + $0x5dc] sm:$0xf]  ;;  %v6313_v53 = vor.u32 %v7626_v48, %v6312_v47  ;;  %v7627_v47 = vld [vmem:[%s11143_s1 + $0x7dc] sm:$0xf0]  ;;  %v7563_v48 = vld [vmem:[%s11143_s1 + $0x5e4] sm:$0xf] }
 0x398   :  { %v6317_v54 = vor.u32 %v7562_v49, %v6314_v50 }
 0x39d   :  { %5052 = vmatpush.bf16.xpose.msra.mxu0 %v5777_v63  ;;  %5065 = vmatpush.bf16.xpose.msra.mxu1 %v5781_v3  ;;  %v7434_v63 = vld [vmem:[%s11143_s1 + $0x1dc] sm:$0xf]  ;;  %v7819_v3 = vld [vmem:[%s11143_s1 + $0xde4] sm:$0xf] }
 0x39e   :  { %5078 = vmatpush.bf16.xpose.msra.mxu2 %v5785_v4  ;;  %v5793_v4 = vor.u32 %v7497_v57, %v5792_v56  ;;  %v5805_v13 = vor.u32 %v7434_v63, %v5802_v0  ;;  %v7349_v15 = vor.u32 %v7819_v3, %v7346_v5  ;;  %v6321_v56 = vor.u32 %v7627_v47, %v6320_v46  ;;  %v7435_v63 = vld [vmem:[%s11143_s1 + $0x1e4] sm:$0xf]  ;;  %v5816_v3 = vld [vmem:[%s11143_s1 + $0x1e8] sm:$0xf]  ;;  %v7436_v5 = vld [vmem:[%s11143_s1 + $0x1ec] sm:$0xf] }
 0x39f   :  { %5091 = vmatpush.bf16.xpose.msra.mxu3 %v5789_v8  ;;  %v5797_v8 = vor.u32 %v7433_v59, %v5794_v60  ;;  %v5808_v60 = vld [vmem:[%s11143_s1 + $0x1e0] sm:$0xf] }
 0x3a1   :  { %v4846_v21 = vpop.f32.mrf.mxu0 }
 0x3a2   :  { %v4847_v23 = vadd.f32 %v4846_v21, %v4834_v45 }
 0x3a4   :  { %5053 = vmatmul.bf16.vlgmr.msra.gmra.mxu0 %v501_v19  ;;  %5066 = vmatmul.bf16.vlgmr.msra.gmra.mxu1 %v502_v25  ;;  %v249_v19 = vld.sshfl [vmem:[#allocation1 + $0x30] sm:$0xff pattern:$0x73625140]  ;;  %v4859_v25 = vpop.f32.mrf.mxu1 }
 0x3a5   :  { %5101 = vmatpush.bf16.xpose.msrb.mxu0 %v7329_v9  ;;  %5114 = vmatpush.bf16.xpose.msrb.mxu1 %v7333_v10  ;;  %v5801_v9 = vor.u32 %v7498_v62, %v5800_v61  ;;  %v7820_v10 = vld [vmem:[%s11143_s1 + $0xdec] sm:$0xf]  ;;  %v507_v29 = vpack.c.bf16 %v249_v19, %v249_v19  ;;  %v7499_v62 = vld [vmem:[%s11143_s1 + $0x3dc] sm:$0xf0]  ;;  %252 = vst [vmem:[#allocation1 + $0x20] ss:$4 sm:$0xff] %v67_v1 }
 0x3a6   :  { %5127 = vmatpush.bf16.xpose.msrb.mxu2 %v7337_v11  ;;  %5092 = vmatmul.bf16.vlgmr.msra.gmra.mxu3 %v504_v30  ;;  %v7354_v11 = vld [vmem:[%s11143_s1 + $0xfe8] sm:$0xf0]  ;;  %v506_v30 = vpack.c.bf16 %v248_v20, %v248_v20 }
 0x3a7   :  { %5140 = vmatpush.bf16.xpose.msrb.mxu3 %v7341_v12  ;;  %5079 = vmatmul.bf16.vlgmr.msra.gmra.mxu2 %v503_v24  ;;  %v66_v12 = vld [vmem:[%s11144_s0 + $0xf0] sm:$0xff]  ;;  %v7357_v17 = vor.u32 %v7820_v10, %v7354_v11  ;;  %v505_v24 = vpack.c.bf16 %v247_v18, %v247_v18  ;;  %v5809_v10 = vor.u32 %v7499_v62, %v5808_v60  ;;  %v6346_v60 = vld [vmem:[%s11143_s1 + $0x7f8] sm:$0xf0] }
 0x3a8   :  { %251 = vst [vmem:[#allocation1] ss:$4 sm:$0xff] %v66_v12  ;;  %v7362_v11 = vld [vmem:[%s11143_s1 + $0xff0] sm:$0xf0]  ;;  %v7368_v12 = vld [vmem:[%s11143_s1 + $0xdf8] sm:$0xf]  ;;  %v5821_v18 = vor.u32 %v7436_v5, %v5818_v6 }
 0x3a9   :  { %v4885_v44 = vpop.f32.mrf.mxu3  ;;  %v4848_v45 = vpop.f32.mrf.mxu0  ;;  %v7437_v5 = vld [vmem:[%s11143_s1 + $0x1f4] sm:$0xf] }
 0x3aa   :  { %v4872_v42 = vpop.f32.mrf.mxu2  ;;  %v5826_v6 = vld [vmem:[%s11143_s1 + $0x3f0] sm:$0xf0] }
 0x3ac   :  { %v4861_v49 = vpop.f32.mrf.mxu1 }
 0x3ad   :  { %5102 = vmatpush.bf16.xpose.msrb.mxu0 %v6817_v33  ;;  %5115 = vmatpush.bf16.xpose.msrb.mxu1 %v6821_v34  ;;  %v7756_v33 = vld [vmem:[%s11143_s1 + $0xbe4] sm:$0xf0]  ;;  %v4860_v34 = vadd.f32 %v4859_v25, %v4847_v23 }
 0x3ae   :  { %5128 = vmatpush.bf16.xpose.msrb.mxu2 %v6825_v35  ;;  %v508_v35 = vpack.c.bf16 %v250_v22, %v250_v22  ;;  %v6841_v40 = vor.u32 %v7756_v33, %v6840_v32  ;;  %v7757_v32 = vld [vmem:[%s11143_s1 + $0xbec] sm:$0xf0]  ;;  %v7693_v33 = vld [vmem:[%s11143_s1 + $0x9f4] sm:$0xf] }
 0x3af   :  { %5141 = vmatpush.bf16.xpose.msrb.mxu3 %v6829_v36  ;;  %v7692_v36 = vld [vmem:[%s11143_s1 + $0x9ec] sm:$0xf]  ;;  %v4873_v43 = vadd.f32 %v4872_v42, %v4860_v34  ;;  %v253_v23 = vld.sshfl [vmem:[#allocation1] sm:$0xff pattern:$0x73625140] }
 0x3b0   :  { %v6845_v41 = vor.u32 %v7692_v36, %v6842_v37  ;;  %v254_v25 = vld.sshfl [vmem:[#allocation1 + $0x8] sm:$0xff pattern:$0x73625140]  ;;  %v256_v27 = vld.sshfl [vmem:[#allocation1 + $0x18] sm:$0xff pattern:$0x73625140] }
 0x3b1   :  { %v4886_v50 = vadd.f32 %v4885_v44, %v4873_v43  ;;  %v4887_v0 = vpop.f32.mrf.mxu3  ;;  %v6850_v36 = vld [vmem:[%s11143_s1 + $0xbf0] sm:$0xf0]  ;;  %v6856_v37 = vld [vmem:[%s11143_s1 + $0x9f8] sm:$0xf]  ;;  %v6858_v42 = vld [vmem:[%s11143_s1 + $0xbf8] sm:$0xf0]  ;;  %v6849_v43 = vor.u32 %v7757_v32, %v6848_v31 }
 0x3b2   :  { %v4874_v61 = vpop.f32.mrf.mxu2  ;;  %v6853_v44 = vor.u32 %v7693_v33, %v6850_v36 }
 0x3b5   :  { %5103 = vmatpush.bf16.xpose.msrb.mxu0 %v6305_v51  ;;  %5116 = vmatpush.bf16.xpose.msrb.mxu1 %v6309_v52  ;;  %v6322_v51 = vld [vmem:[%s11143_s1 + $0x7e0] sm:$0xf0]  ;;  %v6328_v52 = vld [vmem:[%s11143_s1 + $0x5e8] sm:$0xf] }
 0x3b6   :  { %5129 = vmatpush.bf16.xpose.msrb.mxu2 %v6313_v53  ;;  %v7628_v53 = vld [vmem:[%s11143_s1 + $0x7e4] sm:$0xf0]  ;;  %v6325_v57 = vor.u32 %v7563_v48, %v6322_v51  ;;  %v6336_v51 = vld [vmem:[%s11143_s1 + $0x5f0] sm:$0xf] }
 0x3b7   :  { %5142 = vmatpush.bf16.xpose.msrb.mxu3 %v6317_v54  ;;  %v7564_v54 = vld [vmem:[%s11143_s1 + $0x5ec] sm:$0xf]  ;;  %v6329_v58 = vor.u32 %v7628_v53, %v6328_v52  ;;  %v7629_v52 = vld [vmem:[%s11143_s1 + $0x7ec] sm:$0xf0]  ;;  %v7565_v53 = vld [vmem:[%s11143_s1 + $0x5f4] sm:$0xf] }
 0x3b8   :  { %v6333_v59 = vor.u32 %v7564_v54, %v6330_v55  ;;  %v6337_v61 = vor.u32 %v7629_v52, %v6336_v51 }
 0x3bd   :  { %5104 = vmatpush.bf16.xpose.msrb.mxu0 %v5793_v4  ;;  %5117 = vmatpush.bf16.xpose.msrb.mxu1 %v5797_v8  ;;  %v7500_v4 = vld [vmem:[%s11143_s1 + $0x3e4] sm:$0xf0]  ;;  %v7885_v8 = vld [vmem:[%s11143_s1 + $0xfec] sm:$0xf0] }
 0x3be   :  { %5130 = vmatpush.bf16.xpose.msrb.mxu2 %v5801_v9  ;;  %v7821_v9 = vld [vmem:[%s11143_s1 + $0xdf4] sm:$0xf]  ;;  %v7361_v19 = vor.u32 %v7885_v8, %v7360_v7  ;;  %v5832_v7 = vld [vmem:[%s11143_s1 + $0x1f8] sm:$0xf] }
 0x3bf   :  { %5143 = vmatpush.bf16.xpose.msrb.mxu3 %v5805_v13  ;;  %v7886_v13 = vld [vmem:[%s11143_s1 + $0xff4] sm:$0xf0]  ;;  %v7365_v20 = vor.u32 %v7821_v9, %v7362_v11  ;;  %v7438_v9 = vld [vmem:[%s11143_s1 + $0x1fc] sm:$0xf] }
 0x3c0   :  { %v7369_v21 = vor.u32 %v7886_v13, %v7368_v12  ;;  %v7502_v8 = vld [vmem:[%s11143_s1 + $0x3f4] sm:$0xf0]  ;;  %v5829_v12 = vor.u32 %v7437_v5, %v5826_v6 }
 0x3c1   :  { %v4898_v26 = vpop.f32.mrf.mxu0  ;;  %v5833_v13 = vor.u32 %v7502_v8, %v5832_v7  ;;  %v5275_v7 = vld [vmem:[%s11147_s3 + $0x38] sm:$0xff] }
 0x3c2   :  { %v4899_v28 = vadd.f32 %v4898_v26, %v4886_v50 }
 0x3c4   :  { %5105 = vmatmul.bf16.vlgmr.msrb.gmra.mxu0 %v505_v24  ;;  %5118 = vmatmul.bf16.vlgmr.msrb.gmra.mxu1 %v506_v30  ;;  %v255_v24 = vld.sshfl [vmem:[#allocation1 + $0x10] sm:$0xff pattern:$0x73625140]  ;;  %v4911_v30 = vpop.f32.mrf.mxu1 }
 0x3c5   :  { %5153 = vmatpush.bf16.xpose.msra.mxu0 %v7345_v14  ;;  %5166 = vmatpush.bf16.xpose.msra.mxu1 %v7349_v15  ;;  %v5813_v14 = vor.u32 %v7435_v63, %v5810_v2  ;;  %v5817_v15 = vor.u32 %v7500_v4, %v5816_v3  ;;  %v511_v34 = vpack.c.bf16 %v255_v24, %v255_v24  ;;  %v5824_v3 = vld [vmem:[%s11143_s1 + $0x1f0] sm:$0xf] }
 0x3c6   :  { %5179 = vmatpush.bf16.xpose.msra.mxu2 %v7353_v16  ;;  %5144 = vmatmul.bf16.vlgmr.msrb.gmra.mxu3 %v508_v35  ;;  %v7822_v16 = vld [vmem:[%s11143_s1 + $0xdfc] sm:$0xf]  ;;  %v510_v35 = vpack.c.bf16 %v254_v25, %v254_v25  ;;  %v7501_v4 = vld [vmem:[%s11143_s1 + $0x3ec] sm:$0xf0] }
 0x3c7   :  { %5192 = vmatpush.bf16.xpose.msra.mxu3 %v7357_v17  ;;  %5131 = vmatmul.bf16.vlgmr.msrb.gmra.mxu2 %v507_v29  ;;  %v7370_v17 = vld [vmem:[%s11143_s1 + $0xff8] sm:$0xf0]  ;;  %v509_v29 = vpack.c.bf16 %v253_v23, %v253_v23  ;;  %v5825_v11 = vor.u32 %v7501_v4, %v5824_v3 }
 0x3c8   :  { %v7373_v22 = vor.u32 %v7822_v16, %v7370_v17  ;;  %v258_v16 = vld.sshfl [vmem:[#allocation1 + $0x28] sm:$0xff pattern:$0x73625140]  ;;  %v259_v17 = vld.sshfl [vmem:[#allocation1 + $0x30] sm:$0xff pattern:$0x73625140] }
 0x3c9   :  { %v4937_v49 = vpop.f32.mrf.mxu3  ;;  %v4900_v50 = vpop.f32.mrf.mxu0  ;;  %v514_v23 = vpack.c.bf16 %v258_v16, %v258_v16  ;;  %v515_v24 = vpack.c.bf16 %v259_v17, %v259_v17  ;;  %v5272_v16 = vld [vmem:[%s11147_s3 + $0x20] sm:$0xff]  ;;  %v5271_v17 = vld [vmem:[%s11147_s3 + $0x18] sm:$0xff] }
 0x3ca   :  { %v4924_v47 = vpop.f32.mrf.mxu2 }
 0x3cc   :  { %v4913_v54 = vpop.f32.mrf.mxu1 }
 0x3cd   :  { %5154 = vmatpush.bf16.xpose.msra.mxu0 %v6833_v38  ;;  %5167 = vmatpush.bf16.xpose.msra.mxu1 %v6837_v39  ;;  %v7758_v38 = vld [vmem:[%s11143_s1 + $0xbf4] sm:$0xf0]  ;;  %v4912_v39 = vadd.f32 %v4911_v30, %v4899_v28 }
 0x3ce   :  { %5180 = vmatpush.bf16.xpose.msra.mxu2 %v6841_v40  ;;  %v512_v40 = vpack.c.bf16 %v256_v27, %v256_v27  ;;  %v6857_v45 = vor.u32 %v7758_v38, %v6856_v37 }
 0x3cf   :  { %5193 = vmatpush.bf16.xpose.msra.mxu3 %v6845_v41  ;;  %v7694_v41 = vld [vmem:[%s11143_s1 + $0x9fc] sm:$0xf]  ;;  %v4925_v48 = vadd.f32 %v4924_v47, %v4912_v39 }
 0x3d0   :  { %v6861_v46 = vor.u32 %v7694_v41, %v6858_v42 }
 0x3d1   :  { %v4938_v55 = vadd.f32 %v4937_v49, %v4925_v48  ;;  %v4939_v2 = vpop.f32.mrf.mxu3 }
 0x3d2   :  { %v4926_v1 = vpop.f32.mrf.mxu2  ;;  %v7892_v2 = vmov 0.0  }
 0x3d3   :  { %34 = vst.msk [vmem:[#allocation2] sm:$0x3] %vm33_vm0, %v7892_v2 }
 0x3d5   :  { %5155 = vmatpush.bf16.xpose.msra.mxu0 %v6321_v56  ;;  %5168 = vmatpush.bf16.xpose.msra.mxu1 %v6325_v57  ;;  %v6338_v56 = vld [vmem:[%s11143_s1 + $0x7f0] sm:$0xf0]  ;;  %v6344_v57 = vld [vmem:[%s11143_s1 + $0x5f8] sm:$0xf] }
 0x3d6   :  { %5181 = vmatpush.bf16.xpose.msra.mxu2 %v6329_v58  ;;  %v7630_v58 = vld [vmem:[%s11143_s1 + $0x7f4] sm:$0xf0]  ;;  %v6341_v62 = vor.u32 %v7565_v53, %v6338_v56 }
 0x3d7   :  { %5194 = vmatpush.bf16.xpose.msra.mxu3 %v6333_v59  ;;  %v7566_v59 = vld [vmem:[%s11143_s1 + $0x5fc] sm:$0xf]  ;;  %v6345_v63 = vor.u32 %v7630_v58, %v6344_v57 }
 0x3d8   :  { %v6349_v0 = vor.u32 %v7566_v59, %v6346_v60 }
 0x3dd   :  { %5156 = vmatpush.bf16.xpose.msra.mxu0 %v5809_v10  ;;  %5169 = vmatpush.bf16.xpose.msra.mxu1 %v5813_v14  ;;  %v5834_v10 = vld [vmem:[%s11143_s1 + $0x3f8] sm:$0xf0] }
 0x3de   :  { %5182 = vmatpush.bf16.xpose.msra.mxu2 %v5817_v15  ;;  %v5837_v14 = vor.u32 %v7438_v9, %v5834_v10  ;;  %v257_v15 = vld.sshfl [vmem:[#allocation1 + $0x20] sm:$0xff pattern:$0x73625140] }
 0x3df   :  { %5195 = vmatpush.bf16.xpose.msra.mxu3 %v5821_v18 }
 0x3e1   :  { %v4950_v18 = vpop.f32.mrf.mxu0 }
 0x3e4   :  { %5157 = vmatmul.bf16.vlgmr.msra.gmra.mxu0 %v509_v29  ;;  %5170 = vmatmul.bf16.vlgmr.msra.gmra.mxu1 %v510_v35 }
 0x3e5   :  { %5205 = vmatpush.bf16.xpose.msrb.mxu0 %v7361_v19  ;;  %5218 = vmatpush.bf16.xpose.msrb.mxu1 %v7365_v20  ;;  %v260_v19 = vld.sshfl [vmem:[#allocation1 + $0x38] sm:$0xff pattern:$0x73625140]  ;;  %v4951_v20 = vadd.f32 %v4950_v18, %v4938_v55 }
 0x3e6   :  { %5231 = vmatpush.bf16.xpose.msrb.mxu2 %v7369_v21  ;;  %5196 = vmatmul.bf16.vlgmr.msra.gmra.mxu3 %v512_v40  ;;  %v513_v21 = vpack.c.bf16 %v257_v15, %v257_v15  ;;  %v516_v25 = vpack.c.bf16 %v260_v19, %v260_v19  ;;  %v5273_v15 = vld [vmem:[%s11147_s3 + $0x28] sm:$0xff]  ;;  %v5270_v19 = vld [vmem:[%s11147_s3 + $0x10] sm:$0xff] }
 0x3e7   :  { %5244 = vmatpush.bf16.xpose.msrb.mxu3 %v7373_v22  ;;  %5183 = vmatmul.bf16.vlgmr.msra.gmra.mxu2 %v511_v34  ;;  %v4963_v22 = vpop.f32.mrf.mxu1 }
 0x3e8   :  { %v4964_v26 = vadd.f32 %v4963_v22, %v4951_v20 }
 0x3e9   :  { %v4989_v29 = vpop.f32.mrf.mxu3  ;;  %v4952_v30 = vpop.f32.mrf.mxu0 }
 0x3ea   :  { %v4976_v27 = vpop.f32.mrf.mxu2 }
 0x3eb   :  { %v4977_v28 = vadd.f32 %v4976_v27, %v4964_v26 }
 0x3ed   :  { %5206 = vmatpush.bf16.xpose.msrb.mxu0 %v6849_v43  ;;  %5219 = vmatpush.bf16.xpose.msrb.mxu1 %v6853_v44  ;;  %v4990_v32 = vadd.f32 %v4989_v29, %v4977_v28 }
 0x3ee   :  { %5232 = vmatpush.bf16.xpose.msrb.mxu2 %v6857_v45 }
 0x3ef   :  { %5245 = vmatpush.bf16.xpose.msrb.mxu3 %v6861_v46  ;;  %v4965_v31 = vpop.f32.mrf.mxu1 }
 0x3f1   :  { %v4991_v34 = vpop.f32.mrf.mxu3 }
 0x3f2   :  { %v4978_v33 = vpop.f32.mrf.mxu2 }
 0x3f5   :  { %5207 = vmatpush.bf16.xpose.msrb.mxu0 %v6337_v61  ;;  %5220 = vmatpush.bf16.xpose.msrb.mxu1 %v6341_v62 }
 0x3f6   :  { %5233 = vmatpush.bf16.xpose.msrb.mxu2 %v6345_v63 }
 0x3f7   :  { %5246 = vmatpush.bf16.xpose.msrb.mxu3 %v6349_v0 }
 0x3fd   :  { %5208 = vmatpush.bf16.xpose.msrb.mxu0 %v5825_v11  ;;  %5221 = vmatpush.bf16.xpose.msrb.mxu1 %v5829_v12  ;;  %v5274_v12 = vld [vmem:[%s11147_s3 + $0x30] sm:$0xff] }
 0x3fe   :  { %5234 = vmatpush.bf16.xpose.msrb.mxu2 %v5833_v13 }
 0x3ff   :  { %5247 = vmatpush.bf16.xpose.msrb.mxu3 %v5837_v14 }
 0x401   :  { %v5002_v35 = vpop.f32.mrf.mxu0  ;;  %v5015_v37 = vpop.f32.mrf.mxu1 }
 0x402   :  { %v5003_v36 = vadd.f32 %v5002_v35, %v4990_v32 }
 0x404   :  { %5209 = vmatmul.bf16.vlgmr.msrb.gmra.mxu0 %v513_v21  ;;  %5222 = vmatmul.bf16.vlgmr.msrb.gmra.mxu1 %v514_v23  ;;  %v5016_v38 = vadd.f32 %v5015_v37, %v5003_v36  ;;  %v5269_v23 = vld [vmem:[%s11147_s3 + $0x8] sm:$0xff] }
 0x405   :  { %5235 = vmatmul.bf16.vlgmr.msrb.gmra.mxu2 %v515_v24  ;;  %5292 = vmatpush.msra.mxu0 %v5275_v7  ;;  %v5268_v24 = vld [vmem:[%s11147_s3] sm:$0xff]  ;;  %v35_v36 = vld [vmem:[#allocation2] sm:$0x3] }
 0x406   :  { %5248 = vmatmul.bf16.vlgmr.msrb.gmra.mxu3 %v516_v25 }
 0x407   :  { %5293 = vmatpush.msra.mxu0 %v5274_v12 }
 0x409   :  { %v5041_v41 = vpop.f32.mrf.mxu3  ;;  %v5004_v42 = vpop.f32.mrf.mxu0  ;;  %5294 = vmatpush.msra.mxu0 %v5273_v15 }
 0x40a   :  { %v5028_v39 = vpop.f32.mrf.mxu2  ;;  %v5017_v43 = vpop.f32.mrf.mxu1  ;;  %v7888_v42 = vld [vmem:[%s11145_s2] ss:$0 sm:$0xff] }
 0x40b   :  { %v5029_v40 = vadd.f32 %v5028_v39, %v5016_v38  ;;  %5295 = vmatpush.msra.mxu0 %v5272_v16 }
 0x40d   :  { %v5042_v44 = vadd.f32 %v5041_v41, %v5029_v40  ;;  %5296 = vmatpush.msra.mxu0 %v5271_v17 }
 0x40f   :  { %5297 = vmatpush.msra.mxu0 %v5270_v19 }
 0x411   :  { %v5043_v46 = vpop.f32.mrf.mxu3  ;;  %5298 = vmatpush.msra.mxu0 %v5269_v23 }
 0x412   :  { %v5030_v45 = vpop.f32.mrf.mxu2 }
 0x413   :  { %5299 = vmatpush.msra.mxu0 %v5268_v24 }
 0x421   :  { %v5054_v47 = vpop.f32.mrf.mxu0  ;;  %v5067_v48 = vpop.f32.mrf.mxu1 }
 0x422   :  { %v5055_v63 = vadd.f32 %v5054_v47, %v5042_v44  ;;  %v12_v47 = vstv %s11149_s6 }
 0x423   :  { %13 = vst [vmem:[#allocation3] sm:$0x1] %v12_v47 }
 0x424   :  { %v5068_v0 = vadd.f32 %v5067_v48, %v5055_v63  ;;  %v7889_v48 = vld [vmem:[%s11146_s4] ss:$0 sm:$0xff] }
 0x429   :  { %v5093_v50 = vpop.f32.mrf.mxu3  ;;  %v5056_v51 = vpop.f32.mrf.mxu0 }
 0x42a   :  { %v5080_v49 = vpop.f32.mrf.mxu2  ;;  %v5069_v52 = vpop.f32.mrf.mxu1  ;;  %v7890_v51 = vld [vmem:[%s11148_s5] ss:$0 sm:$0xff] }
 0x42b   :  { %v5081_v1 = vadd.f32 %v5080_v49, %v5068_v0 }
 0x42d   :  { %v5094_v5 = vadd.f32 %v5093_v50, %v5081_v1 }
 0x431   :  { %v5095_v54 = vpop.f32.mrf.mxu3 }
 0x432   :  { %v5082_v53 = vpop.f32.mrf.mxu2 }
 0x441   :  { %v5106_v55 = vpop.f32.mrf.mxu0  ;;  %v5119_v56 = vpop.f32.mrf.mxu1 }
 0x442   :  { %v5107_v6 = vadd.f32 %v5106_v55, %v5094_v5 }
 0x444   :  { %v5120_v9 = vadd.f32 %v5119_v56, %v5107_v6  ;;  %v7891_v56 = vld [vmem:[#allocation3] ss:$0 sm:$0xff] }
 0x449   :  { %v5145_v58 = vpop.f32.mrf.mxu3  ;;  %v5108_v59 = vpop.f32.mrf.mxu0 }
 0x44a   :  { %v5132_v57 = vpop.f32.mrf.mxu2  ;;  %v5121_v60 = vpop.f32.mrf.mxu1 }
 0x44b   :  { %v5133_v14 = vadd.f32 %v5132_v57, %v5120_v9 }
 0x44d   :  { %v5146_v18 = vadd.f32 %v5145_v58, %v5133_v14 }
 0x451   :  { %v5147_v62 = vpop.f32.mrf.mxu3 }
 0x452   :  { %v5134_v61 = vpop.f32.mrf.mxu2 }
 0x461   :  { %v5158_v3 = vpop.f32.mrf.mxu0  ;;  %v5171_v4 = vpop.f32.mrf.mxu1 }
 0x462   :  { %v5159_v21 = vadd.f32 %v5158_v3, %v5146_v18 }
 0x464   :  { %v5172_v25 = vadd.f32 %v5171_v4, %v5159_v21 }
 0x469   :  { %v5197_v10 = vpop.f32.mrf.mxu3  ;;  %v5160_v11 = vpop.f32.mrf.mxu0 }
 0x46a   :  { %v5184_v8 = vpop.f32.mrf.mxu2  ;;  %v5173_v13 = vpop.f32.mrf.mxu1 }
 0x46b   :  { %v5185_v26 = vadd.f32 %v5184_v8, %v5172_v25 }
 0x46d   :  { %v5198_v27 = vadd.f32 %v5197_v10, %v5185_v26 }
 0x471   :  { %v5199_v22 = vpop.f32.mrf.mxu3 }
 0x472   :  { %v5186_v20 = vpop.f32.mrf.mxu2 }
 0x481   :  { %v5210_v28 = vpop.f32.mrf.mxu0  ;;  %v5223_v29 = vpop.f32.mrf.mxu1 }
 0x482   :  { %v5211_v30 = vadd.f32 %v5210_v28, %v5198_v27 }
 0x484   :  { %v5224_v31 = vadd.f32 %v5223_v29, %v5211_v30 }
 0x488   :  { %v5236_v32 = vpop.f32.mrf.mxu2 }
 0x489   :  { %v5237_v33 = vadd.f32 %v5236_v32, %v5224_v31  ;;  %v5249_v34 = vpop.f32.mrf.mxu3  ;;  %v5212_v35 = vpop.f32.mrf.mxu0 }
 0x48a   :  { %v5225_v37 = vpop.f32.mrf.mxu1 }
 0x48b   :  { %v5250_v38 = vadd.f32 %v5249_v34, %v5237_v33 }
 0x48d   :  { %v5253_v39 = vadd.f32 %v5250_v38, %v35_v36 }
 0x48f   :  { %5255 = vst.msk [vmem:[#allocation2] sm:$0x3] %vm33_vm0, %v5253_v39 }
 0x490   :  { %v5238_v40 = vpop.f32.mrf.mxu2 }
 0x491   :  { %v5251_v41 = vpop.f32.mrf.mxu3 }
 0x496   :  { %v5259_v43 = vld [vmem:[#allocation2] sm:$0x3] }
 0x497   :  { %v5264_v44 = vadd.f32 %v7888_v42, %v5259_v43 }
 0x499   :  { %vm5265_vm1 = vcmp.gt.f32.partialorder %v5264_v44, 0.0  ;;  %v5266_v45 = vmul.f32 0.2, %v5264_v44 }
 0x49b   :  { %v5267_v46 = vsel %vm5265_vm1, %v5264_v44, %v5266_v45 }
 0x49c   :  { %7374 = vmatmul.msk.f32.vlgmr.msra.gmra.mxu0 %vm5280_vm2, %v5267_v46 }
 0x519   :  { %v5301_v49 = vpop.f32.mrf.mxu0 }
 0x51a   :  { %v5302_v50 = vadd.f32 %v7889_v48, %v5301_v49 }
 0x51c   :  { %v5305_v52 = vmul.f32 0.2, %v5302_v50  ;;  %vm5304_vm3 = vcmp.gt.f32.partialorder %v5302_v50, 0.0 }
 0x51e   :  { %v5306_v53 = vsel %vm5304_vm3, %v5302_v50, %v5305_v52 }
 0x51f   :  { %v5311_v54 = vmul.f32 %v7890_v51, %v5306_v53 }
 0x521   :  { %v5312_v55 = vsel %vm33_vm0, %v5311_v54, 0.0 }
 0x522   :  { %5313 = vadd.xlane.f32.xlu0 %v5312_v55 }
 0x595   :  { %v5314_v57 = vpop.xlane.xlu0 %5313 }
 0x596   :  { %v5319_v58 = vadd.f32 %v7891_v56, %v5314_v57 }
 0x598   :  { %5321 = vst.msk [vmem:[%s11150_s7] sm:$0x3] %vm5320_vm4, %v5319_v58 }

</bundles_post_ra>
